<compile_context>
chip_gen: v6e
topology: v6e:2x2x1
jax: 0.10.0
libtpu: 0.0.40
codegen_flags: <defaults>
</compile_context>

<pallas_src>
import functools

import jax
import jax.numpy as jnp
from jax.experimental import pallas as pl
from jax.experimental.pallas import tpu as pltpu


def asym_bicha_fuse_kernel(
    xh_ref, xl_ref,
    td_w1t_ref, td_b1t_ref, td_w2_ref, td_b2_ref,
    bu_w1_ref, bu_b1_ref, bu_w2_ref, bu_b2_ref,
    post_w_ref, post_b_ref,
    out_ref,
    im2col_ref,
    *, H, W,
):
    HW = H * W
    C = xh_ref.shape[-1]
    bf = jnp.bfloat16

    xh2 = xh_ref[0]                                     # (HW, C) f32
    xl2 = xl_ref[0]                                     # (HW, C) f32

    # ---- topdown(xh): global avg-pool -> 1x1 conv(+BN) -> ReLU -> 1x1 conv(+BN)
    # -> sigmoid.  M=1 matmuls are kept off the MXU (pure VPU/XLU work).
    pooled = jnp.sum(xh2, axis=0, keepdims=True) * (1.0 / float(HW))           # (1, C)
    t1 = jnp.sum(td_w1t_ref[...] * pooled, axis=1, keepdims=True) + td_b1t_ref[...]
    t1 = jnp.maximum(t1, 0.0)                                                  # (Cb, 1)
    td = jnp.sum(t1 * td_w2_ref[...], axis=0, keepdims=True) + td_b2_ref[...]
    td = jax.nn.sigmoid(td)                                                    # (1, C)

    # ---- bottomup(xl): per-pixel 1x1 conv(+BN) -> ReLU -> 1x1 conv(+BN) -> sigmoid
    # bf16 MXU operands, f32 accumulation; bottleneck dim zero-padded to 128.
    b1 = jnp.dot(xl2.astype(bf), bu_w1_ref[...],
                 preferred_element_type=jnp.float32) + bu_b1_ref[...]
    b1 = jnp.maximum(b1, 0.0)                                                  # (HW, Cbp)
    bu = jnp.dot(b1.astype(bf), bu_w2_ref[...],
                 preferred_element_type=jnp.float32) + bu_b2_ref[...]
    bu = jax.nn.sigmoid(bu)                                                    # (HW, C)

    # ---- fuse: xs = 2*xl*topdown_wei + 2*xh*bottomup_wei
    xs = 2.0 * (xl2 * td + xh2 * bu)                                           # (HW, C) f32

    # ---- post: 3x3 conv (padding=1, BN folded) + ReLU.
    # Single-ky slab: rows [W, W+HW) hold [xs(p-1) | xs(p) | xs(p+1)] (column
    # taps, edge-masked), rows [0, W) and [W+HW, W+2W) are the zero halo for
    # the ky padding.  The conv is 3 accumulating matmuls on W-row-shifted
    # views of the slab.  pltpu.roll follows np.roll: roll(x, 1)[p] == x[p-1].
    # NOTE: W must be a multiple of 16 so the bf16 row-offset stores/loads stay
    # sublane-aligned (perf, not correctness).
    col = jax.lax.broadcasted_iota(jnp.int32, (HW, 1), 0) % W
    left = jnp.where(col == 0, 0.0, pltpu.roll(xs, 1, axis=0))                 # xs at p-1
    right = jnp.where(col == W - 1, 0.0, pltpu.roll(xs, HW - 1, axis=0))       # xs at p+1

    im2col_ref[0:W, :] = jnp.zeros((W, 3 * C), bf)                             # top halo
    im2col_ref[HW + W:HW + 2 * W, :] = jnp.zeros((W, 3 * C), bf)               # bottom halo
    im2col_ref[W:W + HW, 0:C] = left.astype(bf)                                # kx = 0
    im2col_ref[W:W + HW, C:2 * C] = xs.astype(bf)                              # kx = 1
    im2col_ref[W:W + HW, 2 * C:3 * C] = right.astype(bf)                       # kx = 2

    acc = jnp.dot(im2col_ref[0:HW, :], post_w_ref[0],                          # ky = 0 (row above)
                  preferred_element_type=jnp.float32)
    acc += jnp.dot(im2col_ref[W:W + HW, :], post_w_ref[1],                     # ky = 1 (same row)
                   preferred_element_type=jnp.float32)
    acc += jnp.dot(im2col_ref[2 * W:2 * W + HW, :], post_w_ref[2],             # ky = 2 (row below)
                   preferred_element_type=jnp.float32)
    acc += post_b_ref[...]
    out_ref[0] = jnp.maximum(acc, 0.0)


def asym_bicha_fuse(xh, xl, p):
    B, H, W, C = xh.shape
    Cb = p["td_w1"].shape[1]
    Cbp = ((Cb + 127) // 128) * 128          # lane-dense padded bottleneck width
    HW = H * W
    bf = jnp.bfloat16
    f32 = jnp.float32

    # Zero-pad the bottomup bottleneck (exactly equivalent through the ReLU).
    bu_w1 = jnp.zeros((C, Cbp), f32).at[:, :Cb].set(p["bu_w1"]).astype(bf)
    bu_b1 = jnp.zeros((1, Cbp), f32).at[:, :Cb].set(p["bu_b1"])
    bu_w2 = jnp.zeros((Cbp, C), f32).at[:Cb, :].set(p["bu_w2"]).astype(bf)

    # (3, 3C, C): per-ky weight slab matching the [left|center|right] layout.
    post_w = p["post_w"].reshape(3, 3 * C, C).astype(bf)

    x_spec = pl.BlockSpec((1, HW, C), lambda b: (b, 0, 0))

    def full_spec(shape):
        return pl.BlockSpec(shape, lambda b, n=len(shape): (0,) * n)

    out = pl.pallas_call(
        functools.partial(asym_bicha_fuse_kernel, H=H, W=W),
        out_shape=jax.ShapeDtypeStruct((B, HW, C), f32),
        grid=(B,),
        in_specs=[
            x_spec, x_spec,
            full_spec((Cb, C)), full_spec((Cb, 1)),          # topdown conv1 (transposed), bias
            full_spec((Cb, C)), full_spec((1, C)),           # topdown conv2, bias
            full_spec((C, Cbp)), full_spec((1, Cbp)),        # bottomup conv1 (bf16, padded), bias
            full_spec((Cbp, C)), full_spec((1, C)),          # bottomup conv2 (bf16, padded), bias
            full_spec((3, 3 * C, C)), full_spec((1, C)),     # post 3x3 conv (bf16, per-ky), bias
        ],
        out_specs=x_spec,
        scratch_shapes=[pltpu.VMEM((HW + 2 * W, 3 * C), bf)],   # single-ky im2col slab (+halo)
        compiler_params=pltpu.CompilerParams(
            dimension_semantics=("parallel",),
            vmem_limit_bytes=32 * 1024 * 1024,
        ),
    )(
        xh.reshape(B, HW, C), xl.reshape(B, HW, C),
        p["td_w1"].T, p["td_b1"].T, p["td_w2"], p["td_b2"],
        bu_w1, bu_b1, bu_w2, p["bu_b2"],
        post_w, p["post_b"],
    )
    return out.reshape(B, H, W, C)


# ---------------- deterministic parameter construction (BN folded) ----------------
def make_params(key, C, r):
    Cb = C // r
    eps = 1e-5
    ks = jax.random.split(key, 10)

    def dense(k, cin, cout):
        kw, kb = jax.random.split(k)
        w = jax.random.normal(kw, (cin, cout), jnp.float32) / jnp.sqrt(float(cin))
        b = 0.1 * jax.random.normal(kb, (1, cout), jnp.float32)
        return w, b

    def bn(k, c):
        kg, kb = jax.random.split(k)
        gamma = 1.0 + 0.1 * jax.random.normal(kg, (c,), jnp.float32)
        beta = 0.1 * jax.random.normal(kb, (c,), jnp.float32)
        mean = jnp.zeros((c,), jnp.float32)   # eval-mode running stats (fresh module)
        var = jnp.ones((c,), jnp.float32)
        return gamma, beta, mean, var

    def fold(w, b, bn_params):
        gamma, beta, mean, var = bn_params
        scale = gamma / jnp.sqrt(var + eps)                       # (cout,)
        w_eff = w * scale[None, :]
        b_eff = (b - mean[None, :]) * scale[None, :] + beta[None, :]
        return w_eff, b_eff

    td_w1, td_b1 = fold(*dense(ks[0], C, Cb), bn(ks[1], Cb))
    td_w2, td_b2 = fold(*dense(ks[2], Cb, C), bn(ks[3], C))
    bu_w1, bu_b1 = fold(*dense(ks[4], C, Cb), bn(ks[5], Cb))
    bu_w2, bu_b2 = fold(*dense(ks[6], Cb, C), bn(ks[7], C))

    # 3x3 conv: weights stored as (ky, kx, Cin, Cout) -> folded -> (9*C, C)
    kw, kb = jax.random.split(ks[8])
    pw = jax.random.normal(kw, (3, 3, C, C), jnp.float32) / jnp.sqrt(9.0 * C)
    pb = 0.1 * jax.random.normal(kb, (1, C), jnp.float32)
    gamma, beta, mean, var = bn(ks[9], C)
    scale = gamma / jnp.sqrt(var + eps)
    pw = (pw * scale[None, None, None, :]).reshape(9 * C, C)
    pb = (pb - mean[None, :]) * scale[None, :] + beta[None, :]

    return dict(td_w1=td_w1, td_b1=td_b1, td_w2=td_w2, td_b2=td_b2,
                bu_w1=bu_w1, bu_b1=bu_b1, bu_w2=bu_w2, bu_b2=bu_b2,
                post_w=pw, post_b=pb)


# ---------------- pure-JAX f32 reference (same folded params) ----------------
def reference(xh, xl, p):
    B, H, W, C = xh.shape
    pooled = xh.mean(axis=(1, 2))                                   # (B, C)
    t = jax.nn.relu(pooled @ p["td_w1"] + p["td_b1"])
    td = jax.nn.sigmoid(t @ p["td_w2"] + p["td_b2"])                # (B, C)

    xhf = xh.reshape(B, H * W, C)
    xlf = xl.reshape(B, H * W, C)
    bu = jax.nn.relu(xlf @ p["bu_w1"] + p["bu_b1"])
    bu = jax.nn.sigmoid(bu @ p["bu_w2"] + p["bu_b2"])               # (B, HW, C)

    xs = 2.0 * xlf * td[:, None, :] + 2.0 * xhf * bu
    xs = xs.reshape(B, H, W, C)
    xsp = jnp.pad(xs, ((0, 0), (1, 1), (1, 1), (0, 0)))
    w = p["post_w"].reshape(3, 3, C, C)
    out = jnp.zeros((B, H, W, C), jnp.float32)
    for ky in range(3):
        for kx in range(3):
            out = out + jnp.einsum("bhwc,cd->bhwd",
                                   xsp[:, ky:ky + H, kx:kx + W, :], w[ky, kx])
    out = out + p["post_b"][None, :, :]
    return jax.nn.relu(out)


if __name__ == "__main__":
    B, C, H, W, r = 2, 64, 16, 16, 4
    key = jax.random.PRNGKey(0)
    k1, k2, k3 = jax.random.split(key, 3)
    xh = jax.random.normal(k1, (B, H, W, C), jnp.float32)
    xl = jax.random.normal(k2, (B, H, W, C), jnp.float32)
    params = make_params(k3, C, r)

    out = asym_bicha_fuse(xh, xl, params)
    out = jax.block_until_ready(out)

    ref = reference(xh, xl, params)
    err = float(jnp.max(jnp.abs(out - ref)))
    assert out.shape == (B, H, W, C)
    # bf16 MXU operands (f32 accumulate) -> tolerance loosened vs pure-f32 reference.
    assert jnp.allclose(out, ref, atol=1e-1, rtol=1e-1), f"max abs err {err}"
    print("KERNEL_OK")
</pallas_src>

<mosaic_0001>
module attributes {stable_mosaic.version = 11 : i64} {
  func.func @asym_bicha_fuse_kernel(%arg0: i32, %arg1: memref<1x256x64xf32, #tpu.memory_space<vmem>>, %arg2: memref<1x256x64xf32, #tpu.memory_space<vmem>>, %arg3: memref<16x64xf32, #tpu.memory_space<vmem>>, %arg4: memref<16x1xf32, #tpu.memory_space<vmem>>, %arg5: memref<16x64xf32, #tpu.memory_space<vmem>>, %arg6: memref<1x64xf32, #tpu.memory_space<vmem>>, %arg7: memref<64x128xbf16, #tpu.memory_space<vmem>>, %arg8: memref<1x128xf32, #tpu.memory_space<vmem>>, %arg9: memref<128x64xbf16, #tpu.memory_space<vmem>>, %arg10: memref<1x64xf32, #tpu.memory_space<vmem>>, %arg11: memref<3x192x64xbf16, #tpu.memory_space<vmem>>, %arg12: memref<1x64xf32, #tpu.memory_space<vmem>>, %arg13: memref<1x256x64xf32, #tpu.memory_space<vmem>>, %arg14: memref<288x192xbf16, #tpu.memory_space<vmem>>) attributes {dimension_semantics = [#tpu.dimension_semantics<parallel>], iteration_bounds = array<i64: 2>, scalar_prefetch = 0 : i64, scratch_operands = 1 : i64, tpu.core_type = #tpu.core_type<tc>, window_params = [{transform_indices = @transform_0, window_bounds = array<i64: 1, 256, 64>}, {transform_indices = @transform_1, window_bounds = array<i64: 1, 256, 64>}, {pipeline_mode = #tpu.pipeline_mode<synchronous>, transform_indices = @transform_2, window_bounds = array<i64: 16, 64>}, {pipeline_mode = #tpu.pipeline_mode<synchronous>, transform_indices = @transform_3, window_bounds = array<i64: 16, 1>}, {pipeline_mode = #tpu.pipeline_mode<synchronous>, transform_indices = @transform_4, window_bounds = array<i64: 16, 64>}, {pipeline_mode = #tpu.pipeline_mode<synchronous>, transform_indices = @transform_5, window_bounds = array<i64: 1, 64>}, {pipeline_mode = #tpu.pipeline_mode<synchronous>, transform_indices = @transform_6, window_bounds = array<i64: 64, 128>}, {pipeline_mode = #tpu.pipeline_mode<synchronous>, transform_indices = @transform_7, window_bounds = array<i64: 1, 128>}, {pipeline_mode = #tpu.pipeline_mode<synchronous>, transform_indices = @transform_8, window_bounds = array<i64: 128, 64>}, {pipeline_mode = #tpu.pipeline_mode<synchronous>, transform_indices = @transform_9, window_bounds = array<i64: 1, 64>}, {pipeline_mode = #tpu.pipeline_mode<synchronous>, transform_indices = @transform_10, window_bounds = array<i64: 3, 192, 64>}, {pipeline_mode = #tpu.pipeline_mode<synchronous>, transform_indices = @transform_11, window_bounds = array<i64: 1, 64>}, {transform_indices = @transform_12, window_bounds = array<i64: 1, 256, 64>}]} {
    %c0 = arith.constant 0 : index
    %c0_0 = arith.constant 0 : index
    %c0_1 = arith.constant 0 : index
    %0 = vector.load %arg1[%c0, %c0_0, %c0_1] : memref<1x256x64xf32, #tpu.memory_space<vmem>>, vector<1x256x64xf32>
    %1 = vector.shape_cast %0 : vector<1x256x64xf32> to vector<256x64xf32>
    %c0_2 = arith.constant 0 : index
    %c0_3 = arith.constant 0 : index
    %c0_4 = arith.constant 0 : index
    %2 = vector.load %arg2[%c0_2, %c0_3, %c0_4] : memref<1x256x64xf32, #tpu.memory_space<vmem>>, vector<1x256x64xf32>
    %3 = vector.shape_cast %2 : vector<1x256x64xf32> to vector<256x64xf32>
    %cst = arith.constant dense<0.000000e+00> : vector<64xf32>
    %4 = vector.multi_reduction <add>, %1, %cst [0] : vector<256x64xf32> to vector<64xf32>
    %5 = vector.shape_cast %4 : vector<64xf32> to vector<1x64xf32>
    %cst_5 = arith.constant 3.906250e-03 : f32
    %6 = vector.broadcast %cst_5 : f32 to vector<1x64xf32>
    %7 = arith.mulf %5, %6 : vector<1x64xf32>
    %c0_6 = arith.constant 0 : index
    %c0_7 = arith.constant 0 : index
    %8 = vector.load %arg3[%c0_6, %c0_7] : memref<16x64xf32, #tpu.memory_space<vmem>>, vector<16x64xf32>
    %9 = vector.broadcast %7 : vector<1x64xf32> to vector<16x64xf32>
    %10 = arith.mulf %8, %9 : vector<16x64xf32>
    %cst_8 = arith.constant dense<0.000000e+00> : vector<16xf32>
    %11 = vector.multi_reduction <add>, %10, %cst_8 [1] : vector<16x64xf32> to vector<16xf32>
    %12 = vector.shape_cast %11 : vector<16xf32> to vector<16x1xf32>
    %c0_9 = arith.constant 0 : index
    %c0_10 = arith.constant 0 : index
    %13 = vector.load %arg4[%c0_9, %c0_10] : memref<16x1xf32, #tpu.memory_space<vmem>>, vector<16x1xf32>
    %14 = arith.addf %12, %13 : vector<16x1xf32>
    %cst_11 = arith.constant 0.000000e+00 : f32
    %15 = vector.broadcast %cst_11 : f32 to vector<16x1xf32>
    %16 = arith.maximumf %14, %15 : vector<16x1xf32>
    %c0_12 = arith.constant 0 : index
    %c0_13 = arith.constant 0 : index
    %17 = vector.load %arg5[%c0_12, %c0_13] : memref<16x64xf32, #tpu.memory_space<vmem>>, vector<16x64xf32>
    %18 = vector.broadcast %16 : vector<16x1xf32> to vector<16x64xf32>
    %19 = arith.mulf %18, %17 : vector<16x64xf32>
    %cst_14 = arith.constant dense<0.000000e+00> : vector<64xf32>
    %20 = vector.multi_reduction <add>, %19, %cst_14 [0] : vector<16x64xf32> to vector<64xf32>
    %21 = vector.shape_cast %20 : vector<64xf32> to vector<1x64xf32>
    %c0_15 = arith.constant 0 : index
    %c0_16 = arith.constant 0 : index
    %22 = vector.load %arg6[%c0_15, %c0_16] : memref<1x64xf32, #tpu.memory_space<vmem>>, vector<1x64xf32>
    %23 = arith.addf %21, %22 : vector<1x64xf32>
    %24 = arith.negf %23 : vector<1x64xf32>
    %25 = math.exp %24 : vector<1x64xf32>
    %cst_17 = arith.constant 1.000000e+00 : f32
    %26 = vector.broadcast %cst_17 : f32 to vector<1x64xf32>
    %27 = arith.addf %26, %25 : vector<1x64xf32>
    %28 = arith.divf %26, %27 : vector<1x64xf32>
    %29 = arith.truncf %3 : vector<256x64xf32> to vector<256x64xbf16>
    %c0_18 = arith.constant 0 : index
    %c0_19 = arith.constant 0 : index
    %30 = vector.load %arg7[%c0_18, %c0_19] : memref<64x128xbf16, #tpu.memory_space<vmem>>, vector<64x128xbf16>
    %cst_20 = arith.constant dense<0.000000e+00> : vector<256x128xf32>
    %31 = tpu.matmul %29, %30, %cst_20 {dimension_numbers = #tpu.dot_dimension_numbers<[1], [0], [0], [1], [0, 0, 1, 1], [], []>} : vector<256x64xbf16>, vector<64x128xbf16>, vector<256x128xf32> -> vector<256x128xf32>
    %c0_21 = arith.constant 0 : index
    %c0_22 = arith.constant 0 : index
    %32 = vector.load %arg8[%c0_21, %c0_22] : memref<1x128xf32, #tpu.memory_space<vmem>>, vector<1x128xf32>
    %33 = vector.broadcast %32 : vector<1x128xf32> to vector<256x128xf32>
    %34 = arith.addf %31, %33 : vector<256x128xf32>
    %cst_23 = arith.constant 0.000000e+00 : f32
    %35 = vector.broadcast %cst_23 : f32 to vector<256x128xf32>
    %36 = arith.maximumf %34, %35 : vector<256x128xf32>
    %37 = arith.truncf %36 : vector<256x128xf32> to vector<256x128xbf16>
    %c0_24 = arith.constant 0 : index
    %c0_25 = arith.constant 0 : index
    %38 = vector.load %arg9[%c0_24, %c0_25] : memref<128x64xbf16, #tpu.memory_space<vmem>>, vector<128x64xbf16>
    %cst_26 = arith.constant dense<0.000000e+00> : vector<256x64xf32>
    %39 = tpu.matmul %37, %38, %cst_26 {dimension_numbers = #tpu.dot_dimension_numbers<[1], [0], [0], [1], [0, 0, 1, 1], [], []>} : vector<256x128xbf16>, vector<128x64xbf16>, vector<256x64xf32> -> vector<256x64xf32>
    %c0_27 = arith.constant 0 : index
    %c0_28 = arith.constant 0 : index
    %40 = vector.load %arg10[%c0_27, %c0_28] : memref<1x64xf32, #tpu.memory_space<vmem>>, vector<1x64xf32>
    %41 = vector.broadcast %40 : vector<1x64xf32> to vector<256x64xf32>
    %42 = arith.addf %39, %41 : vector<256x64xf32>
    %43 = arith.negf %42 : vector<256x64xf32>
    %44 = math.exp %43 : vector<256x64xf32>
    %cst_29 = arith.constant 1.000000e+00 : f32
    %45 = vector.broadcast %cst_29 : f32 to vector<256x64xf32>
    %46 = arith.addf %45, %44 : vector<256x64xf32>
    %47 = arith.divf %45, %46 : vector<256x64xf32>
    %48 = vector.broadcast %28 : vector<1x64xf32> to vector<256x64xf32>
    %49 = arith.mulf %3, %48 : vector<256x64xf32>
    %50 = arith.mulf %1, %47 : vector<256x64xf32>
    %51 = arith.addf %49, %50 : vector<256x64xf32>
    %cst_30 = arith.constant 2.000000e+00 : f32
    %52 = vector.broadcast %cst_30 : f32 to vector<256x64xf32>
    %53 = arith.mulf %52, %51 : vector<256x64xf32>
    %54 = tpu.iota {dimensions = array<i32: 0>} : vector<256x1xi32>
    %c16_i32 = arith.constant 16 : i32
    %c0_i32 = arith.constant 0 : i32
    %55 = arith.cmpi eq, %c16_i32, %c0_i32 : i32
    %c1_i32 = arith.constant 1 : i32
    %56 = arith.select %55, %c1_i32, %c16_i32 : i32
    %57 = vector.broadcast %56 : i32 to vector<256x1xi32>
    %58 = arith.remsi %54, %57 : vector<256x1xi32>
    %c0_i32_31 = arith.constant 0 : i32
    %59 = vector.broadcast %c0_i32_31 : i32 to vector<256x1xi32>
    %60 = arith.cmpi ne, %58, %59 : vector<256x1xi32>
    %c0_i32_32 = arith.constant 0 : i32
    %61 = vector.broadcast %c0_i32_32 : i32 to vector<256x1xi32>
    %62 = arith.cmpi slt, %58, %61 : vector<256x1xi32>
    %c0_i32_33 = arith.constant 0 : i32
    %63 = arith.cmpi slt, %56, %c0_i32_33 : i32
    %64 = vector.broadcast %63 : i1 to vector<256x1xi1>
    %65 = vector.broadcast %64 : vector<256x1xi1> to vector<256x1xi1>
    %66 = arith.xori %62, %65 : vector<256x1xi1>
    %67 = arith.andi %66, %60 : vector<256x1xi1>
    %68 = vector.broadcast %56 : i32 to vector<256x1xi32>
    %69 = arith.addi %58, %68 : vector<256x1xi32>
    %70 = arith.select %67, %69, %58 : vector<256x1xi1>, vector<256x1xi32>
    %c0_i32_34 = arith.constant 0 : i32
    %71 = vector.broadcast %c0_i32_34 : i32 to vector<256x1xi32>
    %72 = arith.cmpi eq, %70, %71 : vector<256x1xi32>
    %c1_i32_35 = arith.constant 1 : i32
    %73 = tpu.dynamic_rotate %53 by %c1_i32_35 dim 0 : vector<256x64xf32>, i32 -> vector<256x64xf32>
    %cst_36 = arith.constant 0.000000e+00 : f32
    %74 = vector.shape_cast %72 : vector<256x1xi1> to vector<256x1xi1>
    %75 = vector.broadcast %74 : vector<256x1xi1> to vector<256x64xi1>
    %76 = vector.broadcast %cst_36 : f32 to vector<256x64xf32>
    %77 = arith.select %75, %76, %73 : vector<256x64xi1>, vector<256x64xf32>
    %c15_i32 = arith.constant 15 : i32
    %78 = vector.broadcast %c15_i32 : i32 to vector<256x1xi32>
    %79 = arith.cmpi eq, %70, %78 : vector<256x1xi32>
    %c255_i32 = arith.constant 255 : i32
    %80 = tpu.dynamic_rotate %53 by %c255_i32 dim 0 : vector<256x64xf32>, i32 -> vector<256x64xf32>
    %cst_37 = arith.constant 0.000000e+00 : f32
    %81 = vector.shape_cast %79 : vector<256x1xi1> to vector<256x1xi1>
    %82 = vector.broadcast %81 : vector<256x1xi1> to vector<256x64xi1>
    %83 = vector.broadcast %cst_37 : f32 to vector<256x64xf32>
    %84 = arith.select %82, %83, %80 : vector<256x64xi1>, vector<256x64xf32>
    %cst_38 = arith.constant 0.000000e+00 : bf16
    %85 = vector.broadcast %cst_38 : bf16 to vector<16x192xbf16>
    %c0_39 = arith.constant 0 : index
    %c0_40 = arith.constant 0 : index
    %86 = vector.load %arg14[%c0_39, %c0_40] : memref<288x192xbf16, #tpu.memory_space<vmem>>, vector<16x192xbf16>
    tpu.vector_store %arg14[%c0_39, %c0_40], %85 {strides = array<i32>} : memref<288x192xbf16, #tpu.memory_space<vmem>>, vector<16x192xbf16>,
    %cst_41 = arith.constant 0.000000e+00 : bf16
    %87 = vector.broadcast %cst_41 : bf16 to vector<16x192xbf16>
    %c272 = arith.constant 272 : index
    %c0_42 = arith.constant 0 : index
    %88 = vector.load %arg14[%c272, %c0_42] : memref<288x192xbf16, #tpu.memory_space<vmem>>, vector<16x192xbf16>
    tpu.vector_store %arg14[%c272, %c0_42], %87 {strides = array<i32>} : memref<288x192xbf16, #tpu.memory_space<vmem>>, vector<16x192xbf16>,
    %89 = arith.truncf %77 : vector<256x64xf32> to vector<256x64xbf16>
    %c16 = arith.constant 16 : index
    %c0_43 = arith.constant 0 : index
    %90 = vector.load %arg14[%c16, %c0_43] : memref<288x192xbf16, #tpu.memory_space<vmem>>, vector<256x64xbf16>
    tpu.vector_store %arg14[%c16, %c0_43], %89 {strides = array<i32>} : memref<288x192xbf16, #tpu.memory_space<vmem>>, vector<256x64xbf16>,
    %91 = arith.truncf %53 : vector<256x64xf32> to vector<256x64xbf16>
    %c16_44 = arith.constant 16 : index
    %c64 = arith.constant 64 : index
    %92 = vector.load %arg14[%c16_44, %c64] : memref<288x192xbf16, #tpu.memory_space<vmem>>, vector<256x64xbf16>
    tpu.vector_store %arg14[%c16_44, %c64], %91 {strides = array<i32>} : memref<288x192xbf16, #tpu.memory_space<vmem>>, vector<256x64xbf16>,
    %93 = arith.truncf %84 : vector<256x64xf32> to vector<256x64xbf16>
    %c16_45 = arith.constant 16 : index
    %c128 = arith.constant 128 : index
    %94 = vector.load %arg14[%c16_45, %c128] : memref<288x192xbf16, #tpu.memory_space<vmem>>, vector<256x64xbf16>
    tpu.vector_store %arg14[%c16_45, %c128], %93 {strides = array<i32>} : memref<288x192xbf16, #tpu.memory_space<vmem>>, vector<256x64xbf16>,
    %c0_46 = arith.constant 0 : index
    %c0_47 = arith.constant 0 : index
    %95 = vector.load %arg14[%c0_46, %c0_47] : memref<288x192xbf16, #tpu.memory_space<vmem>>, vector<256x192xbf16>
    %c0_48 = arith.constant 0 : index
    %c0_49 = arith.constant 0 : index
    %c0_50 = arith.constant 0 : index
    %96 = vector.load %arg11[%c0_48, %c0_49, %c0_50] : memref<3x192x64xbf16, #tpu.memory_space<vmem>>, vector<1x192x64xbf16>
    %97 = vector.shape_cast %96 : vector<1x192x64xbf16> to vector<192x64xbf16>
    %cst_51 = arith.constant dense<0.000000e+00> : vector<256x64xf32>
    %98 = tpu.matmul %95, %97, %cst_51 {dimension_numbers = #tpu.dot_dimension_numbers<[1], [0], [0], [1], [0, 0, 1, 1], [], []>} : vector<256x192xbf16>, vector<192x64xbf16>, vector<256x64xf32> -> vector<256x64xf32>
    %c16_52 = arith.constant 16 : index
    %c0_53 = arith.constant 0 : index
    %99 = vector.load %arg14[%c16_52, %c0_53] : memref<288x192xbf16, #tpu.memory_space<vmem>>, vector<256x192xbf16>
    %c1 = arith.constant 1 : index
    %c0_54 = arith.constant 0 : index
    %c0_55 = arith.constant 0 : index
    %100 = vector.load %arg11[%c1, %c0_54, %c0_55] : memref<3x192x64xbf16, #tpu.memory_space<vmem>>, vector<1x192x64xbf16>
    %101 = vector.shape_cast %100 : vector<1x192x64xbf16> to vector<192x64xbf16>
    %cst_56 = arith.constant dense<0.000000e+00> : vector<256x64xf32>
    %102 = tpu.matmul %99, %101, %cst_56 {dimension_numbers = #tpu.dot_dimension_numbers<[1], [0], [0], [1], [0, 0, 1, 1], [], []>} : vector<256x192xbf16>, vector<192x64xbf16>, vector<256x64xf32> -> vector<256x64xf32>
    %103 = arith.addf %98, %102 : vector<256x64xf32>
    %c32 = arith.constant 32 : index
    %c0_57 = arith.constant 0 : index
    %104 = vector.load %arg14[%c32, %c0_57] : memref<288x192xbf16, #tpu.memory_space<vmem>>, vector<256x192xbf16>
    %c2 = arith.constant 2 : index
    %c0_58 = arith.constant 0 : index
    %c0_59 = arith.constant 0 : index
    %105 = vector.load %arg11[%c2, %c0_58, %c0_59] : memref<3x192x64xbf16, #tpu.memory_space<vmem>>, vector<1x192x64xbf16>
    %106 = vector.shape_cast %105 : vector<1x192x64xbf16> to vector<192x64xbf16>
    %cst_60 = arith.constant dense<0.000000e+00> : vector<256x64xf32>
    %107 = tpu.matmul %104, %106, %cst_60 {dimension_numbers = #tpu.dot_dimension_numbers<[1], [0], [0], [1], [0, 0, 1, 1], [], []>} : vector<256x192xbf16>, vector<192x64xbf16>, vector<256x64xf32> -> vector<256x64xf32>
    %108 = arith.addf %103, %107 : vector<256x64xf32>
    %c0_61 = arith.constant 0 : index
    %c0_62 = arith.constant 0 : index
    %109 = vector.load %arg12[%c0_61, %c0_62] : memref<1x64xf32, #tpu.memory_space<vmem>>, vector<1x64xf32>
    %110 = vector.broadcast %109 : vector<1x64xf32> to vector<256x64xf32>
    %111 = arith.addf %108, %110 : vector<256x64xf32>
    %cst_63 = arith.constant 0.000000e+00 : f32
    %112 = vector.broadcast %cst_63 : f32 to vector<256x64xf32>
    %113 = arith.maximumf %111, %112 : vector<256x64xf32>
    %c0_64 = arith.constant 0 : index
    %c0_65 = arith.constant 0 : index
    %c0_66 = arith.constant 0 : index
    %114 = vector.load %arg13[%c0_64, %c0_65, %c0_66] : memref<1x256x64xf32, #tpu.memory_space<vmem>>, vector<1x256x64xf32>
    %115 = vector.shape_cast %114 : vector<1x256x64xf32> to vector<256x64xf32>
    %116 = vector.shape_cast %113 : vector<256x64xf32> to vector<1x256x64xf32>
    tpu.vector_store %arg13[%c0_64, %c0_65, %c0_66], %116 {strides = array<i32>} : memref<1x256x64xf32, #tpu.memory_space<vmem>>, vector<1x256x64xf32>,
    return
  }
  func.func @transform_0(%arg0: i32) -> (i32, i32, i32) {
    %c0_i32 = arith.constant 0 : i32
    %c0_i32_0 = arith.constant 0 : i32
    %c0_i32_1 = arith.constant 0 : i32
    return %arg0, %c0_i32, %c0_i32_0 : i32, i32, i32
  }
  func.func @transform_1(%arg0: i32) -> (i32, i32, i32) {
    %c0_i32 = arith.constant 0 : i32
    %c0_i32_0 = arith.constant 0 : i32
    %c0_i32_1 = arith.constant 0 : i32
    return %arg0, %c0_i32, %c0_i32_0 : i32, i32, i32
  }
  func.func @transform_2(%arg0: i32) -> (i32, i32) {
    %c0_i32 = arith.constant 0 : i32
    %c0_i32_0 = arith.constant 0 : i32
    %c0_i32_1 = arith.constant 0 : i32
    return %c0_i32, %c0_i32_0 : i32, i32
  }
  func.func @transform_3(%arg0: i32) -> (i32, i32) {
    %c0_i32 = arith.constant 0 : i32
    %c0_i32_0 = arith.constant 0 : i32
    %c0_i32_1 = arith.constant 0 : i32
    return %c0_i32, %c0_i32_0 : i32, i32
  }
  func.func @transform_4(%arg0: i32) -> (i32, i32) {
    %c0_i32 = arith.constant 0 : i32
    %c0_i32_0 = arith.constant 0 : i32
    %c0_i32_1 = arith.constant 0 : i32
    return %c0_i32, %c0_i32_0 : i32, i32
  }
  func.func @transform_5(%arg0: i32) -> (i32, i32) {
    %c0_i32 = arith.constant 0 : i32
    %c0_i32_0 = arith.constant 0 : i32
    %c0_i32_1 = arith.constant 0 : i32
    return %c0_i32, %c0_i32_0 : i32, i32
  }
  func.func @transform_6(%arg0: i32) -> (i32, i32) {
    %c0_i32 = arith.constant 0 : i32
    %c0_i32_0 = arith.constant 0 : i32
    %c0_i32_1 = arith.constant 0 : i32
    return %c0_i32, %c0_i32_0 : i32, i32
  }
  func.func @transform_7(%arg0: i32) -> (i32, i32) {
    %c0_i32 = arith.constant 0 : i32
    %c0_i32_0 = arith.constant 0 : i32
    %c0_i32_1 = arith.constant 0 : i32
    return %c0_i32, %c0_i32_0 : i32, i32
  }
  func.func @transform_8(%arg0: i32) -> (i32, i32) {
    %c0_i32 = arith.constant 0 : i32
    %c0_i32_0 = arith.constant 0 : i32
    %c0_i32_1 = arith.constant 0 : i32
    return %c0_i32, %c0_i32_0 : i32, i32
  }
  func.func @transform_9(%arg0: i32) -> (i32, i32) {
    %c0_i32 = arith.constant 0 : i32
    %c0_i32_0 = arith.constant 0 : i32
    %c0_i32_1 = arith.constant 0 : i32
    return %c0_i32, %c0_i32_0 : i32, i32
  }
  func.func @transform_10(%arg0: i32) -> (i32, i32, i32) {
    %c0_i32 = arith.constant 0 : i32
    %c0_i32_0 = arith.constant 0 : i32
    %c0_i32_1 = arith.constant 0 : i32
    %c0_i32_2 = arith.constant 0 : i32
    return %c0_i32, %c0_i32_0, %c0_i32_1 : i32, i32, i32
  }
  func.func @transform_11(%arg0: i32) -> (i32, i32) {
    %c0_i32 = arith.constant 0 : i32
    %c0_i32_0 = arith.constant 0 : i32
    %c0_i32_1 = arith.constant 0 : i32
    return %c0_i32, %c0_i32_0 : i32, i32
  }
  func.func @transform_12(%arg0: i32) -> (i32, i32, i32) {
    %c0_i32 = arith.constant 0 : i32
    %c0_i32_0 = arith.constant 0 : i32
    %c0_i32_1 = arith.constant 0 : i32
    return %arg0, %c0_i32, %c0_i32_0 : i32, i32, i32
  }
}

</mosaic_0001>

<bundles_post_ra>
// kernel: tpu_custom_call.1
= control target key start
LH: loop header
LB: loop body
LE: loop exit
PB: predicated region body
PF: predicated region fallthrough
CT: control target
= control target key end

     0   :  { %s5252_s21 = smov 0   ;;  %s7314_s0 = inlined_call_operand.vmem [shape: f32[2,256,64], index: 0, kind: input, shape index: {}]   ;;  %s7315_s1 = inlined_call_operand.vmem [shape: f32[2,256,64], index: 1, kind: input, shape index: {}]   ;;  %s7316_s2 = inlined_call_operand.vmem [shape: f32[16,64], index: 2, kind: input, shape index: {}]   ;;  %s7317_s3 = inlined_call_operand.vmem [shape: f32[16,1], index: 3, kind: input, shape index: {}]   ;;  %s7318_s4 = inlined_call_operand.vmem [shape: f32[16,64], index: 4, kind: input, shape index: {}]   ;;  %s7319_s5 = inlined_call_operand.vmem [shape: f32[1,64], index: 5, kind: input, shape index: {}]   ;;  %s7320_s6 = inlined_call_operand.vmem [shape: bf16[64,128], index: 6, kind: input, shape index: {}]   ;;  %s7321_s7 = inlined_call_operand.vmem [shape: f32[1,128], index: 7, kind: input, shape index: {}]   ;;  %s7322_s8 = inlined_call_operand.vmem [shape: bf16[128,64], index: 8, kind: input, shape index: {}]   ;;  %s7323_s9 = inlined_call_operand.vmem [shape: f32[1,64], index: 9, kind: input, shape index: {}]   ;;  %s7324_s10 = inlined_call_operand.vmem [shape: bf16[3,192,64], index: 10, kind: input, shape index: {}]   ;;  %s7325_s11 = inlined_call_operand.vmem [shape: f32[1,64], index: 11, kind: input, shape index: {}]   ;;  %s7326_s12 = inlined_call_operand.vmem [shape: f32[2,256,64], index: 12, kind: output, shape index: {}]  }
   0x1 LB: > { %s4278_s22 = sadd.s32 4294967295, %s5183_s21   ;;  %p4282_p0 = scmp.ge.s32.totalorder %s5183_s21, 1  ;;  %s5183_s21 = sphi %s5252_s21, %s22_s21  }
   0x2   : > { %p372_p1 = scmp.lt.s32.totalorder %s5183_s21, 3 }
   0x4   : > { %p373_p2 = pnand %p4282_p0, %p372_p1 }
   0x6   : > { %376 = sbr.rel (%p373_p2) target bundleno = 1032 (0x408), region = 68 }
   0xb   : > { %v4916_v0 = vld [vmem:[%s7320_s6 + $0x18] sm:$0xff]   ;;  %p419_p3 = scmp.lt.s32.totalorder %s4278_s22, 1  ;;  %v4917_v1 = vld [vmem:[%s7320_s6 + $0x10] sm:$0xff]   ;;  %v4918_v2 = vld [vmem:[%s7320_s6 + $0x8] sm:$0xff]   ;;  %vm499_vm0 = vcmask 523264   ;;  %s5186_s15 = smov 64  }
   0xc   : > { %4792 = vmatprep.subr.bf16.mxu0 %v4916_v0  ;;  %v4920_v3 = vld [vmem:[%s7322_s8 + $0x38] sm:$0xff]   ;;  %v4919_v7 = vld [vmem:[%s7320_s6] sm:$0xff]   ;;  %vm2423_vm3 = vcmask 519168  }
   0xd   : > { %s7505_s22 = smov (!%p419_p3, %s4278_s22), 1  ;;  %4793 = vmatpush3.bf16.msra.mxu0 %v4916_v0  ;;  %4832 = vmatprep.subr.bf16.mxu1 %v4920_v3 }
   0xe   : > { %4794 = vmatprep.subr.bf16.mxu0 %v4917_v1  ;;  %s5269_s29 = sshll.u32 %s7505_s22, 8  ;;  %4833 = vmatpush3.bf16.msra.mxu1 %v4920_v3 }
   0xf   : > { %s5275_s14 = scalar_lea.vmem %s7315_s1, %s5269_s29  ;;  %s5308_s22 = scalar_lea.vmem %s7314_s0, %s5269_s29 }
  0x10   : > { %v5281_v4 = vld [vmem:[%s5275_s14] sm:$0xff]  ;;  %v5284_v5 = vld [vmem:[%s5275_s14 + $0x8] sm:$0xff]  ;;  %v5293_v8 = vld [vmem:[%s5275_s14 + $0x10] sm:$0xff]  ;;  %s7184_s23 = scalar_lea.vmem %s7326_s12, %s5269_s29 }
  0x11   : > { %4795 = vmatpush3.bf16.msra.mxu0 %v4917_v1  ;;  %v617_v6 = vpack.c.bf16 %v5284_v5, %v5281_v4  ;;  %v5296_v9 = vld [vmem:[%s5275_s14 + $0x18] sm:$0xff]  ;;  %v5299_v10 = vld [vmem:[%s5275_s14 + $0x20] sm:$0xff]  ;;  %v5302_v11 = vld [vmem:[%s5275_s14 + $0x28] sm:$0xff] }
  0x12   : > { %4796 = vmatprep.subr.bf16.mxu0 %v4918_v2  ;;  %v618_v12 = vpack.c.bf16 %v5296_v9, %v5293_v8  ;;  %v619_v13 = vpack.c.bf16 %v5302_v11, %v5299_v10  ;;  %v435_v14 = vld [vmem:[%s5308_s22] sm:$0xff]  ;;  %v436_v15 = vld [vmem:[%s5308_s22 + $0x8] sm:$0xff]  ;;  %v437_v16 = vld [vmem:[%s5308_s22 + $0x10] sm:$0xff] }
  0x13   : > { %4800 = vmatprep.mubr.msk.bf16.mxu0 %vm499_vm0, %v617_v6  ;;  %v438_v17 = vld [vmem:[%s5308_s22 + $0x18] sm:$0xff]  ;;  %v500_v18 = vsel %vm499_vm0, %v435_v14, 0.0  ;;  %v501_v19 = vsel %vm499_vm0, %v436_v15, 0.0  ;;  %v503_v20 = vsel %vm499_vm0, %v437_v16, 0.0  ;;  %v5324_v21 = vld [vmem:[%s5275_s14 + $0x30] sm:$0xff]  ;;  %v439_v23 = vld [vmem:[%s5308_s22 + $0x20] sm:$0xff] }
  0x14   : > { %v5327_v22 = vld [vmem:[%s5275_s14 + $0x38] sm:$0xff]  ;;  %v502_v24 = vadd.f32 %v501_v19, %v500_v18  ;;  %v5331_v25 = vld [vmem:[%s5275_s14 + $0x40] sm:$0xff]  ;;  %v5334_v26 = vld [vmem:[%s5275_s14 + $0x48] sm:$0xff]  ;;  %v505_v28 = vsel %vm499_vm0, %v438_v17, 0.0  ;;  %v507_v37 = vsel %vm499_vm0, %v439_v23, 0.0 }
  0x15   : > { %4797 = vmatpush3.bf16.msra.mxu0 %v4918_v2  ;;  %v440_v27 = vld [vmem:[%s5308_s22 + $0x28] sm:$0xff]  ;;  %v441_v29 = vld [vmem:[%s5308_s22 + $0x30] sm:$0xff]  ;;  %v442_v30 = vld [vmem:[%s5308_s22 + $0x38] sm:$0xff]  ;;  %v620_v33 = vpack.c.bf16 %v5327_v22, %v5324_v21  ;;  %v621_v38 = vpack.c.bf16 %v5334_v26, %v5331_v25 }
  0x16   : > { %4798 = vmatprep.subr.bf16.mxu0 %v4919_v7  ;;  %v443_v31 = vld [vmem:[%s5308_s22 + $0x40] sm:$0xff]  ;;  %v504_v32 = vadd.f32 %v503_v20, %v502_v24  ;;  %v444_v34 = vld [vmem:[%s5308_s22 + $0x48] sm:$0xff]  ;;  %v445_v35 = vld [vmem:[%s5308_s22 + $0x50] sm:$0xff]  ;;  %v509_v45 = vsel %vm499_vm0, %v440_v27, 0.0  ;;  %v511_v46 = vsel %vm499_vm0, %v441_v29, 0.0  ;;  %v513_v47 = vsel %vm499_vm0, %v442_v30, 0.0 }
  0x17   : > { %v446_v36 = vld [vmem:[%s5308_s22 + $0x58] sm:$0xff]  ;;  %v447_v39 = vld [vmem:[%s5308_s22 + $0x60] sm:$0xff]  ;;  %v448_v40 = vld [vmem:[%s5308_s22 + $0x68] sm:$0xff]  ;;  %v515_v52 = vsel %vm499_vm0, %v443_v31, 0.0  ;;  %v517_v53 = vsel %vm499_vm0, %v444_v34, 0.0  ;;  %v519_v54 = vsel %vm499_vm0, %v445_v35, 0.0 }
  0x18   : > { %v449_v41 = vld [vmem:[%s5308_s22 + $0x70] sm:$0xff]  ;;  %v506_v42 = vadd.f32 %v505_v28, %v504_v32  ;;  %v450_v43 = vld [vmem:[%s5308_s22 + $0x78] sm:$0xff]  ;;  %v451_v44 = vld [vmem:[%s5308_s22 + $0x80] sm:$0xff]  ;;  %v521_v59 = vsel %vm499_vm0, %v446_v36, 0.0  ;;  %v523_v60 = vsel %vm499_vm0, %v447_v39, 0.0  ;;  %v525_v61 = vsel %vm499_vm0, %v448_v40, 0.0 }
  0x19   : > { %4799 = vmatpush3.bf16.msra.mxu0 %v4919_v7  ;;  %v5358_v48 = vld [vmem:[%s5275_s14 + $0x50] sm:$0xff]  ;;  %v5361_v49 = vld [vmem:[%s5275_s14 + $0x58] sm:$0xff]  ;;  %v452_v50 = vld [vmem:[%s5308_s22 + $0x88] sm:$0xff]  ;;  %v527_v62 = vsel %vm499_vm0, %v449_v41, 0.0  ;;  %v529_v2 = vsel %vm499_vm0, %v450_v43, 0.0  ;;  %v531_v3 = vsel %vm499_vm0, %v451_v44, 0.0 }
  0x1a   : > { %v508_v51 = vadd.f32 %v507_v37, %v506_v42  ;;  %v5369_v55 = vld [vmem:[%s5275_s14 + $0x60] sm:$0xff]  ;;  %v5372_v56 = vld [vmem:[%s5275_s14 + $0x68] sm:$0xff]  ;;  %v453_v57 = vld [vmem:[%s5308_s22 + $0x90] sm:$0xff]  ;;  %v533_v6 = vsel %vm499_vm0, %v452_v50, 0.0  ;;  %v622_v15 = vpack.c.bf16 %v5361_v49, %v5358_v48 }
  0x1b   : > { %v454_v58 = vld [vmem:[%s5308_s22 + $0x98] sm:$0xff]  ;;  %v455_v63 = vld [vmem:[%s5308_s22 + $0xa0] sm:$0xff]  ;;  %v456_v0 = vld [vmem:[%s5308_s22 + $0xa8] sm:$0xff]  ;;  %v623_v18 = vpack.c.bf16 %v5372_v56, %v5369_v55 }
  0x1c   : > { %4801 = vmatmul.mubr.msk.bf16.vlgmr.msra.gmra.mxu0 %vm499_vm0, %v618_v12  ;;  %v510_v1 = vadd.f32 %v509_v45, %v508_v51  ;;  %v4921_v7 = vld [vmem:[%s7322_s8 + $0x30] sm:$0xff]   ;;  %v4922_v14 = vld [vmem:[%s7322_s8 + $0x28] sm:$0xff]   ;;  %v537_v16 = vsel %vm499_vm0, %v454_v58, 0.0  ;;  %v539_v17 = vsel %vm499_vm0, %v455_v63, 0.0  ;;  %v541_v20 = vsel %vm499_vm0, %v456_v0, 0.0  ;;  %v4923_v23 = vld [vmem:[%s7322_s8 + $0x20] sm:$0xff]  }
  0x1d   : > { %4804 = vmatprep.mubr.msk.bf16.mxu0 %vm499_vm0, %v619_v13  ;;  %v535_v13 = vsel %vm499_vm0, %v453_v57, 0.0  ;;  %4834 = vmatprep.subr.bf16.mxu1 %v4921_v7  ;;  %v5404_v24 = vld [vmem:[%s5275_s14 + $0x70] sm:$0xff]  ;;  %v5407_v27 = vld [vmem:[%s5275_s14 + $0x78] sm:$0xff]  ;;  %v5411_v29 = vld [vmem:[%s5275_s14 + $0x80] sm:$0xff] }
  0x1e   : > { %v512_v12 = vadd.f32 %v511_v46, %v510_v1  ;;  %4835 = vmatpush3.bf16.msra.mxu1 %v4921_v7  ;;  %v5414_v30 = vld [vmem:[%s5275_s14 + $0x88] sm:$0xff]  ;;  %v4924_v31 = vld [vmem:[%s7322_s8 + $0x18] sm:$0xff]   ;;  %v624_v34 = vpack.c.bf16 %v5407_v27, %v5404_v24  ;;  %v5425_v37 = vld [vmem:[%s5275_s14 + $0x90] sm:$0xff] }
  0x1f   : > { %4836 = vmatprep.subr.bf16.mxu1 %v4922_v14  ;;  %v625_v35 = vpack.c.bf16 %v5414_v30, %v5411_v29  ;;  %v5432_v40 = vld [vmem:[%s5275_s14 + $0xa0] sm:$0xff]  ;;  %v5435_v41 = vld [vmem:[%s5275_s14 + $0xa8] sm:$0xff]  ;;  %v5446_v50 = vld [vmem:[%s5275_s14 + $0xb8] sm:$0xff] }
  0x20   : > { %v514_v19 = vadd.f32 %v513_v47, %v512_v12  ;;  %v627_v45 = vpack.c.bf16 %v5435_v41, %v5432_v40  ;;  %v5443_v47 = vld [vmem:[%s5275_s14 + $0xb0] sm:$0xff]  ;;  %v5473_v7 = vld [vmem:[%s5275_s14 + $0xe0] sm:$0xff]  ;;  %v5476_v12 = vld [vmem:[%s5275_s14 + $0xe8] sm:$0xff] }
  0x21   : > { %v457_v57 = vld [vmem:[%s5308_s22 + $0xb0] sm:$0xff] }
  0x22   : > { %v516_v28 = vadd.f32 %v515_v52, %v514_v19  ;;  %4837 = vmatpush3.bf16.msra.mxu1 %v4922_v14  ;;  %v5450_v52 = vld [vmem:[%s5275_s14 + $0xc0] sm:$0xff]  ;;  %v543_v0 = vsel %vm499_vm0, %v457_v57, 0.0  ;;  %v5466_v1 = vld [vmem:[%s5275_s14 + $0xd0] sm:$0xff]  ;;  %v460_v14 = vld [vmem:[%s5308_s22 + $0xc8] sm:$0xff] }
  0x23   : > { %4838 = vmatprep.subr.bf16.mxu1 %v4923_v23  ;;  %v461_v19 = vld [vmem:[%s5308_s22 + $0xd0] sm:$0xff]  ;;  %v466_v57 = vld [vmem:[%s5308_s22 + $0xf8] sm:$0xff] }
  0x24   : > { %4805 = vmatmul.mubr.msk.bf16.gmra.mxu0 %vm499_vm0, %v620_v33  ;;  %v518_v32 = vadd.f32 %v517_v53, %v516_v28  ;;  %v5453_v53 = vld [vmem:[%s5275_s14 + $0xc8] sm:$0xff]  ;;  %v462_v28 = vld [vmem:[%s5308_s22 + $0xd8] sm:$0xff] }
  0x25   : > { %4808 = vmatprep.mubr.msk.bf16.mxu0 %vm499_vm0, %v621_v38  ;;  %v5428_v38 = vld [vmem:[%s5275_s14 + $0x98] sm:$0xff] }
  0x26   : > { %v520_v33 = vadd.f32 %v519_v54, %v518_v32  ;;  %4839 = vmatpush3.bf16.msra.mxu1 %v4923_v23  ;;  %v626_v44 = vpack.c.bf16 %v5428_v38, %v5425_v37  ;;  %v549_v23 = vsel %vm499_vm0, %v460_v14, 0.0  ;;  %v551_v32 = vsel %vm499_vm0, %v461_v19, 0.0  ;;  %v4926_v14 = vld [vmem:[%s7322_s8 + $0x8] sm:$0xff]   ;;  %v570_v19 = vld [vmem:[%s7316_s2] sm:$0xff] }
  0x27   : > { %4840 = vmatprep.subr.bf16.mxu1 %v4924_v31 }
  0x28   : > { %v522_v36 = vadd.f32 %v521_v59, %v520_v33  ;;  %v628_v59 = vpack.c.bf16 %v5446_v50, %v5443_v47  ;;  %v5492_v33 = vld [vmem:[%s5275_s14 + $0xf0] sm:$0xff] }
  0x2a   : > { %v524_v39 = vadd.f32 %v523_v60, %v522_v36  ;;  %4841 = vmatpush3.bf16.msra.mxu1 %v4924_v31  ;;  %v629_v60 = vpack.c.bf16 %v5453_v53, %v5450_v52 }
  0x2c   : > { %4809 = vmatmul.mubr.msk.bf16.gmra.mxu0 %vm499_vm0, %v622_v15  ;;  %v526_v42 = vadd.f32 %v525_v61, %v524_v39  ;;  %v553_v39 = vsel %vm499_vm0, %v462_v28, 0.0 }
  0x2d   : > { %4812 = vmatprep.mubr.msk.bf16.mxu0 %vm499_vm0, %v623_v18  ;;  %v631_v18 = vpack.c.bf16 %v5476_v12, %v5473_v7 }
  0x2e   : > { %v528_v43 = vadd.f32 %v527_v62, %v526_v42  ;;  %v458_v62 = vld [vmem:[%s5308_s22 + $0xb8] sm:$0xff]  ;;  %v464_v42 = vld [vmem:[%s5308_s22 + $0xe8] sm:$0xff] }
  0x30   : > { %v530_v46 = vadd.f32 %v529_v2, %v528_v43  ;;  %v5469_v2 = vld [vmem:[%s5275_s14 + $0xd8] sm:$0xff] }
  0x32   : > { %v532_v51 = vadd.f32 %v531_v3, %v530_v46  ;;  %v459_v3 = vld [vmem:[%s5308_s22 + $0xc0] sm:$0xff]  ;;  %v465_v46 = vld [vmem:[%s5308_s22 + $0xf0] sm:$0xff] }
  0x34   : > { %4813 = vmatmul.mubr.msk.bf16.gmra.mxu0 %vm499_vm0, %v624_v34  ;;  %v534_v54 = vadd.f32 %v533_v6, %v532_v51  ;;  %v5495_v34 = vld [vmem:[%s5275_s14 + $0xf8] sm:$0xff] }
  0x35   : > { %4816 = vmatprep.mubr.msk.bf16.mxu0 %vm499_vm0, %v625_v35  ;;  %v463_v35 = vld [vmem:[%s5308_s22 + $0xe0] sm:$0xff] }
  0x36   : > { %v536_v58 = vadd.f32 %v535_v13, %v534_v54  ;;  %v545_v13 = vsel %vm499_vm0, %v458_v62, 0.0  ;;  %v557_v54 = vsel %vm499_vm0, %v464_v42, 0.0 }
  0x38   : > { %v538_v61 = vadd.f32 %v537_v16, %v536_v58  ;;  %v630_v16 = vpack.c.bf16 %v5469_v2, %v5466_v1 }
  0x3a   : > { %v540_v63 = vadd.f32 %v539_v17, %v538_v61  ;;  %v547_v17 = vsel %vm499_vm0, %v459_v3, 0.0  ;;  %v561_v61 = vsel %vm499_vm0, %v466_v57, 0.0  ;;  %v4925_v3 = vld [vmem:[%s7322_s8 + $0x10] sm:$0xff]  }
  0x3b   : > { %4842 = vmatprep.subr.bf16.mxu1 %v4925_v3 }
  0x3c   : > { %4817 = vmatmul.mubr.msk.bf16.gmra.mxu0 %vm499_vm0, %v626_v44  ;;  %v542_v6 = vadd.f32 %v541_v20, %v540_v63  ;;  %v632_v44 = vpack.c.bf16 %v5495_v34, %v5492_v33  ;;  %4843 = vmatpush3.bf16.msra.mxu1 %v4925_v3 }
  0x3d   : > { %4820 = vmatprep.mubr.msk.bf16.mxu0 %vm499_vm0, %v627_v45  ;;  %v555_v45 = vsel %vm499_vm0, %v463_v35, 0.0  ;;  %4844 = vmatprep.subr.bf16.mxu1 %v4926_v14 }
  0x3e   : > { %v544_v15 = vadd.f32 %v543_v0, %v542_v6 }
  0x40   : > { %v546_v20 = vadd.f32 %v545_v13, %v544_v15  ;;  %4845 = vmatpush3.bf16.msra.mxu1 %v4926_v14 }
  0x42   : > { %v548_v31 = vadd.f32 %v547_v17, %v546_v20  ;;  %v4927_v17 = vld [vmem:[%s7322_s8] sm:$0xff]   ;;  %v571_v20 = vld [vmem:[%s7316_s2 + $0x8] sm:$0xff] }
  0x43   : > { %4846 = vmatprep.subr.bf16.mxu1 %v4927_v17 }
  0x44   : > { %4821 = vmatmul.mubr.msk.bf16.gmra.mxu0 %vm499_vm0, %v628_v59  ;;  %v550_v36 = vadd.f32 %v549_v23, %v548_v31  ;;  %v559_v59 = vsel %vm499_vm0, %v465_v46, 0.0  ;;  %4847 = vmatpush3.bf16.msra.mxu1 %v4927_v17 }
  0x45   : > { %4824 = vmatprep.mubr.msk.bf16.mxu0 %vm499_vm0, %v629_v60 }
  0x46   : > { %v552_v43 = vadd.f32 %v551_v32, %v550_v36  ;;  %v7327_v36 = vmov 0  }
  0x47   : > { %4914 = vset.pattern.permute.xlu1 %v7327_v36  ;;  %3188 = vmatprep.subr.bf16.mxu0 %v7327_v36 }
  0x48   : > { %v554_v51 = vadd.f32 %v553_v39, %v552_v43  ;;  %4880 = vmatprep.subr.bf16.mxu1 %v7327_v36  ;;  %4915 = vset.pattern.permute.xlu0 %v7327_v36  ;;  %v5533_v43 = vld [vmem:[%s7321_s7] ss:$0 sm:$0xff] }
  0x4a   : > { %v556_v58 = vadd.f32 %v555_v45, %v554_v51 }
  0x4c   : > { %4825 = vmatmul.mubr.msk.bf16.gmra.mxu0 %vm499_vm0, %v630_v16  ;;  %v558_v60 = vadd.f32 %v557_v54, %v556_v58 }
  0x4d   : > { %4828 = vmatprep.mubr.msk.bf16.mxu0 %vm499_vm0, %v631_v18 }
  0x4e   : > { %v560_v62 = vadd.f32 %v559_v59, %v558_v60 }
  0x50   : > { %v562_v63 = vadd.f32 %v561_v61, %v560_v62 }
  0x52   : > { %v563_v0 = vrot.slane %v562_v63, 4 }
  0x54   : > { %4829 = vmatmul.mubr.msk.bf16.gmra.mxu0 %vm499_vm0, %v632_v44  ;;  %v564_v6 = vadd.f32 %v563_v0, %v562_v63 }
  0x56   : > { %v565_v13 = vrot.slane %v564_v6, 2 }
  0x58   : > { %v566_v15 = vadd.f32 %v565_v13, %v564_v6 }
  0x5a   : > { %v567_v16 = vrot.slane %v566_v15, 1 }
  0x5c   : > { %v568_v18 = vadd.f32 %v567_v16, %v566_v15 }
  0x5e   : > { %v569_v23 = vmul.f32 0.00390625, %v568_v18 }
  0x60   : > { %v572_v28 = vmul.f32 %v570_v19, %v569_v23  ;;  %v573_v31 = vmul.f32 %v571_v20, %v569_v23 }
  0x62   : > { %v574_v32 = vsel %vm499_vm0, %v572_v28, 0.0  ;;  %v577_v35 = vsel %vm499_vm0, %v573_v31, 0.0 }
  0x63   : > { %575 = vadd.xlane.f32.xlu0 %v574_v32 }
  0x67   : > { %578 = vadd.xlane.f32.xlu0 %v577_v35 }
  0xdc   : > { %v4802_v39 = vpop.f32.mrf.mxu0 }
  0xdd   : > { %v763_v51 = vadd.f32 %v4802_v39, %v5533_v43 }
  0xde   : > { %v754_v42 = vpop.f32.mrf.mxu0 }
  0xdf   : > { %v755_v45 = vadd.f32 %v5533_v43, %v754_v42  ;;  %v883_v62 = vmax.f32 %v763_v51, 0.0 }
  0xe0   : > { %v4803_v44 = vpop.f32.mrf.mxu0 }
  0xe1   : > { %v766_v46 = vadd.f32 %v4803_v44, %v5533_v43  ;;  %v881_v60 = vmax.f32 %v755_v45, 0.0 }
  0xe2   : > { %v757_v54 = vpop.f32.mrf.mxu0 }
  0xe3   : > { %v758_v57 = vadd.f32 %v5533_v43, %v757_v54  ;;  %v884_v58 = vmax.f32 %v766_v46, 0.0  ;;  %v580_v54 = vld [vmem:[%s7317_s3] sm:$0xff] }
  0xe4   : > { %v4806_v59 = vpop.f32.mrf.mxu0 }
  0xe5   : > { %v882_v61 = vmax.f32 %v758_v57, 0.0  ;;  %v914_v3 = vpack.c.bf16 %v884_v58, %v883_v62  ;;  %v779_v15 = vadd.f32 %v4806_v59, %v5533_v43 }
  0xe6   : > { %v770_v63 = vpop.f32.mrf.mxu0 }
  0xe7   : > { %v913_v0 = vpack.c.bf16 %v882_v61, %v881_v60  ;;  %v771_v13 = vadd.f32 %v5533_v43, %v770_v63  ;;  %v887_v28 = vmax.f32 %v779_v15, 0.0 }
  0xe8   : > { %v4807_v6 = vpop.f32.mrf.mxu0 }
  0xe9   : > { %v782_v14 = vadd.f32 %v4807_v6, %v5533_v43  ;;  %4848 = vmatprep.mubr.bf16.mxu1 %v913_v0  ;;  %v885_v20 = vmax.f32 %v771_v13, 0.0  ;;  %v581_v6 = vld [vmem:[%s7317_s3 + $0x8] sm:$0xff] }
  0xea   : > { %v773_v16 = vpop.f32.mrf.mxu0  ;;  %4849 = vmatmul.mubr.bf16.vlgmr.msra.gmra.mxu1 %v914_v3 }
  0xeb   : > { %v774_v17 = vadd.f32 %v5533_v43, %v773_v16  ;;  %v888_v18 = vmax.f32 %v782_v14, 0.0 }
  0xec   : > { %v4810_v19 = vpop.f32.mrf.mxu0  ;;  %v576_v61 = vpop.xlane.xlu0 %575 }
  0xed   : > { %v886_v23 = vmax.f32 %v774_v17, 0.0  ;;  %v916_v35 = vpack.c.bf16 %v888_v18, %v887_v28  ;;  %v795_v45 = vadd.f32 %v4810_v19, %v5533_v43  ;;  %v582_v0 = vadd.f32 %v580_v54, %v576_v61 }
  0xee   : > { %v786_v31 = vpop.f32.mrf.mxu0 }
  0xef   : > { %v915_v32 = vpack.c.bf16 %v886_v23, %v885_v20  ;;  %v787_v42 = vadd.f32 %v5533_v43, %v786_v31  ;;  %v891_v62 = vmax.f32 %v795_v45, 0.0  ;;  %v584_v15 = vmax.f32 %v582_v0, 0.0 }
  0xf0   : > { %v4811_v39 = vpop.f32.mrf.mxu0  ;;  %v579_v18 = vpop.xlane.xlu0 %578 }
  0xf1   : > { %v798_v44 = vadd.f32 %v4811_v39, %v5533_v43  ;;  %4852 = vmatprep.mubr.bf16.mxu1 %v915_v32  ;;  %v889_v59 = vmax.f32 %v787_v42, 0.0  ;;  %v583_v23 = vadd.f32 %v581_v6, %v579_v18  ;;  %590 = vperm.xlu1 %4914, %v584_v15  }
  0xf2   : > { %v789_v46 = vpop.f32.mrf.mxu0  ;;  %4853 = vmatmul.mubr.bf16.gmra.mxu1 %v916_v35 }
  0xf3   : > { %v790_v51 = vadd.f32 %v5533_v43, %v789_v46  ;;  %v892_v57 = vmax.f32 %v798_v44, 0.0  ;;  %v585_v35 = vmax.f32 %v583_v23, 0.0 }
  0xf4   : > { %v4814_v58 = vpop.f32.mrf.mxu0 }
  0xf5   : > { %v890_v60 = vmax.f32 %v790_v51, 0.0  ;;  %v918_v13 = vpack.c.bf16 %v892_v57, %v891_v62  ;;  %v811_v19 = vadd.f32 %v4814_v58, %v5533_v43  ;;  %595 = vperm.xlu1 %4914, %v585_v35  }
  0xf6   : > { %v802_v63 = vpop.f32.mrf.mxu0 }
  0xf7   : > { %v917_v3 = vpack.c.bf16 %v890_v60, %v889_v59  ;;  %v803_v16 = vadd.f32 %v5533_v43, %v802_v63  ;;  %v895_v44 = vmax.f32 %v811_v19, 0.0 }
  0xf8   : > { %v4815_v14 = vpop.f32.mrf.mxu0 }
  0xf9   : > { %v814_v17 = vadd.f32 %v4815_v14, %v5533_v43  ;;  %4856 = vmatprep.mubr.bf16.mxu1 %v917_v3  ;;  %v893_v39 = vmax.f32 %v803_v16, 0.0 }
  0xfa   : > { %v805_v20 = vpop.f32.mrf.mxu0  ;;  %4857 = vmatmul.mubr.bf16.gmra.mxu1 %v918_v13 }
  0xfb   : > { %v806_v28 = vadd.f32 %v5533_v43, %v805_v20  ;;  %v896_v31 = vmax.f32 %v814_v17, 0.0 }
  0xfc   : > { %v4818_v32 = vpop.f32.mrf.mxu0 }
  0xfd   : > { %v894_v42 = vmax.f32 %v806_v28, 0.0  ;;  %v920_v51 = vpack.c.bf16 %v896_v31, %v895_v44  ;;  %v827_v59 = vadd.f32 %v4818_v32, %v5533_v43 }
  0xfe   : > { %v818_v45 = vpop.f32.mrf.mxu0 }
  0xff   : > { %v919_v46 = vpack.c.bf16 %v894_v42, %v893_v39  ;;  %v819_v57 = vadd.f32 %v5533_v43, %v818_v45  ;;  %v899_v6 = vmax.f32 %v827_v59, 0.0 }
 0x100   : > { %v4819_v54 = vpop.f32.mrf.mxu0 }
 0x101   : > { %v830_v58 = vadd.f32 %v4819_v54, %v5533_v43  ;;  %4860 = vmatprep.mubr.bf16.mxu1 %v919_v46  ;;  %v897_v0 = vmax.f32 %v819_v57, 0.0 }
 0x102   : > { %v821_v60 = vpop.f32.mrf.mxu0  ;;  %4861 = vmatmul.mubr.bf16.gmra.mxu1 %v920_v51 }
 0x103   : > { %v822_v61 = vadd.f32 %v5533_v43, %v821_v60  ;;  %v900_v62 = vmax.f32 %v830_v58, 0.0 }
 0x104   : > { %v4822_v63 = vpop.f32.mrf.mxu0 }
 0x105   : > { %v898_v3 = vmax.f32 %v822_v61, 0.0  ;;  %v922_v15 = vpack.c.bf16 %v900_v62, %v899_v6  ;;  %v843_v19 = vadd.f32 %v4822_v63, %v5533_v43 }
 0x106   : > { %v834_v13 = vpop.f32.mrf.mxu0 }
 0x107   : > { %v921_v14 = vpack.c.bf16 %v898_v3, %v897_v0  ;;  %v835_v17 = vadd.f32 %v5533_v43, %v834_v13  ;;  %v903_v39 = vmax.f32 %v843_v19, 0.0 }
 0x108   : > { %v4823_v16 = vpop.f32.mrf.mxu0 }
 0x109   : > { %v846_v18 = vadd.f32 %v4823_v16, %v5533_v43  ;;  %4864 = vmatprep.mubr.bf16.mxu1 %v921_v14  ;;  %v901_v32 = vmax.f32 %v835_v17, 0.0 }
 0x10a   : > { %v837_v20 = vpop.f32.mrf.mxu0  ;;  %4865 = vmatmul.mubr.bf16.gmra.mxu1 %v922_v15 }
 0x10b   : > { %v838_v23 = vadd.f32 %v5533_v43, %v837_v20  ;;  %v904_v28 = vmax.f32 %v846_v18, 0.0 }
 0x10c   : > { %v4826_v31 = vpop.f32.mrf.mxu0 }
 0x10d   : > { %v902_v35 = vmax.f32 %v838_v23, 0.0  ;;  %v859_v42 = vadd.f32 %v4826_v31, %v5533_v43  ;;  %v924_v51 = vpack.c.bf16 %v904_v28, %v903_v39  ;;  %v586_v39 = vld [vmem:[%s7318_s4] sm:$0xff] }
 0x10e   : > { %v850_v44 = vpop.f32.mrf.mxu0 }
 0x10f   : > { %v923_v45 = vpack.c.bf16 %v902_v35, %v901_v32  ;;  %v851_v46 = vadd.f32 %v5533_v43, %v850_v44  ;;  %v907_v58 = vmax.f32 %v859_v42, 0.0 }
 0x110   : > { %v4827_v54 = vpop.f32.mrf.mxu0 }
 0x111   : > { %v862_v57 = vadd.f32 %v4827_v54, %v5533_v43  ;;  %4868 = vmatprep.mubr.bf16.mxu1 %v923_v45  ;;  %v905_v60 = vmax.f32 %v851_v46, 0.0  ;;  %v587_v45 = vld [vmem:[%s7318_s4 + $0x8] sm:$0xff] }
 0x112   : > { %v853_v59 = vpop.f32.mrf.mxu0  ;;  %4869 = vmatmul.mubr.bf16.gmra.mxu1 %v924_v51 }
 0x113   : > { %v908_v61 = vmax.f32 %v862_v57, 0.0  ;;  %v854_v62 = vadd.f32 %v5533_v43, %v853_v59 }
 0x114   : > { %v4830_v63 = vpop.f32.mrf.mxu0 }
 0x115   : > { %v906_v0 = vmax.f32 %v854_v62, 0.0  ;;  %v926_v3 = vpack.c.bf16 %v908_v61, %v907_v58  ;;  %v875_v6 = vadd.f32 %v4830_v63, %v5533_v43  ;;  %v609_v63 = vld [vmem:[%s7319_s5] sm:$0x1] }
 0x116   : > { %v866_v13 = vpop.f32.mrf.mxu0 }
 0x117   : > { %v925_v14 = vpack.c.bf16 %v906_v0, %v905_v60  ;;  %v867_v15 = vadd.f32 %v5533_v43, %v866_v13  ;;  %v911_v18 = vmax.f32 %v875_v6, 0.0 }
 0x118   : > { %v4831_v16 = vpop.f32.mrf.mxu0 }
 0x119   : > { %v878_v17 = vadd.f32 %v4831_v16, %v5533_v43  ;;  %4872 = vmatprep.mubr.bf16.mxu1 %v925_v14  ;;  %v909_v20 = vmax.f32 %v867_v15, 0.0  ;;  %v1353_v15 = vlaneseq }
 0x11a   : > { %v869_v19 = vpop.f32.mrf.mxu0  ;;  %4873 = vmatmul.mubr.bf16.gmra.mxu1 %v926_v3 }
 0x11b   : > { %v912_v23 = vmax.f32 %v878_v17, 0.0  ;;  %v870_v28 = vadd.f32 %v5533_v43, %v869_v19  ;;  %v5584_v16 = vshrl.u32 %v1353_v15, 7 }
 0x11d   : > { %v910_v31 = vmax.f32 %v870_v28, 0.0  ;;  %v928_v32 = vpack.c.bf16 %v912_v23, %v911_v18  ;;  %v5587_v17 = vadd.s32 8, %v5584_v16  ;;  %v5590_v18 = vadd.s32 24, %v5584_v16  ;;  %v5599_v28 = vld [vmem:[%s7323_s9] ss:$0 sm:$0xff] }
 0x11e   : > { %v1355_v23 = vsub.s32 0, %v5584_v16  ;;  %vm2159_vm2 = vcmp.lt.s32.totalorder %v5584_v16, 7 }
 0x11f   : > { %v927_v35 = vpack.c.bf16 %v910_v31, %v909_v20  ;;  %v5593_v20 = vadd.s32 40, %v5584_v16 }
 0x121   : > { %4876 = vmatprep.mubr.bf16.mxu1 %v927_v35  ;;  %v5603_v35 = vadd.s32 56, %v5584_v16 }
 0x122   : > { %4877 = vmatmul.mubr.bf16.gmra.mxu1 %v928_v32 }
 0x16c   : > { %v591_v42 = vpop.permute.xlu1 %590 }
 0x16d   : > { %v598_v44 = vmul.f32 %v591_v42, %v586_v39  ;;  %v5606_v39 = vadd.s32 72, %v5584_v16  ;;  %v4928_v42 = vld [vmem:[%s7324_s10 + $0x98] sm:$0xff]  }
 0x16e   : > { %3189 = vmatpush1.bf16.msra.mxu0 %v4928_v42  ;;  %4892 = vmatpush1.bf16.msra.mxu1 %v4928_v42 }
 0x16f   : > { %v600_v51 = vsel %vm499_vm0, %v598_v44, 0.0  ;;  %7352 = vst [vmem:[#allocation3_spill] sm:$0xff] %v5606_v39  ;;  %v5610_v44 = vadd.s32 152, %v5584_v16  ;;  %v4929_v39 = vld [vmem:[%s7324_s10 + $0x90] sm:$0xff]  }
 0x170   : > { %v596_v46 = vpop.permute.xlu1 %595 }
 0x171   : > { %v599_v54 = vmul.f32 %v596_v46, %v587_v45  ;;  %7353 = vst [vmem:[#allocation4_spill] sm:$0xff] %v5610_v44  ;;  %v5613_v45 = vadd.s32 168, %v5584_v16  ;;  %v5616_v46 = vadd.s32 16, %v5584_v16 }
 0x173   : > { %v601_v43 = vsel %vm499_vm0, %v599_v54, 0.0  ;;  %7354 = vst [vmem:[#allocation5_spill] sm:$0xff] %v5613_v45  ;;  %7355 = vst [vmem:[#allocation6_spill] sm:$0xff] %v5616_v46  ;;  %v7359_v46 = vmov 0  }
 0x174   : > { %v602_v57 = vadd.f32 %v601_v43, %v600_v51  ;;  %v5619_v43 = vadd.s32 184, %v5584_v16  ;;  %3190 = vmatprep.subr.bf16.mxu0 %v7359_v46  ;;  %4881 = vmatprep.subr.bf16.mxu1 %v7359_v46 }
 0x175   : > { %3191 = vmatpush1.bf16.msra.mxu0 %v4929_v39  ;;  %4893 = vmatpush1.bf16.msra.mxu1 %v4929_v39 }
 0x176   : > { %v603_v58 = vrot.slane %v602_v57, 4  ;;  %3192 = vmatprep.subr.bf16.mxu0 %v7359_v46  ;;  %4882 = vmatprep.subr.bf16.mxu1 %v7359_v46 }
 0x178   : > { %v604_v59 = vadd.f32 %v603_v58, %v602_v57  ;;  %v5622_v57 = vadd.s32 200, %v5584_v16  ;;  %v5625_v58 = vadd.s32 88, %v5584_v16 }
 0x17a   : > { %v605_v60 = vrot.slane %v604_v59, 2 }
 0x17c   : > { %v606_v61 = vadd.f32 %v605_v60, %v604_v59  ;;  %v5628_v59 = vadd.s32 104, %v5584_v16 }
 0x17e   : > { %v607_v62 = vrot.slane %v606_v61, 1 }
 0x180   : > { %v608_v0 = vadd.f32 %v607_v62, %v606_v61  ;;  %v5633_v62 = vadd.s32 216, %v5584_v16 }
 0x182   : > { %v610_v3 = vadd.f32 %v609_v63, %v608_v0  ;;  %v5636_v63 = vadd.s32 120, %v5584_v16 }
 0x184   : > { %v4289_v6 = vmul.f32 -1.442695, %v610_v3  ;;  %7356 = vst [vmem:[#allocation7_spill] sm:$0xff] %v5636_v63  ;;  %v5662_v3 = vadd.s32 232, %v5584_v16 }
 0x186   : > { %5013 = vpow2.f32 %v4289_v6 }
 0x193   : > { %v5014_v13 = vpop.eup %5013 }
 0x194   : > { %v614_v14 = vadd.f32 1.0, %v5014_v13  ;;  %v5641_v13 = vadd.s32 136, %v5584_v16 }
 0x196   : > { %5015 = vrcp.f32 %v614_v14  ;;  %7357 = vst [vmem:[#allocation8_spill] sm:$0xff] %v5641_v13  ;;  %v5644_v14 = vadd.s32 32, %v5584_v16 }
 0x198   : > { %7358 = vst [vmem:[#allocation9_spill] sm:$0xff] %v5644_v14 }
 0x1a3   : > { %v5016_v51 = vpop.eup %5015 }
 0x1a4   : > { %v5646_v15 = vrot.slane %v5016_v51, %v1355_v23  ;;  %v5668_v23 = vadd.s32 48, %v5584_v16 }
 0x1a6   : > { %7360 = vst [vmem:[#allocation10_spill] sm:$0xff] %v5668_v23  ;;  %v5680_v45 = vmul.f32 %v5646_v15, %v5293_v8  ;;  %v5684_v36 = vmul.f32 %v5646_v15, %v5296_v9  ;;  %v5699_v8 = vmul.f32 %v5646_v15, %v5324_v21  ;;  %v5703_v9 = vmul.f32 %v5646_v15, %v5327_v22 }
 0x1a7   : > { %v5713_v21 = vmul.f32 %v5646_v15, %v5331_v25  ;;  %v5722_v63 = vmul.f32 %v5646_v15, %v5334_v26  ;;  %v5726_v25 = vmul.f32 %v5646_v15, %v5358_v48  ;;  %v4931_v26 = vld [vmem:[%s7324_s10 + $0x80] sm:$0xff]   ;;  %v5739_v48 = vmul.f32 %v5646_v15, %v5369_v55 }
 0x1a8   : > { %v5753_v55 = vmul.f32 %v5646_v15, %v5407_v27 }
 0x1aa   : > { %v4850_v19 = vpop.f32.mrf.mxu1  ;;  %7361 = vst [vmem:[#allocation11_spill] sm:$0xff] %v5753_v55 }
 0x1ab   : > { %v1043_v60 = vadd.f32 %v4850_v19, %v5599_v28 }
 0x1ac   : > { %v1034_v31 = vpop.f32.mrf.mxu1 }
 0x1ad   : > { %v4322_v51 = vmul.f32 -1.442695, %v1043_v60  ;;  %v1035_v19 = vadd.f32 %v5599_v28, %v1034_v31  ;;  %v5672_v31 = vmul.f32 %v5646_v15, %v5281_v4  ;;  %v5676_v60 = vmul.f32 %v5646_v15, %v5284_v5 }
 0x1ae   : > { %v4851_v54 = vpop.f32.mrf.mxu1  ;;  %v5691_v4 = vmul.f32 %v5646_v15, %v5299_v10  ;;  %v5695_v5 = vmul.f32 %v5646_v15, %v5302_v11  ;;  %v4930_v11 = vld [vmem:[%s7324_s10 + $0x88] sm:$0xff]  }
 0x1af   : > { %5017 = vpow2.f32 %v4322_v51  ;;  %v4320_v42 = vmul.f32 -1.442695, %v1035_v19  ;;  %v1046_v10 = vadd.f32 %v4851_v54, %v5599_v28  ;;  %3193 = vmatpush1.bf16.msra.mxu0 %v4930_v11  ;;  %4894 = vmatpush1.bf16.msra.mxu1 %v4930_v11 }
 0x1b0   : > { %v1037_v0 = vpop.f32.mrf.mxu1  ;;  %3194 = vmatprep.subr.bf16.mxu0 %v7359_v46  ;;  %4883 = vmatprep.subr.bf16.mxu1 %v7359_v46 }
 0x1b1   : > { %v1038_v6 = vadd.f32 %v5599_v28, %v1037_v0  ;;  %5019 = vpow2.f32 %v4320_v42  ;;  %v4323_v54 = vmul.f32 -1.442695, %v1046_v10  ;;  %v5731_v42 = vmul.f32 %v5646_v15, %v5361_v49 }
 0x1b2   : > { %v4854_v32 = vpop.f32.mrf.mxu1 }
 0x1b3   : > { %v1059_v22 = vadd.f32 %v4854_v32, %v5599_v28  ;;  %v4321_v0 = vmul.f32 -1.442695, %v1038_v6  ;;  %5021 = vpow2.f32 %v4323_v54  ;;  %v5766_v54 = vmul.f32 %v5646_v15, %v5425_v37  ;;  %3195 = vmatpush1.bf16.msra.mxu0 %v4931_v26  ;;  %4895 = vmatpush1.bf16.msra.mxu1 %v4931_v26 }
 0x1b4   : > { %v1050_v44 = vpop.f32.mrf.mxu1  ;;  %v5782_v37 = vmul.f32 %v5646_v15, %v5435_v41  ;;  %3196 = vmatprep.subr.bf16.mxu0 %v7359_v46  ;;  %v5796_v41 = vmul.f32 %v5646_v15, %v5450_v52  ;;  %4884 = vmatprep.subr.bf16.mxu1 %v7359_v46  ;;  %v4933_v52 = vld [vmem:[%s7324_s10 + $0x70] sm:$0xff]  }
 0x1b5   : > { %v1051_v14 = vadd.f32 %v5599_v28, %v1050_v44  ;;  %v4326_v32 = vmul.f32 -1.442695, %v1059_v22  ;;  %5023 = vpow2.f32 %v4321_v0  ;;  %v5748_v22 = vmul.f32 %v5646_v15, %v5404_v24 }
 0x1b6   : > { %v4855_v61 = vpop.f32.mrf.mxu1  ;;  %v5778_v0 = vmul.f32 %v5646_v15, %v5432_v40  ;;  %v5792_v40 = vmul.f32 %v5646_v15, %v5446_v50 }
 0x1b7   : > { %v1062_v51 = vadd.f32 %v4855_v61, %v5599_v28  ;;  %v4324_v44 = vmul.f32 -1.442695, %v1051_v14  ;;  %v5743_v14 = vmul.f32 %v5646_v15, %v5372_v56  ;;  %5025 = vpow2.f32 %v4326_v32 }
 0x1b8   : > { %v1053_v19 = vpop.f32.mrf.mxu1  ;;  %v5757_v56 = vmul.f32 %v5646_v15, %v5411_v29  ;;  %v4932_v29 = vld [vmem:[%s7324_s10 + $0x78] sm:$0xff]  }
 0x1b9   : > { %v1054_v13 = vadd.f32 %v5599_v28, %v1053_v19  ;;  %v4327_v6 = vmul.f32 -1.442695, %v1062_v51  ;;  %5027 = vpow2.f32 %v4324_v44  ;;  %v5787_v44 = vmul.f32 %v5646_v15, %v5443_v47  ;;  %3197 = vmatpush1.bf16.msra.mxu0 %v4932_v29  ;;  %4896 = vmatpush1.bf16.msra.mxu1 %v4932_v29 }
 0x1ba   : > { %v4858_v61 = vpop.f32.mrf.mxu1  ;;  %7362 = vst [vmem:[#allocation12_spill] sm:$0xff] %v5757_v56  ;;  %3198 = vmatprep.subr.bf16.mxu0 %v7359_v46  ;;  %4885 = vmatprep.subr.bf16.mxu1 %v7359_v46 }
 0x1bb   : > { %v1075_v39 = vadd.f32 %v4858_v61, %v5599_v28  ;;  %v4325_v49 = vmul.f32 -1.442695, %v1054_v13  ;;  %v5761_v13 = vmul.f32 %v5646_v15, %v5414_v30  ;;  %5029 = vpow2.f32 %v4327_v6 }
 0x1bc   : > { %v1066_v10 = vpop.f32.mrf.mxu1  ;;  %v5774_v30 = vmul.f32 %v5646_v15, %v5428_v38  ;;  %v5800_v6 = vmul.f32 %v5646_v15, %v5453_v53  ;;  %v5813_v53 = vmul.f32 %v5646_v15, %v5469_v2 }
 0x1bd   : > { %v4330_v51 = vmul.f32 -1.442695, %v1075_v39  ;;  %v1067_v19 = vadd.f32 %v5599_v28, %v1066_v10  ;;  %7363 = vst [vmem:[#allocation13_spill] sm:$0xff] %v5761_v13  ;;  %5031 = vpow2.f32 %v4325_v49  ;;  %v5805_v39 = vmul.f32 %v5646_v15, %v5466_v1  ;;  %v5018_v49 = vpop.eup %5017  ;;  %3199 = vmatpush1.bf16.msra.mxu0 %v4933_v52  ;;  %4897 = vmatpush1.bf16.msra.mxu1 %v4933_v52  ;;  %v4935_v52 = vld [vmem:[%s7324_s10 + $0x60] sm:$0xff]  }
 0x1be   : > { %v4859_v24 = vpop.f32.mrf.mxu1  ;;  %v5817_v10 = vmul.f32 %v5646_v15, %v5473_v7  ;;  %v5821_v1 = vmul.f32 %v5646_v15, %v5476_v12  ;;  %v5830_v7 = vmul.f32 %v5646_v15, %v5492_v33  ;;  %v5834_v12 = vmul.f32 %v5646_v15, %v5495_v34  ;;  %v4934_v33 = vld [vmem:[%s7324_s10 + $0x68] sm:$0xff]   ;;  %3200 = vmatprep.subr.bf16.mxu0 %v7359_v46 }
 0x1bf   : > { %v4328_v11 = vmul.f32 -1.442695, %v1067_v19  ;;  %v1078_v27 = vadd.f32 %v4859_v24, %v5599_v28  ;;  %5033 = vpow2.f32 %v4330_v51  ;;  %v5824_v19 = vadd.s32 248, %v5584_v16  ;;  %4886 = vmatprep.subr.bf16.mxu1 %v7359_v46 }
 0x1c0   : > { %v1069_v32 = vpop.f32.mrf.mxu1  ;;  %v1259_v24 = vadd.f32 1.0, %v5018_v49  ;;  %7365 = vst [vmem:[#allocation15_spill] sm:$0xff] %v5830_v7  ;;  %7366 = vst [vmem:[#allocation16_spill] sm:$0xff] %v5834_v12  ;;  %v5847_v34 = vadd.s32 96, %v5584_v16  ;;  %v5857_v13 = vadd.s32 144, %v5584_v16 }
 0x1c1   : > { %v4331_v61 = vmul.f32 -1.442695, %v1078_v27  ;;  %v1070_v38 = vadd.f32 %v5599_v28, %v1069_v32  ;;  %5035 = vpow2.f32 %v4328_v11  ;;  %7364 = vst [vmem:[#allocation14_spill] sm:$0xff] %v5824_v19  ;;  %v5020_v27 = vpop.eup %5019  ;;  %3201 = vmatpush1.bf16.msra.mxu0 %v4934_v33  ;;  %4898 = vmatpush1.bf16.msra.mxu1 %v4934_v33 }
 0x1c2   : > { %v4862_v47 = vpop.f32.mrf.mxu1  ;;  %v1257_v29 = vadd.f32 1.0, %v5020_v27  ;;  %7369 = vst [vmem:[#allocation19_spill] sm:$0xff] %v5847_v34  ;;  %v5022_v15 = vpop.eup %5021  ;;  %7371 = vst [vmem:[#allocation21_spill] sm:$0xff] %v5857_v13  ;;  %3202 = vmatprep.subr.bf16.mxu0 %v7359_v46  ;;  %4887 = vmatprep.subr.bf16.mxu1 %v7359_v46 }
 0x1c3   : > { %5037 = vpow2.f32 %v4331_v61  ;;  %v4329_v26 = vmul.f32 -1.442695, %v1070_v38  ;;  %v1091_v50 = vadd.f32 %v4862_v47, %v5599_v28  ;;  %v5838_v61 = vadd.s32 64, %v5584_v16 }
 0x1c4   : > { %v1082_v51 = vpop.f32.mrf.mxu1  ;;  %v5841_v38 = vadd.s32 80, %v5584_v16 }
 0x1c5   : > { %5039 = vpow2.f32 %v4329_v26  ;;  %v4334_v11 = vmul.f32 -1.442695, %v1091_v50  ;;  %v1083_v2 = vadd.f32 %v5599_v28, %v1082_v51  ;;  %7367 = vst [vmem:[#allocation17_spill] sm:$0xff] %v5838_v61  ;;  %v5853_v51 = vadd.s32 112, %v5584_v16  ;;  %3203 = vmatpush1.bf16.msra.mxu0 %v4935_v52  ;;  %4899 = vmatpush1.bf16.msra.mxu1 %v4935_v52  ;;  %v4936_v52 = vld [vmem:[%s7324_s10 + $0xb8] sm:$0xff]  }
 0x1c6   : > { %v4863_v32 = vpop.f32.mrf.mxu1  ;;  %7368 = vst [vmem:[#allocation18_spill] sm:$0xff] %v5841_v38  ;;  %5041 = vrcp.f32 %v1259_v24  ;;  %v5024_v24 = vpop.eup %5023  ;;  %3212 = vmatprep.subr.bf16.mxu0 %v7359_v46  ;;  %4888 = vmatprep.subr.bf16.mxu1 %v7359_v46 }
 0x1c7   : > { %v4332_v47 = vmul.f32 -1.442695, %v1083_v2  ;;  %5043 = vpow2.f32 %v4334_v11  ;;  %7370 = vst [vmem:[#allocation20_spill] sm:$0xff] %v5853_v51  ;;  %v1260_v2 = vadd.f32 1.0, %v5022_v15  ;;  %v5026_v11 = vpop.eup %5025  ;;  %v1258_v56 = vadd.f32 1.0, %v5024_v24 }
 0x1c8   : > { %v1085_v26 = vpop.f32.mrf.mxu1  ;;  %5045 = vrcp.f32 %v1257_v29  ;;  %v5028_v12 = vpop.eup %5027  ;;  %v1263_v29 = vadd.f32 1.0, %v5026_v11  ;;  %v5867_v24 = vadd.s32 128, %v5584_v16  ;;  %v1094_v49 = vadd.f32 %v4863_v32, %v5599_v28 }
 0x1c9   : > { %5047 = vpow2.f32 %v4332_v47  ;;  %v5030_v47 = vpop.eup %5029  ;;  %v1261_v27 = vadd.f32 1.0, %v5028_v12  ;;  %v1086_v38 = vadd.f32 %v5599_v28, %v1085_v26  ;;  %v5877_v32 = vadd.s32 160, %v5584_v16  ;;  %3213 = vmatpush2.bf16.msra.mxu0 %v4936_v52  ;;  %4900 = vmatpush2.bf16.msra.mxu1 %v4936_v52 }
 0x1ca   : > { %v4866_v50 = vpop.f32.mrf.mxu1  ;;  %5049 = vrcp.f32 %v1260_v2  ;;  %7372 = vst [vmem:[#allocation22_spill] sm:$0xff] %v5867_v24  ;;  %v5032_v11 = vpop.eup %5031  ;;  %v1264_v23 = vadd.f32 1.0, %v5030_v47  ;;  %3214 = vmatprep.subr.bf16.mxu0 %v7359_v46  ;;  %4889 = vmatprep.subr.bf16.mxu1 %v7359_v46 }
 0x1cb   : > { %5051 = vrcp.f32 %v1258_v56  ;;  %v1262_v19 = vadd.f32 1.0, %v5032_v11  ;;  %v1107_v56 = vadd.f32 %v4866_v50, %v5599_v28  ;;  %7373 = vst [vmem:[#allocation23_spill] sm:$0xff] %v5877_v32  ;;  %v4335_v11 = vmul.f32 -1.442695, %v1094_v49 }
 0x1cc   : > { %v1098_v61 = vpop.f32.mrf.mxu1  ;;  %5053 = vrcp.f32 %v1263_v29  ;;  %v5034_v34 = vpop.eup %5033  ;;  %v4333_v13 = vmul.f32 -1.442695, %v1086_v38 }
 0x1cd   : > { %5055 = vrcp.f32 %v1261_v27  ;;  %v1267_v29 = vadd.f32 1.0, %v5034_v34  ;;  %v1099_v47 = vadd.f32 %v5599_v28, %v1098_v61  ;;  %v4338_v34 = vmul.f32 -1.442695, %v1107_v56 }
 0x1ce   : > { %v4867_v12 = vpop.f32.mrf.mxu1  ;;  %v5036_v2 = vpop.eup %5035  ;;  %5057 = vrcp.f32 %v1264_v23  ;;  %v5884_v23 = vadd.s32 176, %v5584_v16 }
 0x1cf   : > { %5059 = vrcp.f32 %v1262_v19  ;;  %v1265_v27 = vadd.f32 1.0, %v5036_v2  ;;  %v1110_v50 = vadd.f32 %v4867_v12, %v5599_v28  ;;  %v4336_v12 = vmul.f32 -1.442695, %v1099_v47  ;;  %v5145_v47 = vld [vmem:[%s5308_s22 + $0x10] sm:$0xff] }
 0x1d0   : > { %v5038_v26 = vpop.eup %5037  ;;  %v1101_v15 = vpop.f32.mrf.mxu1  ;;  %5061 = vrcp.f32 %v1267_v29  ;;  %7374 = vst [vmem:[#allocation24_spill] sm:$0xff] %v5884_v23 }
 0x1d1   : > { %v1268_v51 = vadd.f32 1.0, %v5038_v26  ;;  %5063 = vrcp.f32 %v1265_v27  ;;  %v1102_v33 = vadd.f32 %v5599_v28, %v1101_v15  ;;  %v4339_v56 = vmul.f32 -1.442695, %v1110_v50 }
 0x1d2   : > { %v5040_v61 = vpop.eup %5039  ;;  %v4870_v19 = vpop.f32.mrf.mxu1  ;;  %v5895_v27 = vadd.s32 192, %v5584_v16 }
 0x1d3   : > { %5065 = vrcp.f32 %v1268_v51  ;;  %v1266_v2 = vadd.f32 1.0, %v5040_v61  ;;  %v1123_v38 = vadd.f32 %v4870_v19, %v5599_v28  ;;  %v5042_v29 = vpop.eup %5041 }
 0x1d4   : > { %5067 = vpow2.f32 %v4335_v11  ;;  %v1114_v26 = vpop.f32.mrf.mxu1  ;;  %7375 = vst [vmem:[#allocation25_spill] sm:$0xff] %v5895_v27  ;;  %v5044_v24 = vpop.eup %5043  ;;  %v1391_v61 = vmul.f32 %v5145_v47, %v5042_v29  ;;  %v4337_v11 = vmul.f32 -1.442695, %v1102_v33  ;;  %v5146_v47 = vld [vmem:[%s5308_s22] sm:$0xff] }
 0x1d5   : > { %5069 = vrcp.f32 %v1266_v2  ;;  %v1115_v51 = vadd.f32 %v5599_v28, %v1114_v26  ;;  %v5046_v49 = vpop.eup %5045  ;;  %v1271_v32 = vadd.f32 1.0, %v5044_v24  ;;  %v4342_v50 = vmul.f32 -1.442695, %v1123_v38  ;;  %v4937_v2 = vld [vmem:[%s7324_s10 + $0xb0] sm:$0xff]  }
 0x1d6   : > { %5071 = vpow2.f32 %v4333_v13  ;;  %v4871_v15 = vpop.f32.mrf.mxu1  ;;  %v5048_v29 = vpop.eup %5047  ;;  %v1423_v52 = vadd.f32 %v1391_v61, %v5680_v45  ;;  %v1389_v19 = vmul.f32 %v5146_v47, %v5046_v49  ;;  %3215 = vmatpush2.bf16.msra.mxu0 %v4937_v2  ;;  %4901 = vmatpush2.bf16.msra.mxu1 %v4937_v2 }
 0x1d7   : > { %5073 = vpow2.f32 %v4338_v34  ;;  %v1126_v26 = vadd.f32 %v4871_v15, %v5599_v28  ;;  %v5050_v24 = vpop.eup %5049  ;;  %v1269_v33 = vadd.f32 1.0, %v5048_v29  ;;  %v4340_v38 = vmul.f32 -1.442695, %v1115_v51  ;;  %3216 = vmatprep.subr.bf16.mxu0 %v7359_v46  ;;  %4890 = vmatprep.subr.bf16.mxu1 %v7359_v46 }
 0x1d8   : > { %5075 = vrcp.f32 %v1271_v32  ;;  %v1117_v23 = vpop.f32.mrf.mxu1  ;;  %v5052_v7 = vpop.eup %5051  ;;  %v5909_v55 = vmul.f32 2.0, %v1423_v52  ;;  %v7376_v15 = vand.u32 15, %v5587_v17  ;;  %v1421_v49 = vadd.f32 %v1389_v19, %v5672_v31  ;;  %v5148_v52 = vld [vmem:[%s5308_s22 + $0x18] sm:$0xff]  ;;  %v4938_v17 = vld [vmem:[%s7324_s10 + $0xa8] sm:$0xff]  }
 0x1d9   : > { %5077 = vpow2.f32 %v4336_v12  ;;  %v4343_v34 = vmul.f32 -1.442695, %v1126_v26  ;;  %v1118_v45 = vadd.f32 %v5599_v28, %v1117_v23  ;;  %v5918_v32 = vpop.eup %5053  ;;  %v5147_v12 = vld [vmem:[%s5308_s22 + $0x8] sm:$0xff]  ;;  %v1392_v23 = vmul.f32 %v5148_v52, %v5050_v24  ;;  %v5149_v52 = vld [vmem:[%s5308_s22 + $0x20] sm:$0xff] }
 0x1da   : > { %vm5914_vm1 = vcmp.eq.s32.totalorder %v7376_v15, 15  ;;  %5079 = vrcp.f32 %v1269_v33  ;;  %v4874_v51 = vpop.f32.mrf.mxu1  ;;  %v1390_v29 = vmul.f32 %v5147_v12, %v5052_v7  ;;  %v5056_v2 = vpop.eup %5055  ;;  %v4686_v31 = vpack.c.bf16 %v5909_v55, %v5909_v55  ;;  %3217 = vmatpush2.bf16.msra.mxu0 %v4938_v17  ;;  %4902 = vmatpush2.bf16.msra.mxu1 %v4938_v17 }
 0x1db   : > { %5081 = vpow2.f32 %v4339_v56  ;;  %v4341_v19 = vmul.f32 -1.442695, %v1118_v45  ;;  %v5932_v26 = vpop.eup %5057  ;;  %v5934_v24 = vmul.f32 2.0, %v1421_v49  ;;  %v1139_v33 = vadd.f32 %v4874_v51, %v5599_v28  ;;  %3218 = vmatprep.subr.bf16.mxu0 %v7359_v46  ;;  %4891 = vmatprep.subr.bf16.mxu1 %v7359_v46 }
 0x1dc   : > { %5083 = vpow2.f32 %v4337_v11  ;;  %v1422_v47 = vadd.f32 %v1390_v29, %v5676_v60  ;;  %v1130_v15 = vpop.f32.mrf.mxu1  ;;  %v5060_v12 = vpop.eup %5059  ;;  %2556 = vrot.lane.b32.xlu1 %v4686_v31, %s5186_s15  ;;  %v1424_v45 = vadd.f32 %v1392_v23, %v5684_v36  ;;  %v1393_v13 = vmul.f32 %v5149_v52, %v5056_v2 }
 0x1dd   : > { %7379 = vst [vmem:[#allocation26_spill] sm:$0xff] %v5934_v24  ;;  %5085 = vpow2.f32 %v4342_v50  ;;  %v1131_v56 = vadd.f32 %v5599_v28, %v1130_v15  ;;  %v5942_v11 = vpop.eup %5061  ;;  %v4684_v60 = vpack.c.bf16 %v5934_v24, %v5934_v24  ;;  %v4346_v50 = vmul.f32 -1.442695, %v1139_v33 }
 0x1de   : > { %5087 = vpow2.f32 %v4340_v38  ;;  %v4875_v51 = vpop.f32.mrf.mxu1  ;;  %v5948_v29 = vpop.eup %5063  ;;  %v5950_v36 = vmul.f32 2.0, %v1422_v47  ;;  %v4939_v38 = vld [vmem:[%s7324_s10 + $0xa0] sm:$0xff]   ;;  %v5960_v17 = vmul.f32 2.0, %v1424_v45  ;;  %v1425_v15 = vadd.f32 %v1393_v13, %v5691_v4 }
 0x1df   : > { %5089 = vpow2.f32 %v4343_v34  ;;  %v4344_v23 = vmul.f32 -1.442695, %v1131_v56  ;;  %v1142_v2 = vadd.f32 %v4875_v51, %v5599_v28  ;;  %2552 = vrot.lane.b32.xlu0 %v4684_v60, %s5186_s15  ;;  %v5150_v34 = vld [vmem:[%s5308_s22 + $0x28] sm:$0xff]  ;;  %3219 = vmatpush2.bf16.msra.mxu0 %v4939_v38  ;;  %v7380_v13 = vrot.slane %v5909_v55, 1 }
 0x1e0   : > { %v5957_v31 = vpop.eup %5065  ;;  %5091 = vpow2.f32 %v4341_v19  ;;  %v1133_v33 = vpop.f32.mrf.mxu1  ;;  %v1394_v47 = vmul.f32 %v5150_v34, %v5060_v12  ;;  %v4685_v52 = vpack.c.bf16 %v5950_v36, %v5950_v36  ;;  %v2128_v51 = vrot.slane %v5950_v36, 1  ;;  %3915 = vmatprep.subr.bf16.mxu0 %v7359_v46  ;;  %4903 = vmatpush2.bf16.msra.mxu1 %v4939_v38 }
 0x1e1   : > { %v5068_v56 = vpop.eup %5067  ;;  %5093 = vpow2.f32 %v4346_v50  ;;  %v4347_v49 = vmul.f32 -1.442695, %v1142_v2  ;;  %v4687_v12 = vpack.c.bf16 %v5960_v17, %v5960_v17  ;;  %v7381_v2 = vrot.slane %v5934_v24, 1  ;;  %3433 = vmatprep.subr.bf16.mxu1 %v7359_v46 }
 0x1e2   : > { %v5967_v7 = vpop.eup %5069  ;;  %v1272_v60 = vadd.f32 1.0, %v5068_v56  ;;  %5095 = vpow2.f32 %v4344_v23  ;;  %v4878_v45 = vpop.f32.mrf.mxu1  ;;  %2554 = vrot.lane.b32.xlu1 %v4685_v52, %s5186_s15  ;;  %v2189_v50 = vsel %vm2159_vm2, %v2128_v51, %v7380_v13  ;;  %v1134_v34 = vadd.f32 %v5599_v28, %v1133_v33 }
 0x1e3   : > { %v5072_v4 = vpop.eup %5071  ;;  %v2190_v23 = vsel %vm2159_vm2, %v7381_v2, %v2128_v51  ;;  %5097 = vpow2.f32 %v4347_v49  ;;  %v2257_v52 = vsel %vm5914_vm1, 0.0, %v2189_v50  ;;  %v7382_v13 = vand.u32 15, %v5590_v18 }
 0x1e4   : > { %v5074_v56 = vpop.eup %5073  ;;  %5099 = vrcp.f32 %v1272_v60  ;;  %v1270_v38 = vadd.f32 1.0, %v5072_v4  ;;  %v4716_v19 = vpack.c.bf16 %v2190_v23, %v2190_v23  ;;  %v1146_v27 = vpop.f32.mrf.mxu1  ;;  %v4717_v33 = vpack.c.bf16 %v2257_v52, %v2257_v52 }
 0x1e5   : > { %vm5988_vm4 = vcmp.eq.s32.totalorder %v7382_v13, 15  ;;  %v5992_v51 = vpop.eup %5075  ;;  %v1275_v49 = vadd.f32 1.0, %v5074_v56  ;;  %v7385_v2 = vrot.slane %v5960_v17, 1  ;;  %v7386_v60 = vrot.slane %v5909_v55, 1 }
 0x1e6   : > { %v4345_v4 = vmul.f32 -1.442695, %v1134_v34  ;;  %v5078_v50 = vpop.eup %5077  ;;  %5101 = vrcp.f32 %v1270_v38  ;;  %2809 = vst.msk [vmem:[#allocation2 + $0x14] sm:$0xf] %vm2423_vm3, %v4716_v19  ;;  %v1155_v23 = vadd.f32 %v4878_v45, %v5599_v28  ;;  %v1426_v13 = vadd.f32 %v1394_v47, %v5695_v5  ;;  %v4879_v46 = vpop.f32.mrf.mxu1  ;;  %2810 = vst.msk [vmem:[#allocation2 + $0x1c] sm:$0xf] %vm2423_vm3, %v4717_v33  ;;  %2558 = vrot.lane.b32.xlu1 %v4687_v12, %s5186_s15 }
 0x1e7   : > { %v2188_v61 = vsel %vm2159_vm2, %v7386_v60, %v7385_v2  ;;  %v6003_v56 = vpop.eup %5079  ;;  %5103 = vrcp.f32 %v1275_v49  ;;  %v1273_v52 = vadd.f32 1.0, %v5078_v50  ;;  %v1147_v34 = vadd.f32 %v5599_v28, %v1146_v27 }
 0x1e8   : > { %v4718_v18 = vpack.c.bf16 %v2188_v61, %v2188_v61  ;;  %v1158_v38 = vadd.f32 %v4879_v46, %v5599_v28  ;;  %v5082_v2 = vpop.eup %5081  ;;  %5105 = vpow2.f32 %v4345_v4  ;;  %v4350_v19 = vmul.f32 -1.442695, %v1155_v23  ;;  %v1149_v5 = vpop.f32.mrf.mxu1 }
 0x1e9   : > { %v6010_v45 = vmul.f32 2.0, %v1426_v13  ;;  %v6012_v47 = vmul.f32 2.0, %v1425_v15  ;;  %v5084_v49 = vpop.eup %5083  ;;  %5107 = vrcp.f32 %v1273_v52  ;;  %v1276_v60 = vadd.f32 1.0, %v5082_v2 }
 0x1ea   : > { %2811 = vst.msk [vmem:[#allocation2 + $0x24] sm:$0xf] %vm2423_vm3, %v4718_v18  ;;  %v4348_v33 = vmul.f32 -1.442695, %v1147_v34  ;;  %v6014_v61 = vmul.f32 -1.442695, %v1158_v38  ;;  %v5086_v12 = vpop.eup %5085  ;;  %5109 = vpow2.f32 %v4350_v19  ;;  %v1150_v15 = vadd.f32 %v5599_v28, %v1149_v5 }
 0x1eb   : > { %v1274_v27 = vadd.f32 1.0, %v5084_v49  ;;  %v2132_v46 = vrot.slane %v6010_v45, 1  ;;  %v4689_v4 = vpack.c.bf16 %v6010_v45, %v6010_v45  ;;  %v5088_v50 = vpop.eup %5087  ;;  %5111 = vrcp.f32 %v1276_v60  ;;  %v5151_v19 = vld [vmem:[%s5308_s22 + $0x30] sm:$0xff] }
 0x1ec   : > { %v1279_v18 = vadd.f32 1.0, %v5086_v12  ;;  %v2131_v23 = vrot.slane %v6012_v47, 1  ;;  %v7387_v13 = vand.u32 15, %v5593_v20  ;;  %v5090_v34 = vpop.eup %5089  ;;  %v1277_v38 = vadd.f32 1.0, %v5088_v50 }
 0x1ed   : > { %5113 = vrcp.f32 %v1274_v27  ;;  %2562 = vrot.lane.b32.xlu0 %v4689_v4, %s5186_s15  ;;  %v4688_v2 = vpack.c.bf16 %v6012_v47, %v6012_v47  ;;  %v1395_v49 = vmul.f32 %v5151_v19, %v5918_v32  ;;  %v5092_v28 = vpop.eup %5091  ;;  %v1280_v5 = vadd.f32 1.0, %v5090_v34 }
 0x1ee   : > { %vm6023_vm5 = vcmp.eq.s32.totalorder %v7387_v13, 15  ;;  %5115 = vrcp.f32 %v1279_v18  ;;  %v4349_v60 = vmul.f32 -1.442695, %v1150_v15  ;;  %v2186_v20 = vsel %vm2159_vm2, %v2131_v23, %v2132_v46  ;;  %v5094_v12 = vpop.eup %5093 }
 0x1ef   : > { %5117 = vrcp.f32 %v1277_v38  ;;  %v1278_v27 = vadd.f32 1.0, %v5092_v28  ;;  %v7390_v4 = vrot.slane %v5960_v17, 1  ;;  %v4720_v13 = vpack.c.bf16 %v2186_v20, %v2186_v20  ;;  %v5096_v32 = vpop.eup %5095  ;;  %v5159_v38 = vld [vmem:[%s5308_s22 + $0xa0] sm:$0xff] }
 0x1f0   : > { %5119 = vrcp.f32 %v1280_v5  ;;  %v1283_v18 = vadd.f32 1.0, %v5094_v12  ;;  %v1427_v34 = vadd.f32 %v1395_v49, %v5699_v8  ;;  %v7391_v19 = vand.u32 15, %v5603_v35  ;;  %v5098_v28 = vpop.eup %5097  ;;  %v5152_v5 = vld [vmem:[%s5308_s22 + $0x38] sm:$0xff]  ;;  %v5153_v49 = vld [vmem:[%s5308_s22 + $0x40] sm:$0xff] }
 0x1f1   : > { %v2187_v50 = vsel %vm2159_vm2, %v7390_v4, %v2131_v23  ;;  %5121 = vrcp.f32 %v1278_v27  ;;  %v1281_v23 = vadd.f32 1.0, %v5096_v32  ;;  %2813 = vst.msk [vmem:[#allocation2 + $0x34] sm:$0xf] %vm2423_vm3, %v4720_v13  ;;  %v1396_v24 = vmul.f32 %v5152_v5, %v5932_v26  ;;  %v6052_v12 = vpop.eup %5099  ;;  %v5155_v32 = vld [vmem:[%s5308_s22 + $0x50] sm:$0xff] }
 0x1f2   : > { %v2259_v15 = vsel %vm5988_vm4, 0.0, %v2187_v50  ;;  %vm6045_vm6 = vcmp.eq.s32.totalorder %v7391_v19, 15  ;;  %5123 = vrcp.f32 %v1283_v18  ;;  %v1284_v8 = vadd.f32 1.0, %v5098_v28  ;;  %v5154_v50 = vld [vmem:[%s5308_s22 + $0x48] sm:$0xff] }
 0x1f3   : > { %v4719_v20 = vpack.c.bf16 %v2259_v15, %v2259_v15  ;;  %v6054_v35 = vmul.f32 2.0, %v1427_v34  ;;  %v1397_v4 = vmul.f32 %v5153_v49, %v5948_v29  ;;  %5125 = vrcp.f32 %v1281_v23  ;;  %v6064_v15 = vpop.eup %5101  ;;  %v5162_v29 = vld [vmem:[%s5308_s22 + $0xc0] sm:$0xff] }
 0x1f4   : > { %v1428_v27 = vadd.f32 %v1396_v24, %v5703_v9  ;;  %v1398_v13 = vmul.f32 %v5154_v50, %v5967_v7  ;;  %v1399_v26 = vmul.f32 %v5155_v32, %v5942_v11  ;;  %5127 = vrcp.f32 %v1284_v8  ;;  %v5104_v19 = vpop.eup %5103  ;;  %v5156_v11 = vld [vmem:[%s5308_s22 + $0x90] sm:$0xff] }
 0x1f5   : > { %2812 = vst.msk [vmem:[#allocation2 + $0x2c] sm:$0xf] %vm2423_vm3, %v4719_v20  ;;  %v2133_v18 = vrot.slane %v6054_v35, 1  ;;  %v1429_v34 = vadd.f32 %v1397_v4, %v5713_v21  ;;  %5129 = vpow2.f32 %v4348_v33  ;;  %v5106_v23 = vpop.eup %5105  ;;  %v1407_v20 = vmul.f32 %v5156_v11, %v5104_v19 }
 0x1f6   : > { %v6070_v9 = vmul.f32 2.0, %v1428_v27  ;;  %v1430_v28 = vadd.f32 %v1398_v13, %v5722_v63  ;;  %v1431_v7 = vadd.f32 %v1399_v26, %v5726_v25  ;;  %5131 = vpow2.f32 %v6014_v61  ;;  %v6082_v21 = vpop.eup %5107 }
 0x1f7   : > { %v2185_v5 = vsel %vm2159_vm2, %v2132_v46, %v2133_v18  ;;  %v6080_v24 = vmul.f32 2.0, %v1429_v34  ;;  %v1282_v33 = vadd.f32 1.0, %v5106_v23  ;;  %5133 = vpow2.f32 %v4349_v60  ;;  %v5110_v61 = vpop.eup %5109 }
 0x1f8   : > { %v2261_v63 = vsel %vm6023_vm5, 0.0, %v2185_v5  ;;  %v2134_v25 = vrot.slane %v6070_v9, 1  ;;  %v1439_v8 = vadd.f32 %v1407_v20, %v5766_v54  ;;  %v5112_v27 = vpop.eup %5111  ;;  %v1287_v50 = vadd.f32 1.0, %v5110_v61  ;;  %v5157_v54 = vld [vmem:[%s5308_s22 + $0x98] sm:$0xff] }
 0x1f9   : > { %v4721_v49 = vpack.c.bf16 %v2261_v63, %v2261_v63  ;;  %v2135_v46 = vrot.slane %v6080_v24, 1  ;;  %5135 = vrcp.f32 %v1282_v33  ;;  %v1408_v26 = vmul.f32 %v5157_v54, %v5112_v27  ;;  %v5158_v27 = vld [vmem:[%s5308_s22 + $0xb0] sm:$0xff] }
 0x1fa   : > { %v2184_v60 = vsel %vm2159_vm2, %v2133_v18, %v2134_v25  ;;  %v6095_v13 = vpop.eup %5113  ;;  %v6097_v32 = vmul.f32 2.0, %v1439_v8  ;;  %5137 = vrcp.f32 %v1287_v50  ;;  %v7394_v18 = vld [vmem:[#allocation4_spill] sm:$0xff]  ;;  %v6111_v33 = vmul.f32 2.0, %v1430_v28 }
 0x1fb   : > { %2814 = vst.msk [vmem:[#allocation2 + $0x3c] sm:$0xf] %vm2423_vm3, %v4721_v49  ;;  %v4722_v34 = vpack.c.bf16 %v2184_v60, %v2184_v60  ;;  %v2183_v19 = vsel %vm2159_vm2, %v2134_v25, %v2135_v46  ;;  %v5116_v23 = vpop.eup %5115  ;;  %v7395_v11 = vand.u32 15, %v7394_v18  ;;  %v6113_v63 = vmul.f32 2.0, %v1431_v7 }
 0x1fc   : > { %v2263_v5 = vsel %vm6045_vm6, 0.0, %v2183_v19  ;;  %v5118_v61 = vpop.eup %5117  ;;  %v7351_v8 = vrot.slane %v6097_v32, 1  ;;  %v4702_v25 = vpack.c.bf16 %v6097_v32, %v6097_v32  ;;  %v1440_v49 = vadd.f32 %v1408_v26, %v5774_v30  ;;  %v7398_v26 = vld [vmem:[#allocation5_spill] sm:$0xff] }
 0x1fd   : > { %vm6105_vm7 = vcmp.eq.s32.totalorder %v7395_v11, 15  ;;  %2815 = vst.msk [vmem:[#allocation2 + $0x44] sm:$0xf] %vm2423_vm3, %v4722_v34  ;;  %v1411_v50 = vmul.f32 %v5158_v27, %v5116_v23  ;;  %v5120_v60 = vpop.eup %5119  ;;  %v1409_v28 = vmul.f32 %v5159_v38, %v5118_v61  ;;  %v4723_v54 = vpack.c.bf16 %v2263_v5, %v2263_v5  ;;  %v5160_v61 = vld [vmem:[%s5308_s22 + $0xb8] sm:$0xff] }
 0x1fe   : > { %v7350_v7 = vrot.slane %v6111_v33, 1  ;;  %v5122_v18 = vpop.eup %5121  ;;  %2588 = vrot.lane.b32.xlu1 %v4702_v25, %s5186_s15  ;;  %v6126_v11 = vmul.f32 2.0, %v1440_v49  ;;  %v7399_v34 = vand.u32 15, %v7398_v26  ;;  %v1412_v5 = vmul.f32 %v5160_v61, %v5120_v60  ;;  %v5161_v25 = vld [vmem:[%s5308_s22 + $0xa8] sm:$0xff] }
 0x1ff   : > { %v1443_v30 = vadd.f32 %v1411_v50, %v5787_v44  ;;  %v2137_v27 = vrot.slane %v6113_v63, 1  ;;  %v6137_v38 = vpop.eup %5123  ;;  %v1441_v52 = vadd.f32 %v1409_v28, %v5778_v0  ;;  %v1410_v49 = vmul.f32 %v5161_v25, %v5122_v18  ;;  %2816 = vst.msk [vmem:[#allocation2 + $0x4c] sm:$0xf] %vm2423_vm3, %v4723_v54  ;;  %v7402_v18 = vld [vmem:[#allocation3_spill] sm:$0xff] }
 0x200   : > { %vm6131_vm8 = vcmp.eq.s32.totalorder %v7399_v34, 15  ;;  %v2182_v44 = vsel %vm2159_vm2, %v2135_v46, %v7350_v7  ;;  %v5126_v60 = vpop.eup %5125  ;;  %v2146_v26 = vrot.slane %v6126_v11, 1  ;;  %v4703_v34 = vpack.c.bf16 %v6126_v11, %v6126_v11  ;;  %v5167_v7 = vld [vmem:[%s5308_s22 + $0x60] sm:$0xff] }
 0x201   : > { %v6151_v0 = vmul.f32 2.0, %v1443_v30  ;;  %v1444_v28 = vadd.f32 %v1412_v5, %v5792_v40  ;;  %v7403_v54 = vand.u32 15, %v7402_v18  ;;  %v6160_v46 = vpop.eup %5127  ;;  %v6162_v25 = vmul.f32 2.0, %v1441_v52 }
 0x202   : > { %v1442_v50 = vadd.f32 %v1410_v49, %v5782_v37  ;;  %v4724_v19 = vpack.c.bf16 %v2182_v44, %v2182_v44  ;;  %v1413_v4 = vmul.f32 %v5162_v29, %v5126_v60  ;;  %v7406_v30 = vand.u32 15, %v5619_v43  ;;  %v5130_v40 = vpop.eup %5129  ;;  %2590 = vrot.lane.b32.xlu1 %v4703_v34, %s5186_s15 }
 0x203   : > { %vm6156_vm9 = vcmp.eq.s32.totalorder %v7403_v54, 15  ;;  %v2172_v5 = vsel %vm2159_vm2, %v7351_v8, %v2146_v26  ;;  %v2149_v52 = vrot.slane %v6151_v0, 1  ;;  %v6180_v29 = vmul.f32 2.0, %v1444_v28  ;;  %v5132_v43 = vpop.eup %5131 }
 0x204   : > { %vm6168_vm10 = vcmp.eq.s32.totalorder %v7406_v30, 15  ;;  %v1285_v49 = vadd.f32 1.0, %v5130_v40  ;;  %v4734_v44 = vpack.c.bf16 %v2172_v5, %v2172_v5  ;;  %v2147_v60 = vrot.slane %v6162_v25, 1  ;;  %2817 = vst.msk [vmem:[#allocation2 + $0x54] sm:$0xf] %vm2423_vm3, %v4724_v19  ;;  %v5134_v54 = vpop.eup %5133 }
 0x205   : > { %v4704_v18 = vpack.c.bf16 %v6162_v25, %v6162_v25  ;;  %v1288_v30 = vadd.f32 1.0, %v5132_v43  ;;  %v6186_v34 = vmul.f32 2.0, %v1442_v50  ;;  %v2150_v8 = vrot.slane %v6180_v29, 1 }
 0x206   : > { %v4707_v28 = vpack.c.bf16 %v6180_v29, %v6180_v29  ;;  %5139 = vrcp.f32 %v1285_v49  ;;  %v1286_v37 = vadd.f32 1.0, %v5134_v54  ;;  %2827 = vst.msk [vmem:[#allocation2 + $0xa4] sm:$0xf] %vm2423_vm3, %v4734_v44  ;;  %v2171_v40 = vsel %vm2159_vm2, %v2146_v26, %v2147_v60  ;;  %v5136_v19 = vpop.eup %5135  ;;  %2560 = vrot.lane.b32.xlu1 %v4688_v2, %s5186_s15 }
 0x207   : > { %v1445_v5 = vadd.f32 %v1413_v4, %v5796_v41  ;;  %5141 = vrcp.f32 %v1288_v30  ;;  %v2275_v50 = vsel %vm6105_vm7, 0.0, %v2171_v40  ;;  %v2148_v43 = vrot.slane %v6186_v34, 1  ;;  %v6208_v44 = vpop.eup %5137  ;;  %v5163_v30 = vld [vmem:[%s5308_s22 + $0xc8] sm:$0xff] }
 0x208   : > { %v4705_v49 = vpack.c.bf16 %v6186_v34, %v6186_v34  ;;  %5143 = vrcp.f32 %v1286_v37  ;;  %v4735_v26 = vpack.c.bf16 %v2275_v50, %v2275_v50  ;;  %v2168_v41 = vsel %vm2159_vm2, %v2149_v52, %v2150_v8 }
 0x209   : > { %v6206_v4 = vmul.f32 2.0, %v1445_v5  ;;  %v2170_v2 = vsel %vm2159_vm2, %v2147_v60, %v2148_v43  ;;  %v2169_v20 = vsel %vm2159_vm2, %v2148_v43, %v2149_v52  ;;  %v4738_v54 = vpack.c.bf16 %v2168_v41, %v2168_v41  ;;  %v5164_v41 = vld [vmem:[%s5308_s22 + $0x58] sm:$0xff] }
 0x20a   : > { %2594 = vrot.lane.b32.xlu0 %v4705_v49, %s5186_s15  ;;  %v1414_v37 = vmul.f32 %v5163_v30, %v5136_v19  ;;  %2828 = vst.msk [vmem:[#allocation2 + $0xac] sm:$0xf] %vm2423_vm3, %v4735_v26  ;;  %v4736_v40 = vpack.c.bf16 %v2170_v2, %v2170_v2  ;;  %v2277_v5 = vsel %vm6131_vm8, 0.0, %v2169_v20  ;;  %v7409_v49 = vand.u32 15, %v5622_v57  ;;  %2592 = vrot.lane.b32.xlu1 %v4704_v18, %s5186_s15 }
 0x20b   : > { %v2151_v50 = vrot.slane %v6206_v4, 1  ;;  %v4708_v60 = vpack.c.bf16 %v6206_v4, %v6206_v4  ;;  %v4737_v19 = vpack.c.bf16 %v2277_v5, %v2277_v5  ;;  %2831 = vst.msk [vmem:[#allocation2 + $0xc4] sm:$0xf] %vm2423_vm3, %v4738_v54  ;;  %v7412_v43 = vrot.slane %v6111_v33, 1  ;;  %v5166_v54 = vld [vmem:[%s5308_s22 + $0xd8] sm:$0xff] }
 0x20c   : > { %vm6224_vm11 = vcmp.eq.s32.totalorder %v7409_v49, 15  ;;  %v1446_v23 = vadd.f32 %v1414_v37, %v5800_v6  ;;  %v1400_v57 = vmul.f32 %v5164_v41, %v5957_v31  ;;  %2829 = vst.msk [vmem:[#allocation2 + $0xb4] sm:$0xf] %vm2423_vm3, %v4736_v40  ;;  %v5165_v6 = vld [vmem:[%s5308_s22 + $0xd0] sm:$0xff]  ;;  %v1416_v30 = vmul.f32 %v5166_v54, %v6160_v46 }
 0x20d   : > { %v2181_v26 = vsel %vm2159_vm2, %v7412_v43, %v2137_v27  ;;  %v2167_v18 = vsel %vm2159_vm2, %v2150_v8, %v2151_v50  ;;  %v1415_v20 = vmul.f32 %v5165_v6, %v6137_v38  ;;  %v7413_v37 = vpack.c.bf16 %v6070_v9, %v6070_v9  ;;  %2830 = vst.msk [vmem:[#allocation2 + $0xbc] sm:$0xf] %vm2423_vm3, %v4737_v19 }
 0x20e   : > { %v2265_v2 = vsel %vm6156_vm9, 0.0, %v2181_v26  ;;  %v2279_v31 = vsel %vm6168_vm10, 0.0, %v2167_v18  ;;  %v6255_v8 = vmul.f32 2.0, %v1446_v23  ;;  %v1432_v40 = vadd.f32 %v1400_v57, %v5731_v42  ;;  %v5169_v18 = vld [vmem:[%s5308_s22 + $0x70] sm:$0xff] }
 0x20f   : > { %2566 = vrot.lane.b32.xlu0 %v7413_v37, %s5186_s15  ;;  %v4725_v61 = vpack.c.bf16 %v2265_v2, %v2265_v2  ;;  %v7414_v38 = vand.u32 15, %v5625_v58  ;;  %v4739_v5 = vpack.c.bf16 %v2279_v31, %v2279_v31  ;;  %v1447_v49 = vadd.f32 %v1415_v20, %v5805_v39  ;;  %v5168_v39 = vld [vmem:[%s5308_s22 + $0x68] sm:$0xff] }
 0x210   : > { %v1448_v19 = vadd.f32 %v1416_v30, %v5813_v53  ;;  %v1401_v43 = vmul.f32 %v5167_v7, %v6003_v56  ;;  %v7417_v23 = vpack.c.bf16 %v6054_v35, %v6054_v35  ;;  %v2152_v58 = vrot.slane %v6255_v8, 1 }
 0x211   : > { %vm6260_vm12 = vcmp.eq.s32.totalorder %v7414_v38, 15  ;;  %v4709_v42 = vpack.c.bf16 %v6255_v8, %v6255_v8  ;;  %2818 = vst.msk [vmem:[#allocation2 + $0x5c] sm:$0xf] %vm2423_vm3, %v4725_v61  ;;  %v6276_v26 = vmul.f32 2.0, %v1432_v40  ;;  %v1402_v53 = vmul.f32 %v5168_v39, %v6064_v15  ;;  %2832 = vst.msk [vmem:[#allocation2 + $0xcc] sm:$0xf] %vm2423_vm3, %v4739_v5 }
 0x212   : > { %2564 = vrot.lane.b32.xlu1 %v7417_v23, %s5186_s15  ;;  %v6281_v56 = vmul.f32 2.0, %v1447_v49  ;;  %v6283_v41 = vmul.f32 2.0, %v1448_v19  ;;  %v1433_v57 = vadd.f32 %v1401_v43, %v5739_v48  ;;  %v1403_v2 = vmul.f32 %v5169_v18, %v5992_v51  ;;  %v5170_v23 = vld [vmem:[%s5308_s22 + $0xe0] sm:$0xff] }
 0x213   : > { %2598 = vrot.lane.b32.xlu0 %v4707_v28, %s5186_s15  ;;  %v2166_v6 = vsel %vm2159_vm2, %v2151_v50, %v2152_v58  ;;  %v2138_v15 = vrot.slane %v6276_v26, 1  ;;  %v4695_v20 = vpack.c.bf16 %v6276_v26, %v6276_v26  ;;  %v1434_v54 = vadd.f32 %v1402_v53, %v5743_v14  ;;  %v5140_v31 = vpop.eup %5139 }
 0x214   : > { %v4740_v30 = vpack.c.bf16 %v2166_v6, %v2166_v6  ;;  %v2153_v48 = vrot.slane %v6281_v56, 1  ;;  %v4710_v51 = vpack.c.bf16 %v6281_v56, %v6281_v56  ;;  %v2154_v37 = vrot.slane %v6283_v41, 1  ;;  %v5142_v19 = vpop.eup %5141 }
 0x215   : > { %v7418_v28 = vand.u32 15, %v5633_v62  ;;  %v7421_v14 = vpack.c.bf16 %v6151_v0, %v6151_v0  ;;  %v2180_v61 = vsel %vm2159_vm2, %v2137_v27, %v2138_v15  ;;  %v4711_v40 = vpack.c.bf16 %v6283_v41, %v6283_v41  ;;  %v5144_v53 = vpop.eup %5143 }
 0x216   : > { %v6318_v38 = vmul.f32 2.0, %v1433_v57  ;;  %v6320_v62 = vmul.f32 2.0, %v1434_v54  ;;  %v7422_v5 = vand.u32 15, %v5628_v59  ;;  %2833 = vst.msk [vmem:[#allocation2 + $0xd4] sm:$0xf] %vm2423_vm3, %v4740_v30  ;;  %v4726_v7 = vpack.c.bf16 %v2180_v61, %v2180_v61 }
 0x217   : > { %vm6304_vm13 = vcmp.eq.s32.totalorder %v7418_v28, 15  ;;  %2596 = vrot.lane.b32.xlu1 %v7421_v14, %s5186_s15  ;;  %v2165_v27 = vsel %vm2159_vm2, %v2152_v58, %v2153_v48  ;;  %v2164_v43 = vsel %vm2159_vm2, %v2153_v48, %v2154_v37  ;;  %v1417_v39 = vmul.f32 %v5170_v23, %v5140_v31  ;;  %v5171_v14 = vld [vmem:[%s5308_s22 + $0xe8] sm:$0xff] }
 0x218   : > { %vm6324_vm14 = vcmp.eq.s32.totalorder %v7422_v5, 15  ;;  %v7425_v59 = vpack.c.bf16 %v6111_v33, %v6111_v33  ;;  %v2281_v57 = vsel %vm6224_vm11, 0.0, %v2165_v27  ;;  %v4742_v18 = vpack.c.bf16 %v2164_v43, %v2164_v43  ;;  %2819 = vst.msk [vmem:[#allocation2 + $0x64] sm:$0xf] %vm2423_vm3, %v4726_v7  ;;  %v5172_v7 = vld [vmem:[%s5308_s22 + $0x78] sm:$0xff] }
 0x219   : > { %v2139_v6 = vrot.slane %v6318_v38, 1  ;;  %v4696_v58 = vpack.c.bf16 %v6318_v38, %v6318_v38  ;;  %v4741_v54 = vpack.c.bf16 %v2281_v57, %v2281_v57  ;;  %v2140_v30 = vrot.slane %v6320_v62, 1 }
 0x21a   : > { %2570 = vrot.lane.b32.xlu0 %v7425_v59, %s5186_s15  ;;  %v4697_v48 = vpack.c.bf16 %v6320_v62, %v6320_v62  ;;  %v1449_v28 = vadd.f32 %v1417_v39, %v5817_v10  ;;  %v7426_v52 = vpack.c.bf16 %v6080_v24, %v6080_v24  ;;  %2835 = vst.msk [vmem:[#allocation2 + $0xe4] sm:$0xf] %vm2423_vm3, %v4742_v18  ;;  %v7427_v43 = vand.u32 15, %v5662_v3  ;;  %v7430_v18 = vld [vmem:[#allocation11_spill] sm:$0xff] }
 0x21b   : > { %v2179_v31 = vsel %vm2159_vm2, %v2138_v15, %v2139_v6  ;;  %v1418_v61 = vmul.f32 %v5171_v14, %v5144_v53  ;;  %v1435_v5 = vadd.f32 %v1403_v2, %v5748_v22  ;;  %v1404_v27 = vmul.f32 %v5172_v7, %v6052_v12  ;;  %2834 = vst.msk [vmem:[#allocation2 + $0xdc] sm:$0xf] %vm2423_vm3, %v4741_v54  ;;  %v5173_v22 = vld [vmem:[%s5308_s22 + $0xf0] sm:$0xff]  ;;  %v7431_v54 = vld [vmem:[#allocation15_spill] sm:$0xff]  ;;  %v7432_v14 = vld [vmem:[#allocation6_spill] sm:$0xff] }
 0x21c   : > { %2568 = vrot.lane.b32.xlu1 %v7426_v52, %s5186_s15  ;;  %vm6361_vm15 = vcmp.eq.s32.totalorder %v7427_v43, 15  ;;  %v2267_v23 = vsel %vm6260_vm12, 0.0, %v2179_v31  ;;  %v2178_v15 = vsel %vm2159_vm2, %v2139_v6, %v2140_v30  ;;  %v6370_v39 = vmul.f32 2.0, %v1449_v28  ;;  %v5174_v52 = vld [vmem:[%s5308_s22 + $0xf8] sm:$0xff] }
 0x21d   : > { %v1419_v2 = vmul.f32 %v5173_v22, %v6208_v44  ;;  %v4727_v3 = vpack.c.bf16 %v2267_v23, %v2267_v23  ;;  %v4728_v12 = vpack.c.bf16 %v2178_v15, %v2178_v15  ;;  %v1450_v53 = vadd.f32 %v1418_v61, %v5821_v1  ;;  %v7436_v43 = vld [vmem:[#allocation14_spill] sm:$0xff] }
 0x21e   : > { %2602 = vrot.lane.b32.xlu0 %v4709_v42, %s5186_s15  ;;  %v6376_v59 = vmul.f32 2.0, %v1435_v5  ;;  %v2155_v46 = vrot.slane %v6370_v39, 1  ;;  %v4712_v57 = vpack.c.bf16 %v6370_v39, %v6370_v39  ;;  %v1436_v6 = vadd.f32 %v1404_v27, %v7430_v18 }
 0x21f   : > { %v1451_v28 = vadd.f32 %v1419_v2, %v7431_v54  ;;  %2820 = vst.msk [vmem:[#allocation2 + $0x6c] sm:$0xf] %vm2423_vm3, %v4727_v3  ;;  %2821 = vst.msk [vmem:[#allocation2 + $0x74] sm:$0xf] %vm2423_vm3, %v4728_v12  ;;  %v6389_v1 = vmul.f32 2.0, %v1450_v53  ;;  %v1420_v31 = vmul.f32 %v5174_v52, %v5142_v19  ;;  %v7433_v61 = vand.u32 15, %v7432_v14 }
 0x220   : > { %2600 = vrot.lane.b32.xlu1 %v4708_v60, %s5186_s15  ;;  %v2141_v44 = vrot.slane %v6376_v59, 1  ;;  %v4698_v42 = vpack.c.bf16 %v6376_v59, %v6376_v59  ;;  %v2163_v60 = vsel %vm2159_vm2, %v2154_v37, %v2155_v46  ;;  %v6403_v7 = vmul.f32 2.0, %v1436_v6  ;;  %v5175_v19 = vld [vmem:[%s5308_s22 + $0x80] sm:$0xff] }
 0x221   : > { %vm6397_vm1 = vcmp.eq.s32.totalorder %v7433_v61, 0  ;;  %v6405_v27 = vmul.f32 2.0, %v1451_v28  ;;  %v7437_v23 = vand.u32 15, %v7436_v43  ;;  %v1405_v22 = vmul.f32 %v5175_v19, %v6082_v21  ;;  %v7440_v2 = vld [vmem:[#allocation7_spill] sm:$0xff]  ;;  %v7445_v61 = vld [vmem:[#allocation8_spill] sm:$0xff] }
 0x222   : > { %v7441_v3 = vand.u32 15, %v7440_v2  ;;  %vm1966_vm6 = vcmp.lt.s32.totalorder %v5584_v16, 1  ;;  %2574 = vrot.lane.b32.xlu0 %v4695_v20, %s5186_s15  ;;  %v2283_v37 = vsel %vm6304_vm13, 0.0, %v2163_v60  ;;  %v2156_v53 = vrot.slane %v6389_v1, 1 }
 0x223   : > { %vm6409_vm4 = vcmp.eq.s32.totalorder %v7437_v23, 15  ;;  %v4713_v21 = vpack.c.bf16 %v6389_v1, %v6389_v1  ;;  %v2177_v18 = vsel %vm2159_vm2, %v2140_v30, %v2141_v44  ;;  %v4743_v6 = vpack.c.bf16 %v2283_v37, %v2283_v37 }
 0x224   : > { %vm6417_vm5 = vcmp.eq.s32.totalorder %v7441_v3, 15  ;;  %v2269_v54 = vsel %vm6324_vm14, 0.0, %v2177_v18  ;;  %v2142_v28 = vrot.slane %v6403_v7, 1  ;;  %v4699_v20 = vpack.c.bf16 %v6403_v7, %v6403_v7  ;;  %v7452_v3 = vld [vmem:[#allocation16_spill] sm:$0xff] }
 0x225   : > { %v7444_v50 = vpack.c.bf16 %v6113_v63, %v6113_v63  ;;  %v2162_v52 = vsel %vm2159_vm2, %v2155_v46, %v2156_v53  ;;  %v4729_v14 = vpack.c.bf16 %v2269_v54, %v2269_v54  ;;  %v2157_v30 = vrot.slane %v6405_v27, 1  ;;  %2836 = vst.msk [vmem:[#allocation2 + $0xec] sm:$0xf] %vm2423_vm3, %v4743_v6  ;;  %v7453_v18 = vld [vmem:[#allocation12_spill] sm:$0xff] }
 0x226   : > { %v4714_v49 = vpack.c.bf16 %v6405_v27, %v6405_v27  ;;  %v7446_v60 = vand.u32 15, %v7445_v61  ;;  %v7449_v23 = vand.u32 15, %v5584_v16  ;;  %v4744_v46 = vpack.c.bf16 %v2162_v52, %v2162_v52  ;;  %2606 = vrot.lane.b32.xlu0 %v4711_v40, %s5186_s15  ;;  %v5176_v6 = vld [vmem:[%s5308_s22 + $0x88] sm:$0xff] }
 0x227   : > { %2572 = vrot.lane.b32.xlu1 %v7444_v50, %s5186_s15  ;;  %v2176_v2 = vsel %vm2159_vm2, %v2141_v44, %v2142_v28  ;;  %v1452_v37 = vadd.f32 %v1420_v31, %v7452_v3  ;;  %v1437_v54 = vadd.f32 %v1405_v22, %v7453_v18  ;;  %2822 = vst.msk [vmem:[#allocation2 + $0x7c] sm:$0xf] %vm2423_vm3, %v4729_v14  ;;  %v1935_v44 = vrot.slane %v5950_v36, 7  ;;  %v7454_v36 = vld [vmem:[#allocation13_spill] sm:$0xff]  ;;  %v7455_v14 = vld [vmem:[#allocation26_spill] sm:$0xff] }
 0x228   : > { %vm6449_vm7 = vcmp.eq.s32.totalorder %v7446_v60, 15  ;;  %vm6455_vm8 = vcmp.eq.s32.totalorder %v7449_v23, 0  ;;  %v4730_v50 = vpack.c.bf16 %v2176_v2, %v2176_v2  ;;  %v2161_v61 = vsel %vm2159_vm2, %v2156_v53, %v2157_v30  ;;  %2837 = vst.msk [vmem:[#allocation2 + $0xf4] sm:$0xf] %vm2423_vm3, %v4744_v46  ;;  %v7456_v46 = vld [vmem:[#allocation9_spill] sm:$0xff] }
 0x229   : > { %v1406_v52 = vmul.f32 %v5176_v6, %v6095_v13  ;;  %v2285_v31 = vsel %vm6361_vm15, 0.0, %v2161_v61  ;;  %v6477_v22 = vmul.f32 2.0, %v1452_v37  ;;  %v6479_v60 = vmul.f32 2.0, %v1437_v54  ;;  %v7460_v54 = vld [vmem:[#allocation21_spill] sm:$0xff] }
 0x22a   : > { %v1936_v40 = vrot.slane %v5909_v55, 7  ;;  %2823 = vst.msk [vmem:[#allocation2 + $0x84] sm:$0xf] %vm2423_vm3, %v4730_v50  ;;  %v4745_v13 = vpack.c.bf16 %v2285_v31, %v2285_v31  ;;  %v1934_v23 = vrot.slane %v7455_v14, 7  ;;  %v1937_v10 = vrot.slane %v5960_v17, 7  ;;  %2578 = vrot.lane.b32.xlu0 %v4697_v48, %s5186_s15 }
 0x22b   : > { %2604 = vrot.lane.b32.xlu1 %v4710_v51, %s5186_s15  ;;  %v1438_v53 = vadd.f32 %v1406_v52, %v7454_v36  ;;  %v7457_v2 = vand.u32 15, %v7456_v46  ;;  %v2158_v55 = vrot.slane %v6477_v22, 1  ;;  %v4715_v51 = vpack.c.bf16 %v6477_v22, %v6477_v22 }
 0x22c   : > { %v2143_v37 = vrot.slane %v6479_v60, 1  ;;  %v7461_v50 = vand.u32 15, %v7460_v54  ;;  %2838 = vst.msk [vmem:[#allocation2 + $0xfc] sm:$0xf] %vm2423_vm3, %v4745_v13  ;;  %v1996_v6 = vsel %vm1966_vm6, %v1935_v44, %v1936_v40  ;;  %v1965_v52 = vrot.slane %v6477_v22, 7 }
 0x22d   : > { %vm6492_vm9 = vcmp.eq.s32.totalorder %v7457_v2, 0  ;;  %v6513_v61 = vmul.f32 2.0, %v1438_v53  ;;  %v1997_v31 = vsel %vm1966_vm6, %v1934_v23, %v1935_v44  ;;  %v2160_v36 = vsel %vm2159_vm2, %v2157_v30, %v2158_v55  ;;  %v7465_v2 = vld [vmem:[#allocation23_spill] sm:$0xff]  ;;  %v7469_v44 = vld [vmem:[#allocation10_spill] sm:$0xff] }
 0x22e   : > { %vm6504_vm10 = vcmp.eq.s32.totalorder %v7461_v50, 0  ;;  %v7464_v46 = vrot.slane %v7455_v14, 1  ;;  %v2175_v13 = vsel %vm2159_vm2, %v2142_v28, %v2143_v37  ;;  %v2065_v53 = vsel %vm6397_vm1, 0.0, %v1996_v6  ;;  %2610 = vrot.lane.b32.xlu0 %v4713_v21, %s5186_s15 }
 0x22f   : > { %v7466_v54 = vand.u32 15, %v7465_v2  ;;  %v7470_v18 = vand.u32 15, %v7469_v44  ;;  %2576 = vrot.lane.b32.xlu1 %v4696_v58, %s5186_s15  ;;  %v4746_v28 = vpack.c.bf16 %v2160_v36, %v2160_v36  ;;  %v2271_v14 = vsel %vm6417_vm5, 0.0, %v2175_v13 }
 0x230   : > { %v2191_v48 = vsel %vm2159_vm2, %v2158_v55, %v7464_v46  ;;  %v2144_v55 = vrot.slane %v6513_v61, 1  ;;  %v4731_v46 = vpack.c.bf16 %v2271_v14, %v2271_v14  ;;  %v4654_v2 = vpack.c.bf16 %v2065_v53, %v2065_v53 }
 0x231   : > { %vm6532_vm11 = vcmp.eq.s32.totalorder %v7466_v54, 0  ;;  %vm6538_vm12 = vcmp.eq.s32.totalorder %v7470_v18, 0  ;;  %v2287_v5 = vsel %vm6409_vm4, 0.0, %v2191_v48  ;;  %v4701_v18 = vpack.c.bf16 %v6513_v61, %v6513_v61  ;;  %2839 = vst.msk [vmem:[#allocation2 + $0x104] sm:$0xf] %vm2423_vm3, %v4746_v28  ;;  %v7474_v54 = vld [vmem:[#allocation24_spill] sm:$0xff] }
 0x232   : > { %v4747_v6 = vpack.c.bf16 %v2287_v5, %v2287_v5  ;;  %v7473_v58 = vrot.slane %v6097_v32, 1  ;;  %v2174_v12 = vsel %vm2159_vm2, %v2143_v37, %v2144_v55  ;;  %v1998_v36 = vsel %vm1966_vm6, %v1965_v52, %v1934_v23  ;;  %2824 = vst.msk [vmem:[#allocation2 + $0x8c] sm:$0xf] %vm2423_vm3, %v4731_v46  ;;  %2426 = vst.msk [vmem:[#allocation2 + $0x20] sm:$0xf] %vm2423_vm3, %v4654_v2  ;;  %v7478_v5 = vld [vmem:[#allocation17_spill] sm:$0xff] }
 0x233   : > { %v4653_v48 = vpack.c.bf16 %v1997_v31, %v1997_v31  ;;  %v4732_v13 = vpack.c.bf16 %v2174_v12, %v2174_v12  ;;  %v2063_v53 = vsel %vm6455_vm8, 0.0, %v1998_v36  ;;  %v1995_v37 = vsel %vm1966_vm6, %v1936_v40, %v1937_v10  ;;  %2608 = vrot.lane.b32.xlu1 %v4712_v57, %s5186_s15  ;;  %v7482_v2 = vld [vmem:[#allocation25_spill] sm:$0xff]  ;;  %2582 = vrot.lane.b32.xlu0 %v4699_v20, %s5186_s15 }
 0x234   : > { %v2173_v15 = vsel %vm2159_vm2, %v2144_v55, %v7473_v58  ;;  %2840 = vst.msk [vmem:[#allocation2 + $0x10c] sm:$0xf] %vm2423_vm3, %v4747_v6  ;;  %v7475_v44 = vand.u32 15, %v7474_v54  ;;  %v4652_v31 = vpack.c.bf16 %v2063_v53, %v2063_v53  ;;  %v4655_v19 = vpack.c.bf16 %v1995_v37, %v1995_v37 }
 0x235   : > { %v2273_v21 = vsel %vm6449_vm7, 0.0, %v2173_v15  ;;  %2425 = vst.msk [vmem:[#allocation2 + $0x18] sm:$0xf] %vm2423_vm3, %v4653_v48  ;;  %v1938_v28 = vrot.slane %v6012_v47, 7  ;;  %v7479_v40 = vand.u32 15, %v7478_v5  ;;  %v1939_v55 = vrot.slane %v6010_v45, 7 }
 0x236   : > { %vm6579_vm2 = vcmp.eq.s32.totalorder %v7475_v44, 0  ;;  %v4733_v43 = vpack.c.bf16 %v2273_v21, %v2273_v21  ;;  %2825 = vst.msk [vmem:[#allocation2 + $0x94] sm:$0xf] %vm2423_vm3, %v4732_v13  ;;  %v1951_v6 = vrot.slane %v6513_v61, 7  ;;  %v1952_v57 = vrot.slane %v6097_v32, 7  ;;  %v7486_v21 = vld [vmem:[#allocation18_spill] sm:$0xff] }
 0x237   : > { %vm6591_vm13 = vcmp.eq.s32.totalorder %v7479_v40, 0  ;;  %v1953_v46 = vrot.slane %v6126_v11, 7  ;;  %v7483_v58 = vand.u32 15, %v7482_v2  ;;  %2424 = vst.msk [vmem:[#allocation2 + $0x10] sm:$0xf] %vm2423_vm3, %v4652_v31  ;;  %v1994_v45 = vsel %vm1966_vm6, %v1937_v10, %v1938_v28  ;;  %2580 = vrot.lane.b32.xlu1 %v4698_v42, %s5186_s15  ;;  %2614 = vrot.lane.b32.xlu0 %v4715_v51, %s5186_s15  ;;  %v7490_v40 = vld [vmem:[#allocation19_spill] sm:$0xff] }
 0x238   : > { %2826 = vst.msk [vmem:[#allocation2 + $0x9c] sm:$0xf] %vm2423_vm3, %v4733_v43  ;;  %2427 = vst.msk [vmem:[#allocation2 + $0x28] sm:$0xf] %vm2423_vm3, %v4655_v19  ;;  %v1954_v32 = vrot.slane %v6162_v25, 7  ;;  %v1955_v11 = vrot.slane %v6186_v34, 7  ;;  %v1993_v12 = vsel %vm1966_vm6, %v1938_v28, %v1939_v55  ;;  %v1980_v20 = vsel %vm1966_vm6, %v1951_v6, %v1952_v57 }
 0x239   : > { %vm6602_vm14 = vcmp.eq.s32.totalorder %v7483_v58, 0  ;;  %v1940_v15 = vrot.slane %v6054_v35, 7  ;;  %v1979_v36 = vsel %vm1966_vm6, %v1952_v57, %v1953_v46  ;;  %v2067_v10 = vsel %vm6492_vm9, 0.0, %v1994_v45 }
 0x23a   : > { %v4657_v35 = vpack.c.bf16 %v1993_v12, %v1993_v12  ;;  %v2081_v25 = vsel %vm6504_vm10, 0.0, %v1980_v20  ;;  %v4671_v34 = vpack.c.bf16 %v1979_v36, %v1979_v36  ;;  %v4656_v48 = vpack.c.bf16 %v2067_v10, %v2067_v10  ;;  %v7495_v20 = vld [vmem:[#allocation20_spill] sm:$0xff] }
 0x23b   : > { %v7487_v13 = vand.u32 15, %v7486_v21  ;;  %v4670_v37 = vpack.c.bf16 %v2081_v25, %v2081_v25  ;;  %v1978_v3 = vsel %vm1966_vm6, %v1953_v46, %v1954_v32  ;;  %v1977_v54 = vsel %vm1966_vm6, %v1954_v32, %v1955_v11  ;;  %2612 = vrot.lane.b32.xlu1 %v4714_v49, %s5186_s15  ;;  %2586 = vrot.lane.b32.xlu0 %v4701_v18, %s5186_s15 }
 0x23c   : > { %v1992_v42 = vsel %vm1966_vm6, %v1939_v55, %v1940_v15  ;;  %2429 = vst.msk [vmem:[#allocation2 + $0x38] sm:$0xf] %vm2423_vm3, %v4657_v35  ;;  %2443 = vst.msk [vmem:[#allocation2 + $0xa8] sm:$0xf] %vm2423_vm3, %v4671_v34  ;;  %v2083_v17 = vsel %vm6532_vm11, 0.0, %v1978_v3  ;;  %v4673_v44 = vpack.c.bf16 %v1977_v54, %v1977_v54  ;;  %v1941_v31 = vrot.slane %v6070_v9, 7 }
 0x23d   : > { %vm6636_vm15 = vcmp.eq.s32.totalorder %v7487_v13, 0  ;;  %2428 = vst.msk [vmem:[#allocation2 + $0x30] sm:$0xf] %vm2423_vm3, %v4656_v48  ;;  %v2069_v43 = vsel %vm6538_vm12, 0.0, %v1992_v42  ;;  %2442 = vst.msk [vmem:[#allocation2 + $0xa0] sm:$0xf] %vm2423_vm3, %v4670_v37  ;;  %v4672_v19 = vpack.c.bf16 %v2083_v17, %v2083_v17  ;;  %v7494_v23 = vpack.c.bf16 %v6479_v60, %v6479_v60 }
 0x23e   : > { %v4658_v28 = vpack.c.bf16 %v2069_v43, %v2069_v43  ;;  %v1956_v51 = vrot.slane %v6151_v0, 7  ;;  %v1957_v5 = vrot.slane %v6180_v29, 7  ;;  %v7491_v55 = vand.u32 15, %v7490_v40  ;;  %2445 = vst.msk [vmem:[#allocation2 + $0xb8] sm:$0xf] %vm2423_vm3, %v4673_v44  ;;  %v7499_v42 = vld [vmem:[#allocation22_spill] sm:$0xff] }
 0x23f   : > { %v1991_v9 = vsel %vm1966_vm6, %v1940_v15, %v1941_v31  ;;  %v1942_v0 = vrot.slane %v6080_v24, 7  ;;  %v1943_v29 = vrot.slane %v6111_v33, 7  ;;  %v1958_v50 = vrot.slane %v6206_v4, 7  ;;  %2444 = vst.msk [vmem:[#allocation2 + $0xb0] sm:$0xf] %vm2423_vm3, %v4672_v19  ;;  %2584 = vrot.lane.b32.xlu1 %v7494_v23, %s5186_s15 }
 0x240   : > { %vm6663_vm1 = vcmp.eq.s32.totalorder %v7491_v55, 0  ;;  %2430 = vst.msk [vmem:[#allocation2 + $0x40] sm:$0xf] %vm2423_vm3, %v4658_v28  ;;  %v4659_v30 = vpack.c.bf16 %v1991_v9, %v1991_v9  ;;  %v1976_v46 = vsel %vm1966_vm6, %v1955_v11, %v1956_v51  ;;  %v1975_v49 = vsel %vm1966_vm6, %v1956_v51, %v1957_v5 }
 0x241   : > { %v1959_v2 = vrot.slane %v6255_v8, 7  ;;  %v2085_v24 = vsel %vm6579_vm2, 0.0, %v1976_v46  ;;  %v4675_v33 = vpack.c.bf16 %v1975_v49, %v1975_v49  ;;  %v1990_v4 = vsel %vm1966_vm6, %v1941_v31, %v1942_v0 }
 0x242   : > { %v1989_v58 = vsel %vm1966_vm6, %v1942_v0, %v1943_v29  ;;  %2431 = vst.msk [vmem:[#allocation2 + $0x48] sm:$0xf] %vm2423_vm3, %v4659_v30  ;;  %v4674_v45 = vpack.c.bf16 %v2085_v24, %v2085_v24  ;;  %v2071_v8 = vsel %vm6591_vm13, 0.0, %v1990_v4  ;;  %v1974_v18 = vsel %vm1966_vm6, %v1957_v5, %v1958_v50 }
 0x243   : > { %v4661_v32 = vpack.c.bf16 %v1989_v58, %v1989_v58  ;;  %2447 = vst.msk [vmem:[#allocation2 + $0xc8] sm:$0xf] %vm2423_vm3, %v4675_v33  ;;  %v4660_v11 = vpack.c.bf16 %v2071_v8, %v2071_v8  ;;  %v2087_v15 = vsel %vm6602_vm14, 0.0, %v1974_v18  ;;  %v1973_v12 = vsel %vm1966_vm6, %v1958_v50, %v1959_v2 }
 0x244   : > { %v1944_v14 = vrot.slane %v6113_v63, 7  ;;  %v7496_v36 = vand.u32 15, %v7495_v20  ;;  %2446 = vst.msk [vmem:[#allocation2 + $0xc0] sm:$0xf] %vm2423_vm3, %v4674_v45  ;;  %v4676_v35 = vpack.c.bf16 %v2087_v15, %v2087_v15  ;;  %v4677_v25 = vpack.c.bf16 %v1973_v12, %v1973_v12 }
 0x245   : > { %2433 = vst.msk [vmem:[#allocation2 + $0x58] sm:$0xf] %vm2423_vm3, %v4661_v32  ;;  %v1945_v47 = vrot.slane %v6276_v26, 7  ;;  %v1512_v34 = vadd.s32 208, %v5584_v16  ;;  %2432 = vst.msk [vmem:[#allocation2 + $0x50] sm:$0xf] %vm2423_vm3, %v4660_v11 }
 0x246   : > { %vm6711_vm4 = vcmp.eq.s32.totalorder %v7496_v36, 0  ;;  %v1988_v63 = vsel %vm1966_vm6, %v1943_v29, %v1944_v14  ;;  %v1960_v48 = vrot.slane %v6281_v56, 7  ;;  %v1961_v21 = vrot.slane %v6283_v41, 7  ;;  %2448 = vst.msk [vmem:[#allocation2 + $0xd0] sm:$0xf] %vm2423_vm3, %v4676_v35  ;;  %v4946_v36 = vld [vmem:[%s7324_s10 + $0xf8] sm:$0xff]  }
 0x247   : > { %v1946_v13 = vrot.slane %v6318_v38, 7  ;;  %2449 = vst.msk [vmem:[#allocation2 + $0xd8] sm:$0xf] %vm2423_vm3, %v4677_v25  ;;  %v2073_v26 = vsel %vm6636_vm15, 0.0, %v1988_v63  ;;  %v1987_v37 = vsel %vm1966_vm6, %v1944_v14, %v1945_v47  ;;  %v1704_v3 = vand.u32 15, %v1512_v34  ;;  %v4947_v34 = vld [vmem:[%s7324_s10 + $0xf0] sm:$0xff]  }
 0x248   : > { %v1947_v54 = vrot.slane %v6320_v62, 7  ;;  %v7500_v17 = vand.u32 15, %v7499_v42  ;;  %v4662_v41 = vpack.c.bf16 %v2073_v26, %v2073_v26  ;;  %v4663_v38 = vpack.c.bf16 %v1987_v37, %v1987_v37  ;;  %v6807_v35 = vld [vmem:[#allocation2 + $0x14] ss:$8 sps:$4 sm:$0xff]   ;;  %v4951_v63 = vld [vmem:[%s7324_s10 + $0xe8] sm:$0xff]   ;;  %v4980_v56 = vld [vmem:[%s7324_s10 + $0xc0] sm:$0xff]  }
 0x249   : > { %v1972_v44 = vsel %vm1966_vm6, %v1959_v2, %v1960_v48  ;;  %v1971_v53 = vsel %vm1966_vm6, %v1960_v48, %v1961_v21  ;;  %vm1928_vm7 = vcmp.eq.s32.totalorder %v1704_v3, 0  ;;  %v1986_v31 = vsel %vm1966_vm6, %v1945_v47, %v1946_v13  ;;  %4516 = vmatprep.mubr.msk.bf16.mxu0 %vm499_vm0, %v6807_v35  ;;  %v6813_v47 = vld [vmem:[#allocation2 + $0x24] ss:$8 sps:$4 sm:$0xff]   ;;  %v4968_v37 = vld [vmem:[%s7324_s10 + $0xd0] sm:$0xff]  }
 0x24a   : > { %vm6734_vm5 = vcmp.eq.s32.totalorder %v7500_v17, 0  ;;  %v4679_v43 = vpack.c.bf16 %v1971_v53, %v1971_v53  ;;  %v1985_v62 = vsel %vm1966_vm6, %v1946_v13, %v1947_v54  ;;  %2434 = vst.msk [vmem:[#allocation2 + $0x60] sm:$0xf] %vm2423_vm3, %v4662_v41  ;;  %2435 = vst.msk [vmem:[#allocation2 + $0x68] sm:$0xf] %vm2423_vm3, %v4663_v38  ;;  %v2089_v19 = vsel %vm1928_vm7, 0.0, %v1972_v44 }
 0x24b   : > { %v2075_v28 = vsel %vm6663_vm1, 0.0, %v1986_v31  ;;  %v4665_v51 = vpack.c.bf16 %v1985_v62, %v1985_v62  ;;  %v1514_v5 = vadd.s32 224, %v5584_v16  ;;  %v4678_v40 = vpack.c.bf16 %v2089_v19, %v2089_v19  ;;  %v4963_v13 = vld [vmem:[%s7324_s10 + $0xd8] sm:$0xff]   ;;  %v6857_v53 = vld [vmem:[#allocation2 + $0xa4] ss:$8 sps:$4 sm:$0xff]   ;;  %v4958_v62 = vld [vmem:[%s7324_s10 + $0x30] sm:$0xff]  }
 0x24c   : > { %2451 = vst.msk [vmem:[#allocation2 + $0xe8] sm:$0xf] %vm2423_vm3, %v4679_v43  ;;  %v4664_v55 = vpack.c.bf16 %v2075_v28, %v2075_v28  ;;  %v1962_v9 = vrot.slane %v6370_v39, 7  ;;  %v1963_v0 = vrot.slane %v6389_v1, 7  ;;  %v1948_v50 = vrot.slane %v6376_v59, 7  ;;  %v4954_v41 = vld [vmem:[%s7324_s10 + $0x38] sm:$0xff]   ;;  %4525 = vmatprep.mubr.msk.bf16.mxu1 %vm499_vm0, %v6857_v53 }
 0x24d   : > { %2437 = vst.msk [vmem:[#allocation2 + $0x78] sm:$0xf] %vm2423_vm3, %v4665_v51  ;;  %v1718_v29 = vand.u32 15, %v1514_v5  ;;  %v1949_v30 = vrot.slane %v6403_v7, 7  ;;  %v1516_v57 = vadd.s32 240, %v5584_v16  ;;  %v1964_v1 = vrot.slane %v6405_v27, 7 }
 0x24e   : > { %2450 = vst.msk [vmem:[#allocation2 + $0xe0] sm:$0xf] %vm2423_vm3, %v4678_v40  ;;  %2436 = vst.msk [vmem:[#allocation2 + $0x70] sm:$0xf] %vm2423_vm3, %v4664_v55  ;;  %v1970_v46 = vsel %vm1966_vm6, %v1961_v21, %v1962_v9  ;;  %v1969_v39 = vsel %vm1966_vm6, %v1962_v9, %v1963_v0  ;;  %v1950_v49 = vrot.slane %v6479_v60, 7  ;;  %v1984_v7 = vsel %vm1966_vm6, %v1947_v54, %v1948_v50  ;;  %v2557_v61 = vpop.permute.xlu1 %2556  ;;  %v4955_v21 = vld [vmem:[%s7324_s10 + $0xe0] sm:$0xff]  }
 0x24f   : > { %vm1930_vm8 = vcmp.eq.s32.totalorder %v1718_v29, 0  ;;  %v4681_v59 = vpack.c.bf16 %v1969_v39, %v1969_v39  ;;  %v1983_v2 = vsel %vm1966_vm6, %v1948_v50, %v1949_v30  ;;  %v2077_v33 = vsel %vm6711_vm4, 0.0, %v1984_v7  ;;  %v4975_v54 = vld [vmem:[%s7324_s10 + $0xc8] sm:$0xff]   ;;  %v4987_v31 = vld [vmem:[%s7324_s10 + $0x118] sm:$0xff]   ;;  %v4992_v9 = vld [vmem:[%s7324_s10 + $0x110] sm:$0xff]  }
 0x250   : > { %v2091_v24 = vsel %vm1930_vm8, 0.0, %v1970_v46  ;;  %v4667_v4 = vpack.c.bf16 %v1983_v2, %v1983_v2  ;;  %v1732_v58 = vand.u32 15, %v1516_v57  ;;  %v4666_v27 = vpack.c.bf16 %v2077_v33, %v2077_v33  ;;  %v6871_v5 = vld [vmem:[#allocation2 + $0x34] ss:$8 sps:$4 sm:$0xff]   ;;  %v5000_v39 = vld [vmem:[%s7324_s10 + $0x108] sm:$0xff]   ;;  %v4967_v7 = vld [vmem:[%s7324_s10 + $0x20] sm:$0xff]  }
 0x251   : > { %v4680_v45 = vpack.c.bf16 %v2091_v24, %v2091_v24  ;;  %2453 = vst.msk [vmem:[#allocation2 + $0xf8] sm:$0xf] %vm2423_vm3, %v4681_v59  ;;  %v1968_v60 = vsel %vm1966_vm6, %v1963_v0, %v1964_v1  ;;  %v1967_v8 = vsel %vm1966_vm6, %v1964_v1, %v1965_v52  ;;  %v1982_v18 = vsel %vm1966_vm6, %v1949_v30, %v1950_v49  ;;  %v4962_v0 = vld [vmem:[%s7324_s10 + $0x28] sm:$0xff]   ;;  %v6888_v50 = vld [vmem:[#allocation2 + $0xb4] ss:$8 sps:$4 sm:$0xff]   ;;  %v5006_v33 = vld [vmem:[%s7324_s10 + $0x100] sm:$0xff]  }
 0x252   : > { %2439 = vst.msk [vmem:[#allocation2 + $0x88] sm:$0xf] %vm2423_vm3, %v4667_v4  ;;  %vm1932_vm9 = vcmp.eq.s32.totalorder %v1732_v58, 0  ;;  %v4683_v32 = vpack.c.bf16 %v1967_v8, %v1967_v8  ;;  %v1981_v23 = vsel %vm1966_vm6, %v1950_v49, %v1951_v6  ;;  %2438 = vst.msk [vmem:[#allocation2 + $0x80] sm:$0xf] %vm2423_vm3, %v4666_v27  ;;  %v2079_v52 = vsel %vm6734_vm5, 0.0, %v1982_v18  ;;  %v2553_v6 = vpop.permute.xlu0 %2552 }
 0x253   : > { %2452 = vst.msk [vmem:[#allocation2 + $0xf0] sm:$0xf] %vm2423_vm3, %v4680_v45  ;;  %v2093_v22 = vsel %vm1932_vm9, 0.0, %v1968_v60  ;;  %v4669_v11 = vpack.c.bf16 %v1981_v23, %v1981_v23  ;;  %vm2288_vm10 = vcmask 1043456   ;;  %v4668_v12 = vpack.c.bf16 %v2079_v52, %v2079_v52  ;;  %v6902_v59 = vld [vmem:[#allocation2 + $0x44] ss:$8 sps:$4 sm:$0xff]  }
 0x254   : > { %v4682_v15 = vpack.c.bf16 %v2093_v22, %v2093_v22  ;;  %2455 = vst.msk [vmem:[#allocation2 + $0x108] sm:$0xf] %vm2423_vm3, %v4683_v32  ;;  %vm2289_vm11 = vcmask 523268   ;;  %v7503_v16 = vmov 0   ;;  %vm2648_vm6 = vcmask 1043968   ;;  %v2555_v14 = vpop.permute.xlu1 %2554  ;;  %v4971_v4 = vld [vmem:[%s7324_s10 + $0x18] sm:$0xff]  }
 0x255   : > { %2441 = vst.msk [vmem:[#allocation2 + $0x98] sm:$0xf] %vm2423_vm3, %v4669_v11  ;;  %vm2290_vm12 = vmor %vm2289_vm11, %vm2288_vm10  ;;  %v6922_v45 = vld [vmem:[#allocation2 + $0xc4] ss:$8 sps:$4 sm:$0xff]   ;;  %v6932_v23 = vld [vmem:[#allocation2 + $0x54] ss:$8 sps:$4 sm:$0xff]  }
 0x256   : > { %2454 = vst.msk [vmem:[#allocation2 + $0x100] sm:$0xf] %vm2423_vm3, %v4682_v15  ;;  %2440 = vst.msk [vmem:[#allocation2 + $0x90] sm:$0xf] %vm2423_vm3, %v4668_v12  ;;  %v4976_v22 = vld [vmem:[%s7324_s10 + $0x10] sm:$0xff]   ;;  %v4979_v15 = vld [vmem:[%s7324_s10 + $0x8] sm:$0xff]  }
 0x257   : > { %2291 = vst.msk [vmem:[#allocation2] sm:$0xff] %vm2290_vm12, %v7503_v16  ;;  %2292 = vst.msk [vmem:[#allocation2 + $0x8] sm:$0xff] %vm2290_vm12, %v7503_v16 }
 0x258   : > { %2293 = vst.msk [vmem:[#allocation2 + $0x110] sm:$0xff] %vm2290_vm12, %v7503_v16  ;;  %2294 = vst.msk [vmem:[#allocation2 + $0x118] sm:$0xff] %vm2290_vm12, %v7503_v16  ;;  %v2559_v20 = vpop.permute.xlu1 %2558 }
 0x259   : > { %2651 = vst.msk [vmem:[#allocation2 + $0x20] sm:$0xf] %vm2648_vm6, %v2557_v61  ;;  %2649 = vst.msk [vmem:[#allocation2 + $0x10] sm:$0xf] %vm2648_vm6, %v2553_v6  ;;  %v6948_v61 = vld [vmem:[#allocation2 + $0xd4] ss:$8 sps:$4 sm:$0xff]  }
 0x25a   : > { %2650 = vst.msk [vmem:[#allocation2 + $0x18] sm:$0xf] %vm2648_vm6, %v2555_v14  ;;  %2652 = vst.msk [vmem:[#allocation2 + $0x28] sm:$0xf] %vm2648_vm6, %v2559_v20 }
 0x25f   : > { %v2563_v25 = vpop.permute.xlu0 %2562 }
 0x260   : > { %2654 = vst.msk [vmem:[#allocation2 + $0x38] sm:$0xf] %vm2648_vm6, %v2563_v25 }
 0x261   : > { %v6805_v10 = vld [vmem:[#allocation2 + $0x10] ss:$8 sps:$4 sm:$0xff]   ;;  %v6824_v48 = vld [vmem:[#allocation2 + $0x20] ss:$8 sps:$4 sm:$0xff]  }
 0x262   : > { %3221 = vmatmul.mubr.bf16.vlgmr.msra.gmra.mxu0 %v6805_v10 }
 0x263   : > { %3916 = vmatpush1.bf16.msra.mxu0 %v4946_v36  ;;  %4517 = vmatprep.mubr.msk.bf16.mxu0 %vm499_vm0, %v6813_v47 }
 0x264   : > { %3917 = vmatprep.subr.bf16.mxu0 %v7503_v16 }
 0x267   : > { %3918 = vmatpush1.bf16.msra.mxu0 %v4947_v34  ;;  %v2848_v51 = vld [vmem:[#allocation2 + $0x38] sm:$0xff]  ;;  %v6958_v34 = vld [vmem:[#allocation2 + $0x64] ss:$8 sps:$4 sm:$0xff]  }
 0x268   : > { %3919 = vmatprep.subr.bf16.mxu0 %v7503_v16 }
 0x26a   : > { %3229 = vmatmul.mubr.bf16.gmra.mxu0 %v6824_v48 }
 0x26b   : > { %3920 = vmatpush1.bf16.msra.mxu0 %v4951_v63  ;;  %4518 = vmatprep.mubr.msk.bf16.mxu0 %vm499_vm0, %v6871_v5  ;;  %v4986_v63 = vld [vmem:[%s7324_s10] sm:$0xff]  }
 0x26c   : > { %3921 = vmatprep.subr.bf16.mxu0 %v7503_v16 }
 0x26f   : > { %3922 = vmatpush1.bf16.msra.mxu0 %v4955_v21 }
 0x270   : > { %3923 = vmatprep.subr.bf16.mxu0 %v7503_v16  ;;  %v2589_v26 = vpop.permute.xlu1 %2588 }
 0x271   : > { %2667 = vst.msk [vmem:[#allocation2 + $0xa0] sm:$0xf] %vm2648_vm6, %v2589_v26  ;;  %v4991_v26 = vld [vmem:[%s7324_s10 + $0x58] sm:$0xff]  }
 0x273   : > { %3924 = vmatpush1.bf16.msra.mxu0 %v4963_v13 }
 0x274   : > { %3925 = vmatprep.subr.bf16.mxu0 %v7503_v16  ;;  %v2591_v3 = vpop.permute.xlu1 %2590 }
 0x275   : > { %2668 = vst.msk [vmem:[#allocation2 + $0xa8] sm:$0xf] %vm2648_vm6, %v2591_v3  ;;  %v6974_v3 = vld [vmem:[#allocation2 + $0xe4] ss:$8 sps:$4 sm:$0xff]  }
 0x277   : > { %3926 = vmatpush1.bf16.msra.mxu0 %v4968_v37 }
 0x278   : > { %3927 = vmatprep.subr.bf16.mxu0 %v7503_v16  ;;  %v2561_v42 = vpop.permute.xlu1 %2560 }
 0x279   : > { %2653 = vst.msk [vmem:[#allocation2 + $0x30] sm:$0xf] %vm2648_vm6, %v2561_v42 }
 0x27b   : > { %3928 = vmatpush1.bf16.msra.mxu0 %v4975_v54 }
 0x27c   : > { %v2595_v17 = vpop.permute.xlu0 %2594  ;;  %3929 = vmatprep.subr.bf16.mxu0 %v7503_v16  ;;  %v2593_v38 = vpop.permute.xlu1 %2592  ;;  %v6855_v44 = vld [vmem:[#allocation2 + $0xa0] ss:$8 sps:$4 sm:$0xff]  }
 0x27d   : > { %2670 = vst.msk [vmem:[#allocation2 + $0xb8] sm:$0xf] %vm2648_vm6, %v2595_v17  ;;  %2669 = vst.msk [vmem:[#allocation2 + $0xb0] sm:$0xf] %vm2648_vm6, %v2593_v38  ;;  %3293 = vmatmul.mubr.bf16.vlgmr.msra.gmra.mxu1 %v6855_v44  ;;  %v6984_v38 = vld [vmem:[#allocation2 + $0x74] ss:$8 sps:$4 sm:$0xff]  }
 0x27e   : > { %3434 = vmatpush1.bf16.msra.mxu1 %v4954_v41  ;;  %4526 = vmatprep.mubr.msk.bf16.mxu1 %vm499_vm0, %v6888_v50 }
 0x27f   : > { %3930 = vmatpush1.bf16.msra.mxu0 %v4980_v56  ;;  %3435 = vmatprep.subr.bf16.mxu1 %v7503_v16 }
 0x280   : > { %3939 = vmatprep.subr.bf16.mxu0 %v7503_v16  ;;  %v2847_v28 = vld [vmem:[#allocation2 + $0x30] sm:$0xff] }
 0x281   : > { %v2567_v43 = vpop.permute.xlu0 %2566  ;;  %v6874_v40 = vcombine.low %v2847_v28, %v2848_v51  ;;  %v7000_v51 = vld [vmem:[#allocation2 + $0xf4] ss:$8 sps:$4 sm:$0xff]  }
 0x282   : > { %2656 = vst.msk [vmem:[#allocation2 + $0x48] sm:$0xf] %vm2648_vm6, %v2567_v43  ;;  %3436 = vmatpush1.bf16.msra.mxu1 %v4958_v62  ;;  %v4996_v43 = vld [vmem:[%s7324_s10 + $0x50] sm:$0xff]  }
 0x283   : > { %3940 = vmatpush2.bf16.msra.mxu0 %v4987_v31  ;;  %3437 = vmatprep.subr.bf16.mxu1 %v7503_v16 }
 0x284   : > { %v2565_v19 = vpop.permute.xlu1 %2564  ;;  %3237 = vmatmul.mubr.bf16.gmra.mxu0 %v6874_v40  ;;  %3941 = vmatprep.subr.bf16.mxu0 %v7503_v16  ;;  %v6890_v30 = vld [vmem:[#allocation2 + $0xb0] ss:$8 sps:$4 sm:$0xff]  }
 0x285   : > { %2655 = vst.msk [vmem:[#allocation2 + $0x40] sm:$0xf] %vm2648_vm6, %v2565_v19  ;;  %v2599_v55 = vpop.permute.xlu0 %2598  ;;  %3301 = vmatmul.mubr.bf16.gmra.mxu1 %v6890_v30  ;;  %4519 = vmatprep.mubr.msk.bf16.mxu0 %vm499_vm0, %v6902_v59  ;;  %v5001_v19 = vld [vmem:[%s7324_s10 + $0x48] sm:$0xff]  }
 0x286   : > { %2672 = vst.msk [vmem:[#allocation2 + $0xc8] sm:$0xf] %vm2648_vm6, %v2599_v55  ;;  %3438 = vmatpush1.bf16.msra.mxu1 %v4962_v0  ;;  %4527 = vmatprep.mubr.msk.bf16.mxu1 %vm499_vm0, %v6922_v45  ;;  %v5005_v0 = vld [vmem:[%s7324_s10 + $0x40] sm:$0xff]  }
 0x287   : > { %3942 = vmatpush2.bf16.msra.mxu0 %v4992_v9  ;;  %3439 = vmatprep.subr.bf16.mxu1 %v7503_v16 }
 0x288   : > { %3943 = vmatprep.subr.bf16.mxu0 %v7503_v16 }
 0x289   : > { %v2597_v29 = vpop.permute.xlu1 %2596  ;;  %v2850_v46 = vld [vmem:[#allocation2 + $0x48] sm:$0xff] }
 0x28a   : > { %2671 = vst.msk [vmem:[#allocation2 + $0xc0] sm:$0xf] %vm2648_vm6, %v2597_v29  ;;  %3440 = vmatpush1.bf16.msra.mxu1 %v4967_v7  ;;  %v5002_v7 = vld [vmem:[#allocation2 + $0x94] ss:$8 sps:$4 sm:$0xff]  }
 0x28b   : > { %3944 = vmatpush2.bf16.msra.mxu0 %v5000_v39  ;;  %3441 = vmatprep.subr.bf16.mxu1 %v7503_v16  ;;  %v5009_v39 = vld [vmem:[#allocation2 + $0x4] ss:$8 sps:$4 sm:$0xff]  }
 0x28c   : > { %v2571_v57 = vpop.permute.xlu0 %2570  ;;  %v2849_v49 = vld [vmem:[#allocation2 + $0x40] sm:$0xff]  ;;  %3945 = vmatprep.subr.bf16.mxu0 %v7503_v16 }
 0x28d   : > { %2658 = vst.msk [vmem:[#allocation2 + $0x58] sm:$0xf] %vm2648_vm6, %v2571_v57  ;;  %v6908_v2 = vcombine.low %v2849_v49, %v2850_v46  ;;  %v4993_v57 = vld [vmem:[#allocation2 + $0x84] ss:$8 sps:$4 sm:$0xff]  }
 0x28e   : > { %v2569_v1 = vpop.permute.xlu1 %2568  ;;  %3442 = vmatpush1.bf16.msra.mxu1 %v4971_v4 }
 0x28f   : > { %2657 = vst.msk [vmem:[#allocation2 + $0x50] sm:$0xf] %vm2648_vm6, %v2569_v1  ;;  %3245 = vmatmul.mubr.bf16.gmra.mxu0 %v6908_v2  ;;  %3443 = vmatprep.subr.bf16.mxu1 %v7503_v16  ;;  %v7016_v1 = vld [vmem:[#allocation2 + $0x104] ss:$8 sps:$4 sm:$0xff]  }
 0x290   : > { %v2603_v24 = vpop.permute.xlu0 %2602  ;;  %3946 = vmatpush2.bf16.msra.mxu0 %v5006_v33  ;;  %4520 = vmatprep.mubr.msk.bf16.mxu0 %vm499_vm0, %v6932_v23 }
 0x291   : > { %2674 = vst.msk [vmem:[#allocation2 + $0xd8] sm:$0xf] %vm2648_vm6, %v2603_v24  ;;  %v6924_v27 = vld [vmem:[#allocation2 + $0xc0] ss:$8 sps:$4 sm:$0xff]  }
 0x292   : > { %v2601_v58 = vpop.permute.xlu1 %2600  ;;  %3309 = vmatmul.mubr.bf16.gmra.mxu1 %v6924_v27 }
 0x293   : > { %2673 = vst.msk [vmem:[#allocation2 + $0xd0] sm:$0xf] %vm2648_vm6, %v2601_v58  ;;  %3444 = vmatpush1.bf16.msra.mxu1 %v4976_v22  ;;  %4528 = vmatprep.mubr.msk.bf16.mxu1 %vm499_vm0, %v6948_v61 }
 0x294   : > { %v2575_v60 = vpop.permute.xlu0 %2574  ;;  %v2852_v8 = vld [vmem:[#allocation2 + $0x58] sm:$0xff]  ;;  %3445 = vmatprep.subr.bf16.mxu1 %v7503_v16 }
 0x295   : > { %2660 = vst.msk [vmem:[#allocation2 + $0x68] sm:$0xf] %vm2648_vm6, %v2575_v60 }
 0x296   : > { %v2851_v18 = vld [vmem:[#allocation2 + $0x50] sm:$0xff] }
 0x297   : > { %v6938_v52 = vcombine.low %v2851_v18, %v2852_v8  ;;  %3446 = vmatpush1.bf16.msra.mxu1 %v4979_v15 }
 0x298   : > { %v2607_v11 = vpop.permute.xlu0 %2606  ;;  %3447 = vmatprep.subr.bf16.mxu1 %v7503_v16 }
 0x299   : > { %v2573_v32 = vpop.permute.xlu1 %2572  ;;  %2676 = vst.msk [vmem:[#allocation2 + $0xe8] sm:$0xf] %vm2648_vm6, %v2607_v11  ;;  %3253 = vmatmul.mubr.bf16.gmra.mxu0 %v6938_v52 }
 0x29a   : > { %2659 = vst.msk [vmem:[#allocation2 + $0x60] sm:$0xf] %vm2648_vm6, %v2573_v32  ;;  %v6950_v6 = vld [vmem:[#allocation2 + $0xd0] ss:$8 sps:$4 sm:$0xff]   ;;  %4521 = vmatprep.mubr.msk.bf16.mxu0 %vm499_vm0, %v6958_v34 }
 0x29b   : > { %3317 = vmatmul.mubr.bf16.gmra.mxu1 %v6950_v6 }
 0x29c   : > { %v2579_v14 = vpop.permute.xlu0 %2578  ;;  %v2854_v20 = vld [vmem:[#allocation2 + $0x68] sm:$0xff]  ;;  %3448 = vmatpush1.bf16.msra.mxu1 %v4986_v63  ;;  %4529 = vmatprep.mubr.msk.bf16.mxu1 %vm499_vm0, %v6974_v3 }
 0x29d   : > { %v2605_v12 = vpop.permute.xlu1 %2604  ;;  %2662 = vst.msk [vmem:[#allocation2 + $0x78] sm:$0xf] %vm2648_vm6, %v2579_v14  ;;  %3457 = vmatprep.subr.bf16.mxu1 %v7503_v16 }
 0x29e   : > { %2675 = vst.msk [vmem:[#allocation2 + $0xe0] sm:$0xf] %vm2648_vm6, %v2605_v12 }
 0x2a0   : > { %v2611_v13 = vpop.permute.xlu0 %2610  ;;  %3458 = vmatpush2.bf16.msra.mxu1 %v4991_v26 }
 0x2a1   : > { %v2577_v36 = vpop.permute.xlu1 %2576  ;;  %v2853_v25 = vld [vmem:[#allocation2 + $0x60] sm:$0xff]  ;;  %2678 = vst.msk [vmem:[#allocation2 + $0xf8] sm:$0xf] %vm2648_vm6, %v2611_v13  ;;  %3459 = vmatprep.subr.bf16.mxu1 %v7503_v16 }
 0x2a2   : > { %2661 = vst.msk [vmem:[#allocation2 + $0x70] sm:$0xf] %vm2648_vm6, %v2577_v36  ;;  %v6964_v21 = vcombine.low %v2853_v25, %v2854_v20 }
 0x2a4   : > { %3261 = vmatmul.mubr.bf16.gmra.mxu0 %v6964_v21  ;;  %v2856_v17 = vld [vmem:[#allocation2 + $0x78] sm:$0xff]  ;;  %3460 = vmatpush2.bf16.msra.mxu1 %v4996_v43 }
 0x2a5   : > { %v2609_v37 = vpop.permute.xlu1 %2608  ;;  %v6976_v54 = vld [vmem:[#allocation2 + $0xe0] ss:$8 sps:$4 sm:$0xff]   ;;  %v2583_v42 = vpop.permute.xlu0 %2582  ;;  %4522 = vmatprep.mubr.msk.bf16.mxu0 %vm499_vm0, %v6984_v38  ;;  %3461 = vmatprep.subr.bf16.mxu1 %v7503_v16 }
 0x2a6   : > { %2677 = vst.msk [vmem:[#allocation2 + $0xf0] sm:$0xf] %vm2648_vm6, %v2609_v37  ;;  %3325 = vmatmul.mubr.bf16.gmra.mxu1 %v6976_v54  ;;  %2664 = vst.msk [vmem:[#allocation2 + $0x88] sm:$0xf] %vm2648_vm6, %v2583_v42 }
 0x2a7   : > { %4530 = vmatprep.mubr.msk.bf16.mxu1 %vm499_vm0, %v7000_v51 }
 0x2a8   : > { %3462 = vmatpush2.bf16.msra.mxu1 %v5001_v19 }
 0x2a9   : > { %v2581_v56 = vpop.permute.xlu1 %2580  ;;  %v2855_v41 = vld [vmem:[#allocation2 + $0x70] sm:$0xff]  ;;  %v2615_v62 = vpop.permute.xlu0 %2614  ;;  %3463 = vmatprep.subr.bf16.mxu1 %v7503_v16  ;;  %v5007_v16 = vld [vmem:[#allocation2] ss:$8 sps:$4 sm:$0xff]  }
 0x2aa   : > { %2663 = vst.msk [vmem:[#allocation2 + $0x80] sm:$0xf] %vm2648_vm6, %v2581_v56  ;;  %v6990_v31 = vcombine.low %v2855_v41, %v2856_v17  ;;  %2680 = vst.msk [vmem:[#allocation2 + $0x108] sm:$0xf] %vm2648_vm6, %v2615_v62 }
 0x2ac   : > { %3269 = vmatmul.mubr.bf16.gmra.mxu0 %v6990_v31  ;;  %3464 = vmatpush2.bf16.msra.mxu1 %v5005_v0 }
 0x2ad   : > { %v2613_v28 = vpop.permute.xlu1 %2612  ;;  %v7002_v55 = vld [vmem:[#allocation2 + $0xf0] ss:$8 sps:$4 sm:$0xff]   ;;  %v2587_v9 = vpop.permute.xlu0 %2586  ;;  %4523 = vmatprep.mubr.msk.bf16.mxu0 %vm499_vm0, %v4993_v57 }
 0x2ae   : > { %2679 = vst.msk [vmem:[#allocation2 + $0x100] sm:$0xf] %vm2648_vm6, %v2613_v28  ;;  %3333 = vmatmul.mubr.bf16.gmra.mxu1 %v7002_v55  ;;  %2666 = vst.msk [vmem:[#allocation2 + $0x98] sm:$0xf] %vm2648_vm6, %v2587_v9 }
 0x2af   : > { %4531 = vmatprep.mubr.msk.bf16.mxu1 %vm499_vm0, %v7016_v1 }
 0x2b1   : > { %v2585_v29 = vpop.permute.xlu1 %2584  ;;  %v4995_v46 = vld [vmem:[#allocation2 + $0x80] ss:$8 sps:$4 sm:$0xff]  }
 0x2b2   : > { %2665 = vst.msk [vmem:[#allocation2 + $0x90] sm:$0xf] %vm2648_vm6, %v2585_v29 }
 0x2b4   : > { %3277 = vmatmul.mubr.bf16.gmra.mxu0 %v4995_v46 }
 0x2b5   : > { %v7018_v49 = vld [vmem:[#allocation2 + $0x100] ss:$8 sps:$4 sm:$0xff]   ;;  %4524 = vmatprep.mubr.msk.bf16.mxu0 %vm499_vm0, %v5002_v7 }
 0x2b6   : > { %3341 = vmatmul.mubr.bf16.gmra.mxu1 %v7018_v49 }
 0x2b7   : > { %4546 = vmatprep.mubr.msk.bf16.mxu1 %vm499_vm0, %v5009_v39 }
 0x2b9   : > { %v5004_v24 = vld [vmem:[#allocation2 + $0x90] ss:$8 sps:$4 sm:$0xff]  }
 0x2bc   : > { %3285 = vmatmul.mubr.bf16.gmra.mxu0 %v5004_v24 }
 0x2bd   : > { %4630 = vmatprep.mubr.msk.bf16.mxu0 %vm499_vm0, %v6813_v47 }
 0x2be   : > { %3466 = vmatmul.mubr.bf16.vlgmr.msra.gmra.mxu1 %v5007_v16 }
 0x2bf   : > { %4547 = vmatprep.mubr.msk.bf16.mxu1 %vm499_vm0, %v6807_v35 }
 0x2c4   : > { %3948 = vmatmul.mubr.bf16.vlgmr.msra.gmra.mxu0 %v6824_v48 }
 0x2c5   : > { %4631 = vmatprep.mubr.msk.bf16.mxu0 %vm499_vm0, %v6871_v5 }
 0x2c6   : > { %3474 = vmatmul.mubr.bf16.gmra.mxu1 %v6805_v10 }
 0x2c7   : > { %4548 = vmatprep.mubr.msk.bf16.mxu1 %vm499_vm0, %v6813_v47 }
 0x2cc   : > { %3956 = vmatmul.mubr.bf16.gmra.mxu0 %v6874_v40 }
 0x2cd   : > { %4632 = vmatprep.mubr.msk.bf16.mxu0 %vm499_vm0, %v6902_v59 }
 0x2ce   : > { %3482 = vmatmul.mubr.bf16.gmra.mxu1 %v6824_v48 }
 0x2cf   : > { %4549 = vmatprep.mubr.msk.bf16.mxu1 %vm499_vm0, %v6871_v5 }
 0x2d4   : > { %3964 = vmatmul.mubr.bf16.gmra.mxu0 %v6908_v2 }
 0x2d5   : > { %4633 = vmatprep.mubr.msk.bf16.mxu0 %vm499_vm0, %v6932_v23 }
 0x2d6   : > { %3490 = vmatmul.mubr.bf16.gmra.mxu1 %v6874_v40 }
 0x2d7   : > { %4550 = vmatprep.mubr.msk.bf16.mxu1 %vm499_vm0, %v6902_v59 }
 0x2dc   : > { %3972 = vmatmul.mubr.bf16.gmra.mxu0 %v6938_v52 }
 0x2dd   : > { %4634 = vmatprep.mubr.msk.bf16.mxu0 %vm499_vm0, %v6958_v34 }
 0x2de   : > { %3498 = vmatmul.mubr.bf16.gmra.mxu1 %v6908_v2 }
 0x2df   : > { %4551 = vmatprep.mubr.msk.bf16.mxu1 %vm499_vm0, %v6932_v23 }
 0x2e4   : > { %3980 = vmatmul.mubr.bf16.gmra.mxu0 %v6964_v21 }
 0x2e5   : > { %4635 = vmatprep.mubr.msk.bf16.mxu0 %vm499_vm0, %v6984_v38 }
 0x2e6   : > { %3506 = vmatmul.mubr.bf16.gmra.mxu1 %v6938_v52 }
 0x2e7   : > { %4552 = vmatprep.mubr.msk.bf16.mxu1 %vm499_vm0, %v6958_v34 }
 0x2ec   : > { %3988 = vmatmul.mubr.bf16.gmra.mxu0 %v6990_v31 }
 0x2ed   : > { %4636 = vmatprep.mubr.msk.bf16.mxu0 %vm499_vm0, %v4993_v57 }
 0x2ee   : > { %3514 = vmatmul.mubr.bf16.gmra.mxu1 %v6964_v21 }
 0x2ef   : > { %4553 = vmatprep.mubr.msk.bf16.mxu1 %vm499_vm0, %v6984_v38 }
 0x2f4   : > { %3996 = vmatmul.mubr.bf16.gmra.mxu0 %v4995_v46 }
 0x2f5   : > { %4637 = vmatprep.mubr.msk.bf16.mxu0 %vm499_vm0, %v5002_v7 }
 0x2f6   : > { %3522 = vmatmul.mubr.bf16.gmra.mxu1 %v6990_v31 }
 0x2f7   : > { %4554 = vmatprep.mubr.msk.bf16.mxu1 %vm499_vm0, %v4993_v57 }
 0x2fc   : > { %4004 = vmatmul.mubr.bf16.gmra.mxu0 %v5004_v24 }
 0x2fd   : > { %4638 = vmatprep.mubr.msk.bf16.mxu0 %vm499_vm0, %v6857_v53 }
 0x2fe   : > { %3530 = vmatmul.mubr.bf16.gmra.mxu1 %v4995_v46 }
 0x2ff   : > { %4555 = vmatprep.mubr.msk.bf16.mxu1 %vm499_vm0, %v5002_v7 }
 0x304   : > { %4012 = vmatmul.mubr.bf16.gmra.mxu0 %v6855_v44 }
 0x305   : > { %4639 = vmatprep.mubr.msk.bf16.mxu0 %vm499_vm0, %v6888_v50 }
 0x306   : > { %3538 = vmatmul.mubr.bf16.gmra.mxu1 %v5004_v24 }
 0x307   : > { %4556 = vmatprep.mubr.msk.bf16.mxu1 %vm499_vm0, %v6857_v53 }
 0x30c   : > { %4020 = vmatmul.mubr.bf16.gmra.mxu0 %v6890_v30 }
 0x30d   : > { %4640 = vmatprep.mubr.msk.bf16.mxu0 %vm499_vm0, %v6922_v45 }
 0x30e   : > { %3546 = vmatmul.mubr.bf16.gmra.mxu1 %v6855_v44  ;;  %v5010_v44 = vld [vmem:[#allocation2 + $0x114] ss:$8 sps:$4 sm:$0xff]  }
 0x30f   : > { %4557 = vmatprep.mubr.msk.bf16.mxu1 %vm499_vm0, %v6888_v50 }
 0x314   : > { %4028 = vmatmul.mubr.bf16.gmra.mxu0 %v6924_v27 }
 0x315   : > { %4641 = vmatprep.mubr.msk.bf16.mxu0 %vm499_vm0, %v6948_v61 }
 0x316   : > { %3554 = vmatmul.mubr.bf16.gmra.mxu1 %v6890_v30  ;;  %v5012_v30 = vld [vmem:[#allocation2 + $0x110] ss:$8 sps:$4 sm:$0xff]  }
 0x317   : > { %4558 = vmatprep.mubr.msk.bf16.mxu1 %vm499_vm0, %v6922_v45 }
 0x31c   : > { %4036 = vmatmul.mubr.bf16.gmra.mxu0 %v6950_v6 }
 0x31d   : > { %4642 = vmatprep.mubr.msk.bf16.mxu0 %vm499_vm0, %v6974_v3 }
 0x31e   : > { %3562 = vmatmul.mubr.bf16.gmra.mxu1 %v6924_v27 }
 0x31f   : > { %4559 = vmatprep.mubr.msk.bf16.mxu1 %vm499_vm0, %v6948_v61 }
 0x322   : > { %v7099_v10 = vpop.f32.mrf.mxu0 }
 0x324   : > { %4044 = vmatmul.mubr.bf16.gmra.mxu0 %v6976_v54  ;;  %v3224_v35 = vpop.f32.mrf.mxu0 }
 0x325   : > { %4643 = vmatprep.mubr.msk.bf16.mxu0 %vm499_vm0, %v7000_v51 }
 0x326   : > { %3570 = vmatmul.mubr.bf16.gmra.mxu1 %v6950_v6  ;;  %v7104_v47 = vpop.f32.mrf.mxu0 }
 0x327   : > { %4560 = vmatprep.mubr.msk.bf16.mxu1 %vm499_vm0, %v6974_v3 }
 0x328   : > { %v3227_v48 = vpop.f32.mrf.mxu0 }
 0x32a   : > { %v7109_v53 = vpop.f32.mrf.mxu0 }
 0x32c   : > { %4052 = vmatmul.mubr.bf16.gmra.mxu0 %v7002_v55  ;;  %v3232_v5 = vpop.f32.mrf.mxu0 }
 0x32d   : > { %4644 = vmatprep.mubr.msk.bf16.mxu0 %vm499_vm0, %v7016_v1 }
 0x32e   : > { %3578 = vmatmul.mubr.bf16.gmra.mxu1 %v6976_v54  ;;  %v7113_v40 = vpop.f32.mrf.mxu0 }
 0x32f   : > { %4561 = vmatprep.mubr.msk.bf16.mxu1 %vm499_vm0, %v7000_v51 }
 0x330   : > { %v3235_v50 = vpop.f32.mrf.mxu0 }
 0x334   : > { %4060 = vmatmul.mubr.bf16.gmra.mxu0 %v7018_v49 }
 0x335   : > { %4645 = vmatprep.mubr.msk.bf16.mxu0 %vm499_vm0, %v5010_v44 }
 0x336   : > { %3586 = vmatmul.mubr.bf16.gmra.mxu1 %v7002_v55 }
 0x33c   : > { %4068 = vmatmul.mubr.bf16.gmra.mxu0 %v5012_v30 }
 0x33d   : > { %v7116_v59 = vpop.f32.mrf.mxu1 }
 0x33f   : > { %v3296_v2 = vpop.f32.mrf.mxu1 }
 0x341   : > { %v7120_v4 = vpop.f32.mrf.mxu1 }
 0x343   : > { %v3299_v45 = vpop.f32.mrf.mxu1 }
 0x344   : > { %v7118_v33 = vpop.f32.mrf.mxu0 }
 0x345   : > { %v7124_v60 = vpop.f32.mrf.mxu1 }
 0x346   : > { %v3240_v58 = vpop.f32.mrf.mxu0 }
 0x347   : > { %v3304_v32 = vpop.f32.mrf.mxu1  ;;  %v7176_v58 = vld [vmem:[%s7325_s11] ss:$0 sm:$0xff] }
 0x348   : > { %v7122_v27 = vpop.f32.mrf.mxu0 }
 0x349   : > { %v7128_v23 = vpop.f32.mrf.mxu1 }
 0x34a   : > { %v3243_v8 = vpop.f32.mrf.mxu0 }
 0x34b   : > { %v3307_v52 = vpop.f32.mrf.mxu1 }
 0x34f   : > { %v7126_v18 = vpop.f32.mrf.mxu0 }
 0x351   : > { %v3248_v22 = vpop.f32.mrf.mxu0 }
 0x352   : > { %v7132_v15 = vpop.f32.mrf.mxu1 }
 0x353   : > { %v7130_v11 = vpop.f32.mrf.mxu0 }
 0x354   : > { %v3312_v61 = vpop.f32.mrf.mxu1 }
 0x355   : > { %v3251_v12 = vpop.f32.mrf.mxu0 }
 0x356   : > { %v7136_v14 = vpop.f32.mrf.mxu1 }
 0x358   : > { %v3315_v36 = vpop.f32.mrf.mxu1 }
 0x359   : > { %v7134_v6 = vpop.f32.mrf.mxu0 }
 0x35b   : > { %v3256_v20 = vpop.f32.mrf.mxu0  ;;  %v7140_v34 = vpop.f32.mrf.mxu1 }
 0x35d   : > { %v7138_v25 = vpop.f32.mrf.mxu0  ;;  %v3320_v21 = vpop.f32.mrf.mxu1 }
 0x35f   : > { %v3259_v63 = vpop.f32.mrf.mxu0  ;;  %v7144_v26 = vpop.f32.mrf.mxu1 }
 0x361   : > { %v3323_v3 = vpop.f32.mrf.mxu1 }
 0x364   : > { %v7142_v13 = vpop.f32.mrf.mxu0 }
 0x366   : > { %v3264_v37 = vpop.f32.mrf.mxu0  ;;  %v7148_v42 = vpop.f32.mrf.mxu1 }
 0x368   : > { %v7146_v54 = vpop.f32.mrf.mxu0  ;;  %v3328_v56 = vpop.f32.mrf.mxu1 }
 0x36a   : > { %v3267_v17 = vpop.f32.mrf.mxu0  ;;  %v7152_v38 = vpop.f32.mrf.mxu1 }
 0x36c   : > { %v7150_v41 = vpop.f32.mrf.mxu0  ;;  %v3331_v31 = vpop.f32.mrf.mxu1 }
 0x36e   : > { %v3272_v43 = vpop.f32.mrf.mxu0  ;;  %v7156_v19 = vpop.f32.mrf.mxu1 }
 0x370   : > { %v7154_v62 = vpop.f32.mrf.mxu0  ;;  %v3336_v51 = vpop.f32.mrf.mxu1 }
 0x372   : > { %v3275_v28 = vpop.f32.mrf.mxu0  ;;  %v7160_v9 = vpop.f32.mrf.mxu1 }
 0x374   : > { %v7158_v55 = vpop.f32.mrf.mxu0  ;;  %v3339_v29 = vpop.f32.mrf.mxu1 }
 0x376   : > { %v3280_v0 = vpop.f32.mrf.mxu0  ;;  %v7164_v46 = vpop.f32.mrf.mxu1 }
 0x378   : > { %v7162_v57 = vpop.f32.mrf.mxu0  ;;  %v3344_v1 = vpop.f32.mrf.mxu1 }
 0x37a   : > { %v3283_v39 = vpop.f32.mrf.mxu0  ;;  %v7168_v7 = vpop.f32.mrf.mxu1 }
 0x37c   : > { %v7166_v49 = vpop.f32.mrf.mxu0  ;;  %v3347_v16 = vpop.f32.mrf.mxu1 }
 0x37e   : > { %v3288_v24 = vpop.f32.mrf.mxu0  ;;  %v3467_v48 = vpop.f32.mrf.mxu1 }
 0x37f   : > { %v3468_v50 = vadd.f32 %v3467_v48, %v7099_v10 }
 0x380   : > { %v7170_v35 = vpop.f32.mrf.mxu0  ;;  %v3469_v5 = vpop.f32.mrf.mxu1 }
 0x382   : > { %v3291_v44 = vpop.f32.mrf.mxu0  ;;  %v3470_v30 = vpop.f32.mrf.mxu1 }
 0x383   : > { %v3471_v22 = vadd.f32 %v3470_v30, %v7104_v47 }
 0x384   : > { %v3949_v2 = vpop.f32.mrf.mxu0  ;;  %v3472_v8 = vpop.f32.mrf.mxu1 }
 0x385   : > { %v4076_v45 = vadd.f32 %v3949_v2, %v3468_v50 }
 0x386   : > { %v3951_v32 = vpop.f32.mrf.mxu0  ;;  %v3475_v10 = vpop.f32.mrf.mxu1 }
 0x387   : > { %v4115_v52 = vadd.f32 %v7176_v58, %v4076_v45  ;;  %v3476_v21 = vadd.f32 %v3475_v10, %v7109_v53 }
 0x388   : > { %v3952_v12 = vpop.f32.mrf.mxu0  ;;  %v3477_v36 = vpop.f32.mrf.mxu1 }
 0x389   : > { %v4147_v61 = vmax.f32 %v4115_v52, 0.0  ;;  %v4077_v20 = vadd.f32 %v3952_v12, %v3471_v22 }
 0x38a   : > { %v3954_v63 = vpop.f32.mrf.mxu0  ;;  %v3478_v37 = vpop.f32.mrf.mxu1 }
 0x38b   : > { %4179 = vst.msk [vmem:[%s7184_s23] sm:$0xff] %vm499_vm0, %v4147_v61  ;;  %v4116_v47 = vadd.f32 %v7176_v58, %v4077_v20  ;;  %v3479_v28 = vadd.f32 %v3478_v37, %v7113_v40 }
 0x38c   : > { %v3957_v3 = vpop.f32.mrf.mxu0  ;;  %v3480_v43 = vpop.f32.mrf.mxu1 }
 0x38d   : > { %v4148_v17 = vmax.f32 %v4116_v47, 0.0  ;;  %v4078_v56 = vadd.f32 %v3957_v3, %v3476_v21 }
 0x38e   : > { %v3959_v31 = vpop.f32.mrf.mxu0  ;;  %v3483_v0 = vpop.f32.mrf.mxu1 }
 0x38f   : > { %4180 = vst.msk [vmem:[%s7184_s23 + $0x8] sm:$0xff] %vm499_vm0, %v4148_v17  ;;  %v4117_v51 = vadd.f32 %v7176_v58, %v4078_v56  ;;  %v3484_v16 = vadd.f32 %v3483_v0, %v7118_v33 }
 0x390   : > { %v3960_v29 = vpop.f32.mrf.mxu0  ;;  %v3485_v1 = vpop.f32.mrf.mxu1 }
 0x391   : > { %v4149_v39 = vmax.f32 %v4117_v51, 0.0  ;;  %v4079_v53 = vadd.f32 %v3960_v29, %v3479_v28 }
 0x392   : > { %v3962_v24 = vpop.f32.mrf.mxu0  ;;  %v3486_v44 = vpop.f32.mrf.mxu1 }
 0x393   : > { %4181 = vst.msk [vmem:[%s7184_s23 + $0x10] sm:$0xff] %vm499_vm0, %v4149_v39  ;;  %v4118_v48 = vadd.f32 %v7176_v58, %v4079_v53  ;;  %v3487_v45 = vadd.f32 %v3486_v44, %v7122_v27 }
 0x394   : > { %v3965_v5 = vpop.f32.mrf.mxu0  ;;  %v3488_v30 = vpop.f32.mrf.mxu1 }
 0x395   : > { %v4150_v50 = vmax.f32 %v4118_v48, 0.0  ;;  %v4080_v40 = vadd.f32 %v3965_v5, %v3484_v16 }
 0x396   : > { %v3967_v2 = vpop.f32.mrf.mxu0  ;;  %v3491_v32 = vpop.f32.mrf.mxu1 }
 0x397   : > { %4182 = vst.msk [vmem:[%s7184_s23 + $0x18] sm:$0xff] %vm499_vm0, %v4150_v50  ;;  %v4119_v8 = vadd.f32 %v7176_v58, %v4080_v40  ;;  %v3492_v61 = vadd.f32 %v3491_v32, %v7126_v18 }
 0x398   : > { %v3968_v22 = vpop.f32.mrf.mxu0  ;;  %v3493_v10 = vpop.f32.mrf.mxu1 }
 0x399   : > { %v4151_v52 = vmax.f32 %v4119_v8, 0.0  ;;  %v4081_v33 = vadd.f32 %v3968_v22, %v3487_v45 }
 0x39a   : > { %v3970_v12 = vpop.f32.mrf.mxu0  ;;  %v3494_v36 = vpop.f32.mrf.mxu1 }
 0x39b   : > { %4183 = vst.msk [vmem:[%s7184_s23 + $0x20] sm:$0xff] %vm499_vm0, %v4151_v52  ;;  %v4120_v20 = vadd.f32 %v7176_v58, %v4081_v33  ;;  %v3495_v3 = vadd.f32 %v3494_v36, %v7130_v11 }
 0x39c   : > { %v3973_v63 = vpop.f32.mrf.mxu0  ;;  %v3496_v47 = vpop.f32.mrf.mxu1 }
 0x39d   : > { %v4152_v21 = vmax.f32 %v4120_v20, 0.0  ;;  %v4082_v27 = vadd.f32 %v3973_v63, %v3492_v61 }
 0x39e   : > { %v3975_v37 = vpop.f32.mrf.mxu0  ;;  %v3499_v56 = vpop.f32.mrf.mxu1 }
 0x39f   : > { %4184 = vst.msk [vmem:[%s7184_s23 + $0x28] sm:$0xff] %vm499_vm0, %v4152_v21  ;;  %v4121_v17 = vadd.f32 %v7176_v58, %v4082_v27  ;;  %v3500_v0 = vadd.f32 %v3499_v56, %v7134_v6 }
 0x3a0   : > { %v3976_v43 = vpop.f32.mrf.mxu0  ;;  %v3501_v28 = vpop.f32.mrf.mxu1 }
 0x3a1   : > { %v4153_v31 = vmax.f32 %v4121_v17, 0.0  ;;  %v4083_v18 = vadd.f32 %v3976_v43, %v3495_v3 }
 0x3a2   : > { %v3978_v51 = vpop.f32.mrf.mxu0  ;;  %v3502_v39 = vpop.f32.mrf.mxu1 }
 0x3a3   : > { %4185 = vst.msk [vmem:[%s7184_s23 + $0x30] sm:$0xff] %vm499_vm0, %v4153_v31  ;;  %v4122_v29 = vadd.f32 %v7176_v58, %v4083_v18  ;;  %v3503_v48 = vadd.f32 %v3502_v39, %v7138_v25 }
 0x3a4   : > { %v3981_v53 = vpop.f32.mrf.mxu0  ;;  %v3504_v24 = vpop.f32.mrf.mxu1 }
 0x3a5   : > { %v4154_v1 = vmax.f32 %v4122_v29, 0.0  ;;  %v4084_v11 = vadd.f32 %v3981_v53, %v3500_v0 }
 0x3a6   : > { %v3983_v16 = vpop.f32.mrf.mxu0  ;;  %v3507_v5 = vpop.f32.mrf.mxu1 }
 0x3a7   : > { %4186 = vst.msk [vmem:[%s7184_s23 + $0x38] sm:$0xff] %vm499_vm0, %v4154_v1  ;;  %v4123_v44 = vadd.f32 %v7176_v58, %v4084_v11  ;;  %v3508_v45 = vadd.f32 %v3507_v5, %v7142_v13 }
 0x3a8   : > { %v3984_v50 = vpop.f32.mrf.mxu0  ;;  %v3509_v30 = vpop.f32.mrf.mxu1 }
 0x3a9   : > { %v4155_v40 = vmax.f32 %v4123_v44, 0.0  ;;  %v4085_v6 = vadd.f32 %v3984_v50, %v3503_v48 }
 0x3aa   : > { %v3986_v2 = vpop.f32.mrf.mxu0  ;;  %v3510_v32 = vpop.f32.mrf.mxu1 }
 0x3ab   : > { %4187 = vst.msk [vmem:[%s7184_s23 + $0x40] sm:$0xff] %vm499_vm0, %v4155_v40  ;;  %v4124_v8 = vadd.f32 %v7176_v58, %v4085_v6  ;;  %v3511_v12 = vadd.f32 %v3510_v32, %v7146_v54 }
 0x3ac   : > { %v3989_v22 = vpop.f32.mrf.mxu0  ;;  %v3512_v33 = vpop.f32.mrf.mxu1 }
 0x3ad   : > { %v4156_v52 = vmax.f32 %v4124_v8, 0.0  ;;  %v4086_v25 = vadd.f32 %v3989_v22, %v3508_v45 }
 0x3ae   : > { %v3991_v10 = vpop.f32.mrf.mxu0  ;;  %v3515_v20 = vpop.f32.mrf.mxu1 }
 0x3af   : > { %4188 = vst.msk [vmem:[%s7184_s23 + $0x48] sm:$0xff] %vm499_vm0, %v4156_v52  ;;  %v4125_v61 = vadd.f32 %v7176_v58, %v4086_v25  ;;  %v3516_v47 = vadd.f32 %v3515_v20, %v7150_v41 }
 0x3b0   : > { %v3992_v36 = vpop.f32.mrf.mxu0  ;;  %v3517_v21 = vpop.f32.mrf.mxu1 }
 0x3b1   : > { %v4157_v63 = vmax.f32 %v4125_v61, 0.0  ;;  %v4087_v13 = vadd.f32 %v3992_v36, %v3511_v12 }
 0x3b2   : > { %v3994_v27 = vpop.f32.mrf.mxu0  ;;  %v3518_v3 = vpop.f32.mrf.mxu1 }
 0x3b3   : > { %4189 = vst.msk [vmem:[%s7184_s23 + $0x50] sm:$0xff] %vm499_vm0, %v4157_v63  ;;  %v4126_v37 = vadd.f32 %v7176_v58, %v4087_v13  ;;  %v3519_v18 = vadd.f32 %v3518_v3, %v7154_v62 }
 0x3b4   : > { %v3997_v17 = vpop.f32.mrf.mxu0  ;;  %v3520_v43 = vpop.f32.mrf.mxu1 }
 0x3b5   : > { %v4158_v56 = vmax.f32 %v4126_v37, 0.0  ;;  %v4088_v54 = vadd.f32 %v3997_v17, %v3516_v47 }
 0x3b6   : > { %v3999_v31 = vpop.f32.mrf.mxu0  ;;  %v3523_v51 = vpop.f32.mrf.mxu1 }
 0x3b7   : > { %4190 = vst.msk [vmem:[%s7184_s23 + $0x58] sm:$0xff] %vm499_vm0, %v4158_v56  ;;  %v4127_v28 = vadd.f32 %v7176_v58, %v4088_v54  ;;  %v3524_v1 = vadd.f32 %v3523_v51, %v7158_v55 }
 0x3b8   : > { %v4000_v0 = vpop.f32.mrf.mxu0  ;;  %v3525_v39 = vpop.f32.mrf.mxu1 }
 0x3b9   : > { %v4159_v29 = vmax.f32 %v4127_v28, 0.0  ;;  %v4089_v41 = vadd.f32 %v4000_v0, %v3519_v18 }
 0x3ba   : > { %v4002_v53 = vpop.f32.mrf.mxu0  ;;  %v3526_v24 = vpop.f32.mrf.mxu1 }
 0x3bb   : > { %4191 = vst.msk [vmem:[%s7184_s23 + $0x60] sm:$0xff] %vm499_vm0, %v4159_v29  ;;  %v4128_v11 = vadd.f32 %v7176_v58, %v4089_v41  ;;  %v3527_v50 = vadd.f32 %v3526_v24, %v7162_v57 }
 0x3bc   : > { %v4005_v16 = vpop.f32.mrf.mxu0  ;;  %v3528_v44 = vpop.f32.mrf.mxu1 }
 0x3bd   : > { %v4160_v48 = vmax.f32 %v4128_v11, 0.0  ;;  %v4090_v62 = vadd.f32 %v4005_v16, %v3524_v1 }
 0x3be   : > { %v4007_v5 = vpop.f32.mrf.mxu0  ;;  %v3531_v6 = vpop.f32.mrf.mxu1 }
 0x3bf   : > { %4192 = vst.msk [vmem:[%s7184_s23 + $0x68] sm:$0xff] %vm499_vm0, %v4160_v48  ;;  %v4129_v40 = vadd.f32 %v7176_v58, %v4090_v62  ;;  %v3532_v32 = vadd.f32 %v3531_v6, %v7166_v49 }
 0x3c0   : > { %v4008_v30 = vpop.f32.mrf.mxu0  ;;  %v3533_v45 = vpop.f32.mrf.mxu1 }
 0x3c1   : > { %v4161_v2 = vmax.f32 %v4129_v40, 0.0  ;;  %v4091_v55 = vadd.f32 %v4008_v30, %v3527_v50 }
 0x3c2   : > { %v4010_v8 = vpop.f32.mrf.mxu0  ;;  %v3534_v52 = vpop.f32.mrf.mxu1 }
 0x3c3   : > { %4193 = vst.msk [vmem:[%s7184_s23 + $0x70] sm:$0xff] %vm499_vm0, %v4161_v2  ;;  %v4130_v22 = vadd.f32 %v7176_v58, %v4091_v55  ;;  %v3535_v61 = vadd.f32 %v3534_v52, %v7170_v35 }
 0x3c4   : > { %v4013_v25 = vpop.f32.mrf.mxu0  ;;  %v3536_v10 = vpop.f32.mrf.mxu1 }
 0x3c5   : > { %v4162_v33 = vmax.f32 %v4130_v22, 0.0  ;;  %v4092_v57 = vadd.f32 %v4013_v25, %v3532_v32 }
 0x3c6   : > { %v4015_v12 = vpop.f32.mrf.mxu0  ;;  %v3539_v36 = vpop.f32.mrf.mxu1 }
 0x3c7   : > { %4194 = vst.msk [vmem:[%s7184_s23 + $0x78] sm:$0xff] %vm499_vm0, %v4162_v33  ;;  %v4131_v20 = vadd.f32 %v7176_v58, %v4092_v57  ;;  %v3540_v47 = vadd.f32 %v3539_v36, %v7116_v59 }
 0x3c8   : > { %v4016_v63 = vpop.f32.mrf.mxu0  ;;  %v3541_v21 = vpop.f32.mrf.mxu1 }
 0x3c9   : > { %v4163_v13 = vmax.f32 %v4131_v20, 0.0  ;;  %v4093_v49 = vadd.f32 %v4016_v63, %v3535_v61 }
 0x3ca   : > { %v4018_v27 = vpop.f32.mrf.mxu0  ;;  %v3542_v3 = vpop.f32.mrf.mxu1 }
 0x3cb   : > { %4195 = vst.msk [vmem:[%s7184_s23 + $0x80] sm:$0xff] %vm499_vm0, %v4163_v13  ;;  %v4132_v37 = vadd.f32 %v7176_v58, %v4093_v49  ;;  %v3543_v31 = vadd.f32 %v3542_v3, %v7120_v4 }
 0x3cc   : > { %v4021_v17 = vpop.f32.mrf.mxu0  ;;  %v3544_v54 = vpop.f32.mrf.mxu1 }
 0x3cd   : > { %v4164_v56 = vmax.f32 %v4132_v37, 0.0  ;;  %v4094_v35 = vadd.f32 %v4021_v17, %v3540_v47 }
 0x3ce   : > { %v4023_v43 = vpop.f32.mrf.mxu0  ;;  %v3547_v28 = vpop.f32.mrf.mxu1 }
 0x3cf   : > { %4196 = vst.msk [vmem:[%s7184_s23 + $0x88] sm:$0xff] %vm499_vm0, %v4164_v56  ;;  %v4133_v18 = vadd.f32 %v7176_v58, %v4094_v35  ;;  %v3548_v39 = vadd.f32 %v3547_v28, %v7124_v60 }
 0x3d0   : > { %v4024_v51 = vpop.f32.mrf.mxu0  ;;  %v3549_v29 = vpop.f32.mrf.mxu1 }
 0x3d1   : > { %v4165_v0 = vmax.f32 %v4133_v18, 0.0  ;;  %v4095_v59 = vadd.f32 %v4024_v51, %v3543_v31 }
 0x3d2   : > { %v4026_v41 = vpop.f32.mrf.mxu0  ;;  %v3550_v1 = vpop.f32.mrf.mxu1 }
 0x3d3   : > { %4197 = vst.msk [vmem:[%s7184_s23 + $0x90] sm:$0xff] %vm499_vm0, %v4165_v0  ;;  %v4134_v53 = vadd.f32 %v7176_v58, %v4095_v59  ;;  %v3551_v62 = vadd.f32 %v3550_v1, %v7128_v23 }
 0x3d4   : > { %v4029_v11 = vpop.f32.mrf.mxu0  ;;  %v3552_v16 = vpop.f32.mrf.mxu1 }
 0x3d5   : > { %v4166_v24 = vmax.f32 %v4134_v53, 0.0  ;;  %v4096_v4 = vadd.f32 %v4029_v11, %v3548_v39 }
 0x3d6   : > { %v4031_v48 = vpop.f32.mrf.mxu0  ;;  %v3555_v5 = vpop.f32.mrf.mxu1 }
 0x3d7   : > { %4198 = vst.msk [vmem:[%s7184_s23 + $0x98] sm:$0xff] %vm499_vm0, %v4166_v24  ;;  %v4135_v44 = vadd.f32 %v7176_v58, %v4096_v4  ;;  %v3556_v2 = vadd.f32 %v3555_v5, %v7132_v15 }
 0x3d8   : > { %v4032_v50 = vpop.f32.mrf.mxu0  ;;  %v3557_v6 = vpop.f32.mrf.mxu1 }
 0x3d9   : > { %v4167_v40 = vmax.f32 %v4135_v44, 0.0  ;;  %v4097_v60 = vadd.f32 %v4032_v50, %v3551_v62 }
 0x3da   : > { %v4034_v30 = vpop.f32.mrf.mxu0  ;;  %v3558_v45 = vpop.f32.mrf.mxu1 }
 0x3db   : > { %4199 = vst.msk [vmem:[%s7184_s23 + $0xa0] sm:$0xff] %vm499_vm0, %v4167_v40  ;;  %v4136_v55 = vadd.f32 %v7176_v58, %v4097_v60  ;;  %v3559_v25 = vadd.f32 %v3558_v45, %v7136_v14 }
 0x3dc   : > { %v4037_v8 = vpop.f32.mrf.mxu0  ;;  %v3560_v22 = vpop.f32.mrf.mxu1 }
 0x3dd   : > { %v4168_v32 = vmax.f32 %v4136_v55, 0.0  ;;  %v4098_v23 = vadd.f32 %v4037_v8, %v3556_v2 }
 0x3de   : > { %v4039_v52 = vpop.f32.mrf.mxu0  ;;  %v3563_v57 = vpop.f32.mrf.mxu1 }
 0x3df   : > { %4200 = vst.msk [vmem:[%s7184_s23 + $0xa8] sm:$0xff] %vm499_vm0, %v4168_v32  ;;  %v4137_v33 = vadd.f32 %v7176_v58, %v4098_v23  ;;  %v3564_v36 = vadd.f32 %v3563_v57, %v7140_v34 }
 0x3e0   : > { %v4040_v10 = vpop.f32.mrf.mxu0  ;;  %v3565_v61 = vpop.f32.mrf.mxu1 }
 0x3e1   : > { %v4169_v12 = vmax.f32 %v4137_v33, 0.0  ;;  %v4099_v15 = vadd.f32 %v4040_v10, %v3559_v25 }
 0x3e2   : > { %v4042_v20 = vpop.f32.mrf.mxu0  ;;  %v3566_v13 = vpop.f32.mrf.mxu1 }
 0x3e3   : > { %4201 = vst.msk [vmem:[%s7184_s23 + $0xb0] sm:$0xff] %vm499_vm0, %v4169_v12  ;;  %v4138_v63 = vadd.f32 %v7176_v58, %v4099_v15  ;;  %v3567_v37 = vadd.f32 %v3566_v13, %v7144_v26 }
 0x3e4   : > { %v4045_v49 = vpop.f32.mrf.mxu0  ;;  %v3568_v27 = vpop.f32.mrf.mxu1 }
 0x3e5   : > { %v4170_v21 = vmax.f32 %v4138_v63, 0.0  ;;  %v4100_v14 = vadd.f32 %v4045_v49, %v3564_v36 }
 0x3e6   : > { %v4047_v47 = vpop.f32.mrf.mxu0  ;;  %v3571_v17 = vpop.f32.mrf.mxu1 }
 0x3e7   : > { %4202 = vst.msk [vmem:[%s7184_s23 + $0xb8] sm:$0xff] %vm499_vm0, %v4170_v21  ;;  %v4139_v3 = vadd.f32 %v7176_v58, %v4100_v14  ;;  %v3572_v31 = vadd.f32 %v3571_v17, %v7148_v42 }
 0x3e8   : > { %v4048_v56 = vpop.f32.mrf.mxu0  ;;  %v3573_v54 = vpop.f32.mrf.mxu1 }
 0x3e9   : > { %v4171_v35 = vmax.f32 %v4139_v3, 0.0  ;;  %v4101_v34 = vadd.f32 %v4048_v56, %v3567_v37 }
 0x3ea   : > { %v4050_v43 = vpop.f32.mrf.mxu0  ;;  %v3574_v28 = vpop.f32.mrf.mxu1 }
 0x3eb   : > { %4203 = vst.msk [vmem:[%s7184_s23 + $0xc0] sm:$0xff] %vm499_vm0, %v4171_v35  ;;  %v4140_v18 = vadd.f32 %v7176_v58, %v4101_v34  ;;  %v3575_v41 = vadd.f32 %v3574_v28, %v7152_v38 }
 0x3ec   : > { %v4053_v51 = vpop.f32.mrf.mxu0  ;;  %v3576_v59 = vpop.f32.mrf.mxu1 }
 0x3ed   : > { %v4172_v0 = vmax.f32 %v4140_v18, 0.0  ;;  %v4102_v26 = vadd.f32 %v4053_v51, %v3572_v31 }
 0x3ee   : > { %v4055_v29 = vpop.f32.mrf.mxu0  ;;  %v3579_v53 = vpop.f32.mrf.mxu1 }
 0x3ef   : > { %4204 = vst.msk [vmem:[%s7184_s23 + $0xc8] sm:$0xff] %vm499_vm0, %v4172_v0  ;;  %v4141_v39 = vadd.f32 %v7176_v58, %v4102_v26  ;;  %v3580_v16 = vadd.f32 %v3579_v53, %v7156_v19 }
 0x3f0   : > { %v4056_v1 = vpop.f32.mrf.mxu0  ;;  %v3581_v24 = vpop.f32.mrf.mxu1 }
 0x3f1   : > { %v4173_v11 = vmax.f32 %v4141_v39, 0.0  ;;  %v4103_v42 = vadd.f32 %v4056_v1, %v3575_v41 }
 0x3f2   : > { %v4058_v4 = vpop.f32.mrf.mxu0  ;;  %v3582_v62 = vpop.f32.mrf.mxu1 }
 0x3f3   : > { %4205 = vst.msk [vmem:[%s7184_s23 + $0xd0] sm:$0xff] %vm499_vm0, %v4173_v11  ;;  %v4142_v48 = vadd.f32 %v7176_v58, %v4103_v42  ;;  %v3583_v60 = vadd.f32 %v3582_v62, %v7160_v9 }
 0x3f4   : > { %v4061_v44 = vpop.f32.mrf.mxu0  ;;  %v3584_v50 = vpop.f32.mrf.mxu1 }
 0x3f5   : > { %v4174_v5 = vmax.f32 %v4142_v48, 0.0  ;;  %v4104_v38 = vadd.f32 %v4061_v44, %v3580_v16 }
 0x3f6   : > { %v4063_v40 = vpop.f32.mrf.mxu0  ;;  %v3587_v30 = vpop.f32.mrf.mxu1 }
 0x3f7   : > { %4206 = vst.msk [vmem:[%s7184_s23 + $0xd8] sm:$0xff] %vm499_vm0, %v4174_v5  ;;  %v4143_v6 = vadd.f32 %v7176_v58, %v4104_v38  ;;  %v3588_v32 = vadd.f32 %v3587_v30, %v7164_v46 }
 0x3f8   : > { %v4064_v2 = vpop.f32.mrf.mxu0  ;;  %v3589_v45 = vpop.f32.mrf.mxu1 }
 0x3f9   : > { %v4175_v55 = vmax.f32 %v4143_v6, 0.0  ;;  %v4105_v19 = vadd.f32 %v4064_v2, %v3583_v60 }
 0x3fa   : > { %v4066_v8 = vpop.f32.mrf.mxu0  ;;  %v3590_v22 = vpop.f32.mrf.mxu1 }
 0x3fb   : > { %4207 = vst.msk [vmem:[%s7184_s23 + $0xe0] sm:$0xff] %vm499_vm0, %v4175_v55  ;;  %v4144_v23 = vadd.f32 %v7176_v58, %v4105_v19  ;;  %v3591_v10 = vadd.f32 %v3590_v22, %v7168_v7 }
 0x3fc   : > { %v4069_v52 = vpop.f32.mrf.mxu0  ;;  %v3592_v33 = vpop.f32.mrf.mxu1 }
 0x3fd   : > { %v4176_v9 = vmax.f32 %v4144_v23, 0.0  ;;  %v4106_v25 = vadd.f32 %v4069_v52, %v3588_v32 }
 0x3fe   : > { %v4071_v57 = vpop.f32.mrf.mxu0 }
 0x3ff   : > { %4208 = vst.msk [vmem:[%s7184_s23 + $0xe8] sm:$0xff] %vm499_vm0, %v4176_v9  ;;  %v4145_v12 = vadd.f32 %v7176_v58, %v4106_v25 }
 0x400   : > { %v4072_v15 = vpop.f32.mrf.mxu0 }
 0x401   : > { %v4177_v61 = vmax.f32 %v4145_v12, 0.0  ;;  %v4107_v20 = vadd.f32 %v4072_v15, %v3591_v10 }
 0x402   : > { %v4074_v36 = vpop.f32.mrf.mxu0 }
 0x403   : > { %4209 = vst.msk [vmem:[%s7184_s23 + $0xf0] sm:$0xff] %vm499_vm0, %v4177_v61  ;;  %v4146_v46 = vadd.f32 %v7176_v58, %v4107_v20 }
 0x405   : > { %v4178_v63 = vmax.f32 %v4146_v46, 0.0 }
 0x407   : > { %4210 = vst.msk [vmem:[%s7184_s23 + $0xf8] sm:$0xff] %vm499_vm0, %v4178_v63 }
 0x408 PF: > { %s22_s21 = sadd.s32 1, %s5183_s21  }
 0x409   : > { %p19_p4 = scmp.ge.s32.totalorder %s22_s21, 4  }
 0x40b   :  { %21 = sbr.rel (!%p19_p4) target bundleno = 1 (0x1), region = 103 }

</bundles_post_ra>
